<compile_context>
chip_gen: v7x
topology: tpu7x:2x2x1
jax: 0.10.0
libtpu: 0.0.40
codegen_flags: <defaults>
</compile_context>

<pallas_src>
import functools

import jax
import jax.numpy as jnp
import numpy as np
from jax.experimental import pallas as pl
from jax.experimental.pallas import tpu as pltpu


# ----------------------------------------------------------------------------
# In-kernel building blocks (channel-major layout: activations are (C, lanes)).
# ----------------------------------------------------------------------------
def _dsconv_mxu(x, w2t_ref, mask_ref, *, k, padding, W):
    """Depthwise-separable conv as ONE MXU matmul on a lane-concatenated slab.

    x:        (C_in, L) activations, L = B_blk * H*W (samples concatenated on lanes).
    w2t_ref:  (C_out, k*k*C_in) folded weights, W2T[co, t*C_in+ci] = wdw[t,ci]*wpw[ci,co].
    mask_ref: (k*k, L) 0/1 tap-validity masks (tiled per sample, same dtype as x).
    Each tap is a pltpu.roll of the slab (XLU slot, no padded scratch / unaligned slices);
    the masks implement the conv's zero padding AND zero every lane the circular roll
    wraps across sample / array boundaries (wrapped reads only occur at spatially
    out-of-bounds taps, which are exactly the masked positions).
    Returns (C_out, L) f32 stride-1 'same' conv output, bias NOT added.
    """
    L = x.shape[1]
    masks = mask_ref[...]
    cols = []
    for kh in range(k):
        for kw in range(k):
            t = kh * k + kw
            off = (kh - padding) * W + (kw - padding)          # flat spatial tap offset
            xs = x if off == 0 else pltpu.roll(x, shift=(-off) % L, axis=1)
            if not (kh == padding and kw == padding):          # center tap always valid
                xs = xs * masks[t:t + 1, :]
            cols.append(xs)
    xcol = jnp.concatenate(cols, axis=0)                       # (k*k*C_in, L)
    if xcol.dtype != w2t_ref.dtype:                            # v5e path: one cast at MXU
        xcol = xcol.astype(w2t_ref.dtype)
    return jnp.dot(w2t_ref[...], xcol, preferred_element_type=jnp.float32)


def _groupnorm_bias_relu(a, cst_ref, gm_ref, *, gsize, eps):
    """pointwise-bias + GroupNorm + ReLU on ONE sample's (C, S) conv output.

    cst_ref: (C, 3) packed [pointwise bias, GN gamma, GN beta].
    gm_ref:  (C, C) 0/1 group-membership matrix (hosted); only read when gsize > 1.
    The bias is folded into the GN statistics and the final shift; gamma/beta fuse into a
    single scale/shift FMA over the activation.
    """
    C, S = a.shape
    b, gam, bet = cst_ref[:, 0:1], cst_ref[:, 1:2], cst_ref[:, 2:3]
    m = jnp.sum(a, axis=1, keepdims=True)                      # (C,1)  sum_s a
    q = jnp.sum(a * a, axis=1, keepdims=True)                  # (C,1)  sum_s a^2
    sm = m + S * b                                             # sum_s (a + bias)
    sq = q + 2.0 * b * m + S * (b * b)                         # sum_s (a + bias)^2
    if gsize == 1:                                             # e.g. GroupNorm(32, 32)
        mean_g = sm * (1.0 / S)
        msq_g = sq * (1.0 / S)
    else:                                                      # hosted group-average matmul
        st = jnp.concatenate([sm, sq], axis=1)                 # (C, 2)
        gs = jnp.dot(gm_ref[...], st,
                     preferred_element_type=jnp.float32) * (1.0 / (gsize * S))
        mean_g, msq_g = gs[:, 0:1], gs[:, 1:2]
    var_g = jnp.maximum(msq_g - mean_g * mean_g, 0.0)          # never rsqrt(negative)
    inv = jax.lax.rsqrt(var_g + eps)
    scale = gam * inv                                          # (C, 1)
    shift = bet + (b - mean_g) * scale                         # bias + GN affine folded
    return jnp.maximum(a * scale + shift, 0.0)                 # single FMA + ReLU


def _sepconv_kernel(x_ref, dsel_ref,
                    msk1_ref, w2t1_ref, cst1_ref, gm1_ref,
                    msk2_ref, w2t2_ref, cst2_ref, gm2_ref,
                    o_ref,
                    *, k, padding, stride, W, Wo, S_out, eps,
                    gsize1, gsize2, ew_dtype, nb):
    # Lane-concatenate the nb samples of this grid step: (nb, C_in, S_in) -> (C_in, nb*S_in)
    xs = [x_ref[b].astype(ew_dtype) for b in range(nb)]
    xslab = xs[0] if nb == 1 else jnp.concatenate(xs, axis=1)

    # ---- DilConv block 1: C_in -> C_mid at `stride` ----
    acc1 = _dsconv_mxu(xslab, w2t1_ref, msk1_ref, k=k, padding=padding, W=W)
    if stride > 1:   # strided conv == stride-1 'same' conv + block-diag lane decimation
        acc1 = jnp.dot(acc1, dsel_ref[...], preferred_element_type=jnp.float32)

    y1_parts = []
    for b in range(nb):                                        # per-sample GN statistics
        a = acc1[:, b * S_out:(b + 1) * S_out]
        y1_parts.append(_groupnorm_bias_relu(a, cst1_ref, gm1_ref, gsize=gsize1, eps=eps))
    y1 = (y1_parts[0] if nb == 1 else jnp.concatenate(y1_parts, axis=1)).astype(ew_dtype)

    # ---- DilConv block 2: C_mid -> C_out, stride 1 (y1 never leaves VMEM) ----
    acc2 = _dsconv_mxu(y1, w2t2_ref, msk2_ref, k=k, padding=padding, W=Wo)
    for b in range(nb):
        a = acc2[:, b * S_out:(b + 1) * S_out]
        o_ref[b] = _groupnorm_bias_relu(a, cst2_ref, gm2_ref, gsize=gsize2, eps=eps)


# ----------------------------------------------------------------------------
# Host-side helpers (all constants, built once per call at trace time).
# ----------------------------------------------------------------------------
def _fold_dw_pw(wdw, wpw, mxu_dtype):
    """Fold depthwise taps into the pointwise weights (exact: both linear)."""
    k, _, C_in = wdw.shape
    C_out = wpw.shape[1]
    w2 = wdw.reshape(k * k, C_in)[:, :, None] * wpw[None, :, :]      # (k*k, C_in, C_out)
    w2t = jnp.transpose(w2, (2, 0, 1)).reshape(C_out, k * k * C_in)  # (C_out, k*k*C_in)
    return w2t.astype(mxu_dtype)


def _tap_masks(H, W, k, padding, nb, dtype):
    """(k*k, nb*H*W) 0/1 masks: zero-padding semantics + roll-wrap zeroing, per sample."""
    hh, ww = np.meshgrid(np.arange(H), np.arange(W), indexing="ij")
    m = np.zeros((k * k, H * W), np.float32)
    for kh in range(k):
        for kw in range(k):
            dh, dw = kh - padding, kw - padding
            valid = ((hh + dh >= 0) & (hh + dh < H) & (ww + dw >= 0) & (ww + dw < W))
            m[kh * k + kw] = valid.reshape(-1)
    return jnp.asarray(np.tile(m, (1, nb)), dtype=dtype)


def _decimation_matrix(H, W, stride, Ho, Wo, nb):
    """Block-diagonal (nb*H*W, nb*Ho*Wo) selector: strided conv = conv + decimation."""
    sel = np.zeros((H * W, Ho * Wo), np.float32)
    for ho in range(Ho):
        for wo in range(Wo):
            sel[ho * stride * W + wo * stride, ho * Wo + wo] = 1.0
    return jnp.asarray(np.kron(np.eye(nb, dtype=np.float32), sel))


def _group_matrix(C, num_groups):
    """(C, C) 0/1 group-membership matrix (hosted; avoids per-step iota rebuilds)."""
    gsize = C // num_groups
    gid = np.arange(C) // gsize
    return jnp.asarray((gid[:, None] == gid[None, :]).astype(np.float32))


def sepconv_forward(x_nchw, params, *, k, stride, padding, num_groups=32, eps=1e-5,
                    mxu_dtype=jnp.bfloat16, cast_early=True, samples_per_step=2):
    """SepConv forward. x_nchw: (N, C_in, H, W) float32 (PyTorch layout). Returns NCHW.

    Note: bf16 folded weights round depthwise*pointwise AFTER multiplying, so accuracy is
    slightly below running the two convs separately in bf16; use mxu_dtype=float32 for
    conv-level accuracy.  Set cast_early=False on v5e (no bf16 VPU datapath).
    """
    N, C_in, H, W = x_nchw.shape
    (wdw1, wpw1, bpw1, gam1, bet1), (wdw2, wpw2, bpw2, gam2, bet2) = params
    C_mid, C_out = wpw1.shape[1], wpw2.shape[1]

    # TODO(synk): only 'same' spatial padding (2*padding == k-1) is implemented; other
    # paddings change the output grid and need a different mask/decimation formulation.
    assert 2 * padding == k - 1, "kernel assumes 'same' padding: padding == (k - 1) // 2"
    assert C_mid % num_groups == 0 and C_out % num_groups == 0, \
        "GroupNorm(32, C) requires C % 32 == 0"
    gsize1, gsize2 = C_mid // num_groups, C_out // num_groups

    S_in = H * W
    Ho = (H + 2 * padding - k) // stride + 1
    Wo = (W + 2 * padding - k) // stride + 1
    S_out = Ho * Wo            # block 2 is stride 1 with 'same' padding

    # Samples per grid step: largest divisor of N not exceeding the request.  Keeping
    # >= 2 grid steps lets both v7x TensorCores get work via the "parallel" batch axis.
    nb = max(d for d in range(1, min(samples_per_step, N) + 1) if N % d == 0)

    ew_dtype = mxu_dtype if cast_early else jnp.float32   # elementwise / tap-mask dtype

    # NCHW -> channel-major flat spatial: a free reshape (no transpose, no HBM pass).
    x = x_nchw.reshape(N, C_in, S_in)

    # Hosted constants (constant block index -> DMA'd once, kept resident in VMEM).
    w2t1 = _fold_dw_pw(wdw1, wpw1, mxu_dtype)             # (C_mid, k*k*C_in)
    w2t2 = _fold_dw_pw(wdw2, wpw2, mxu_dtype)             # (C_out, k*k*C_mid)
    msk1 = _tap_masks(H, W, k, padding, nb, ew_dtype)     # (k*k, nb*S_in)
    msk2 = _tap_masks(Ho, Wo, k, padding, nb, ew_dtype)   # (k*k, nb*S_out)
    cst1 = jnp.stack([bpw1, gam1, bet1], axis=1).astype(jnp.float32)   # (C_mid, 3)
    cst2 = jnp.stack([bpw2, gam2, bet2], axis=1).astype(jnp.float32)   # (C_out, 3)
    dummy = jnp.zeros((1, 1), jnp.float32)                # placeholder for unused consts
    dsel = _decimation_matrix(H, W, stride, Ho, Wo, nb) if stride > 1 else dummy
    gm1 = _group_matrix(C_mid, num_groups) if gsize1 > 1 else dummy
    gm2 = _group_matrix(C_out, num_groups) if gsize2 > 1 else dummy

    const_args = (dsel, msk1, w2t1, cst1, gm1, msk2, w2t2, cst2, gm2)

    def const_spec(a):
        nd = a.ndim
        return pl.BlockSpec(a.shape, lambda *_: (0,) * nd)    # fetched once

    kernel = functools.partial(
        _sepconv_kernel, k=k, padding=padding, stride=stride, W=W, Wo=Wo, S_out=S_out,
        eps=eps, gsize1=gsize1, gsize2=gsize2, ew_dtype=ew_dtype, nb=nb)

    flops = 2 * N * (S_in * C_mid * (k * k * C_in) + S_out * C_out * (k * k * C_mid))
    cost = pl.CostEstimate(
        flops=int(flops),
        transcendentals=int(N * (C_mid + C_out)),                       # per-channel rsqrt
        bytes_accessed=int(4 * (x.size + N * C_out * S_out) + 2 * (w2t1.size + w2t2.size)))

    out = pl.pallas_call(
        kernel,
        out_shape=jax.ShapeDtypeStruct((N, C_out, S_out), jnp.float32),
        grid=(N // nb,),   # nb samples per step; batch axis is megacore-parallel
        in_specs=[pl.BlockSpec((nb, C_in, S_in), lambda n: (n, 0, 0))]
                 + [const_spec(a) for a in const_args],
        out_specs=pl.BlockSpec((nb, C_out, S_out), lambda n: (n, 0, 0)),
        compiler_params=pltpu.CompilerParams(dimension_semantics=("parallel",)),
        cost_estimate=cost,
    )(x, *const_args)

    return out.reshape(N, C_out, Ho, Wo)                      # flat spatial -> NCHW (free)


# ----------------------------------------------------------------------------
# Pure-JAX reference (for correctness check only)
# ----------------------------------------------------------------------------
def dilconv_ref(x_nhwc, wdw, wpw, bpw, gamma, beta, *, k, stride, padding,
                num_groups=32, eps=1e-5):
    C_in = x_nhwc.shape[-1]
    dw_kernel = wdw.reshape(k, k, 1, C_in)  # HWIO, feature_group_count=C_in
    y = jax.lax.conv_general_dilated(
        x_nhwc, dw_kernel, window_strides=(stride, stride),
        padding=((padding, padding), (padding, padding)),
        dimension_numbers=("NHWC", "HWIO", "NHWC"),
        feature_group_count=C_in)
    y = jnp.einsum("nhwc,cd->nhwd", y, wpw) + bpw
    N, H, W, C = y.shape
    g = C // num_groups
    yg = y.reshape(N, H, W, num_groups, g)
    mean = jnp.mean(yg, axis=(1, 2, 4), keepdims=True)
    var = jnp.mean((yg - mean) ** 2, axis=(1, 2, 4), keepdims=True)
    yn = ((yg - mean) / jnp.sqrt(var + eps)).reshape(N, H, W, C)
    yn = yn * gamma + beta
    return jnp.maximum(yn, 0.0)


def sepconv_ref(x_nchw, params, *, k, stride, padding):
    x = jnp.transpose(x_nchw, (0, 2, 3, 1))
    p1, p2 = params
    y = dilconv_ref(x, *p1, k=k, stride=stride, padding=padding)
    y = dilconv_ref(y, *p2, k=k, stride=1, padding=padding)
    return jnp.transpose(y, (0, 3, 1, 2))


# ----------------------------------------------------------------------------
# Deterministic parameter init (synthetic; shapes follow the PyTorch module)
# ----------------------------------------------------------------------------
def init_dilconv_params(key, C_in, C_out, k):
    k1, k2, k3, k4, k5 = jax.random.split(key, 5)
    wdw = jax.random.normal(k1, (k, k, C_in), jnp.float32) * 0.2              # depthwise
    wpw = jax.random.normal(k2, (C_in, C_out), jnp.float32) / jnp.sqrt(C_in)  # pointwise
    bpw = jax.random.normal(k3, (C_out,), jnp.float32) * 0.05                 # pw bias
    gamma = 1.0 + 0.1 * jax.random.normal(k4, (C_out,), jnp.float32)          # GN weight
    beta = 0.05 * jax.random.normal(k5, (C_out,), jnp.float32)                # GN bias
    return (wdw, wpw, bpw, gamma, beta)


if __name__ == "__main__":
    key = jax.random.PRNGKey(0)
    kx, kp1, kp2 = jax.random.split(key, 3)

    # GroupNorm(32, C) forces channel counts to be multiples of 32.  N=4 with 2 samples
    # per grid step -> 2 grid steps (both v7x TensorCores busy).
    N, C_in, C_out, H, W = 4, 32, 32, 16, 16
    ksz, padding = 3, 1

    x = jax.random.normal(kx, (N, C_in, H, W), jnp.float32)   # NCHW, as in PyTorch
    p1 = init_dilconv_params(kp1, C_in, C_in, ksz)
    p2 = init_dilconv_params(kp2, C_in, C_out, ksz)

    # --- stride 1, f32 MXU operands: tight check against the pure-JAX reference ---
    ref = sepconv_ref(x, (p1, p2), k=ksz, stride=1, padding=padding)
    fwd_f32 = jax.jit(functools.partial(sepconv_forward, k=ksz, stride=1,
                                        padding=padding, mxu_dtype=jnp.float32))
    out = jax.block_until_ready(fwd_f32(x, (p1, p2)))
    assert out.shape == (N, C_out, H, W)
    np.testing.assert_allclose(np.asarray(out), np.asarray(ref), atol=2e-3, rtol=2e-3)

    # --- stride 1, default bf16 MXU operands (f32 accumulation): looser tolerance ---
    fwd_bf16 = jax.jit(functools.partial(sepconv_forward, k=ksz, stride=1,
                                         padding=padding))
    out_bf = jax.block_until_ready(fwd_bf16(x, (p1, p2)))
    np.testing.assert_allclose(np.asarray(out_bf), np.asarray(ref), atol=3e-2, rtol=3e-2)

    # --- stride 2 (decimation path), f32 MXU operands ---
    ref2 = sepconv_ref(x, (p1, p2), k=ksz, stride=2, padding=padding)
    fwd_s2 = jax.jit(functools.partial(sepconv_forward, k=ksz, stride=2,
                                       padding=padding, mxu_dtype=jnp.float32))
    out2 = jax.block_until_ready(fwd_s2(x, (p1, p2)))
    assert out2.shape == (N, C_out, H // 2, W // 2)
    np.testing.assert_allclose(np.asarray(out2), np.asarray(ref2), atol=2e-3, rtol=2e-3)

    print("KERNEL_OK")
</pallas_src>

<mosaic_0001>
module attributes {stable_mosaic.version = 11 : i64} {
  func.func @_sepconv_kernel(%arg0: i32, %arg1: memref<2x32x256xf32, #tpu.memory_space<vmem>>, %arg2: memref<1x1xf32, #tpu.memory_space<vmem>>, %arg3: memref<9x512xf32, #tpu.memory_space<vmem>>, %arg4: memref<32x288xf32, #tpu.memory_space<vmem>>, %arg5: memref<32x3xf32, #tpu.memory_space<vmem>>, %arg6: memref<1x1xf32, #tpu.memory_space<vmem>>, %arg7: memref<9x512xf32, #tpu.memory_space<vmem>>, %arg8: memref<32x288xf32, #tpu.memory_space<vmem>>, %arg9: memref<32x3xf32, #tpu.memory_space<vmem>>, %arg10: memref<1x1xf32, #tpu.memory_space<vmem>>, %arg11: memref<2x32x256xf32, #tpu.memory_space<vmem>>) attributes {dimension_semantics = [#tpu.dimension_semantics<parallel>], iteration_bounds = array<i64: 2>, scalar_prefetch = 0 : i64, scratch_operands = 0 : i64, tpu.core_type = #tpu.core_type<tc>, window_params = [{transform_indices = @transform_0, window_bounds = array<i64: 2, 32, 256>}, {pipeline_mode = #tpu.pipeline_mode<synchronous>, transform_indices = @transform_1, window_bounds = array<i64: 1, 1>}, {pipeline_mode = #tpu.pipeline_mode<synchronous>, transform_indices = @transform_2, window_bounds = array<i64: 9, 512>}, {pipeline_mode = #tpu.pipeline_mode<synchronous>, transform_indices = @transform_3, window_bounds = array<i64: 32, 288>}, {pipeline_mode = #tpu.pipeline_mode<synchronous>, transform_indices = @transform_4, window_bounds = array<i64: 32, 3>}, {pipeline_mode = #tpu.pipeline_mode<synchronous>, transform_indices = @transform_5, window_bounds = array<i64: 1, 1>}, {pipeline_mode = #tpu.pipeline_mode<synchronous>, transform_indices = @transform_6, window_bounds = array<i64: 9, 512>}, {pipeline_mode = #tpu.pipeline_mode<synchronous>, transform_indices = @transform_7, window_bounds = array<i64: 32, 288>}, {pipeline_mode = #tpu.pipeline_mode<synchronous>, transform_indices = @transform_8, window_bounds = array<i64: 32, 3>}, {pipeline_mode = #tpu.pipeline_mode<synchronous>, transform_indices = @transform_9, window_bounds = array<i64: 1, 1>}, {transform_indices = @transform_10, window_bounds = array<i64: 2, 32, 256>}]} {
    %c0 = arith.constant 0 : index
    %c0_0 = arith.constant 0 : index
    %c0_1 = arith.constant 0 : index
    %0 = vector.load %arg1[%c0, %c0_0, %c0_1] : memref<2x32x256xf32, #tpu.memory_space<vmem>>, vector<1x32x256xf32>
    %1 = vector.shape_cast %0 : vector<1x32x256xf32> to vector<32x256xf32>
    %c1 = arith.constant 1 : index
    %c0_2 = arith.constant 0 : index
    %c0_3 = arith.constant 0 : index
    %2 = vector.load %arg1[%c1, %c0_2, %c0_3] : memref<2x32x256xf32, #tpu.memory_space<vmem>>, vector<1x32x256xf32>
    %3 = vector.shape_cast %2 : vector<1x32x256xf32> to vector<32x256xf32>
    %4 = tpu.concatenate %1, %3 in 1 : vector<32x256xf32>, vector<32x256xf32> -> vector<32x512xf32>
    %c0_4 = arith.constant 0 : index
    %c0_5 = arith.constant 0 : index
    %5 = vector.load %arg3[%c0_4, %c0_5] : memref<9x512xf32, #tpu.memory_space<vmem>>, vector<9x512xf32>
    %c17_i32 = arith.constant 17 : i32
    %6 = tpu.dynamic_rotate %4 by %c17_i32 dim 1 : vector<32x512xf32>, i32 -> vector<32x512xf32>
    %7 = vector.extract_strided_slice %5 {offsets = [0, 0], sizes = [1, 512], strides = [1, 1]} : vector<9x512xf32> to vector<1x512xf32>
    %8 = vector.broadcast %7 : vector<1x512xf32> to vector<32x512xf32>
    %9 = arith.mulf %6, %8 : vector<32x512xf32>
    %c16_i32 = arith.constant 16 : i32
    %10 = tpu.dynamic_rotate %4 by %c16_i32 dim 1 : vector<32x512xf32>, i32 -> vector<32x512xf32>
    %11 = vector.extract_strided_slice %5 {offsets = [1, 0], sizes = [1, 512], strides = [1, 1]} : vector<9x512xf32> to vector<1x512xf32>
    %12 = vector.broadcast %11 : vector<1x512xf32> to vector<32x512xf32>
    %13 = arith.mulf %10, %12 : vector<32x512xf32>
    %c15_i32 = arith.constant 15 : i32
    %14 = tpu.dynamic_rotate %4 by %c15_i32 dim 1 : vector<32x512xf32>, i32 -> vector<32x512xf32>
    %15 = vector.extract_strided_slice %5 {offsets = [2, 0], sizes = [1, 512], strides = [1, 1]} : vector<9x512xf32> to vector<1x512xf32>
    %16 = vector.broadcast %15 : vector<1x512xf32> to vector<32x512xf32>
    %17 = arith.mulf %14, %16 : vector<32x512xf32>
    %c1_i32 = arith.constant 1 : i32
    %18 = tpu.dynamic_rotate %4 by %c1_i32 dim 1 : vector<32x512xf32>, i32 -> vector<32x512xf32>
    %19 = vector.extract_strided_slice %5 {offsets = [3, 0], sizes = [1, 512], strides = [1, 1]} : vector<9x512xf32> to vector<1x512xf32>
    %20 = vector.broadcast %19 : vector<1x512xf32> to vector<32x512xf32>
    %21 = arith.mulf %18, %20 : vector<32x512xf32>
    %c511_i32 = arith.constant 511 : i32
    %22 = tpu.dynamic_rotate %4 by %c511_i32 dim 1 : vector<32x512xf32>, i32 -> vector<32x512xf32>
    %23 = vector.extract_strided_slice %5 {offsets = [5, 0], sizes = [1, 512], strides = [1, 1]} : vector<9x512xf32> to vector<1x512xf32>
    %24 = vector.broadcast %23 : vector<1x512xf32> to vector<32x512xf32>
    %25 = arith.mulf %22, %24 : vector<32x512xf32>
    %c497_i32 = arith.constant 497 : i32
    %26 = tpu.dynamic_rotate %4 by %c497_i32 dim 1 : vector<32x512xf32>, i32 -> vector<32x512xf32>
    %27 = vector.extract_strided_slice %5 {offsets = [6, 0], sizes = [1, 512], strides = [1, 1]} : vector<9x512xf32> to vector<1x512xf32>
    %28 = vector.broadcast %27 : vector<1x512xf32> to vector<32x512xf32>
    %29 = arith.mulf %26, %28 : vector<32x512xf32>
    %c496_i32 = arith.constant 496 : i32
    %30 = tpu.dynamic_rotate %4 by %c496_i32 dim 1 : vector<32x512xf32>, i32 -> vector<32x512xf32>
    %31 = vector.extract_strided_slice %5 {offsets = [7, 0], sizes = [1, 512], strides = [1, 1]} : vector<9x512xf32> to vector<1x512xf32>
    %32 = vector.broadcast %31 : vector<1x512xf32> to vector<32x512xf32>
    %33 = arith.mulf %30, %32 : vector<32x512xf32>
    %c495_i32 = arith.constant 495 : i32
    %34 = tpu.dynamic_rotate %4 by %c495_i32 dim 1 : vector<32x512xf32>, i32 -> vector<32x512xf32>
    %35 = vector.extract_strided_slice %5 {offsets = [8, 0], sizes = [1, 512], strides = [1, 1]} : vector<9x512xf32> to vector<1x512xf32>
    %36 = vector.broadcast %35 : vector<1x512xf32> to vector<32x512xf32>
    %37 = arith.mulf %34, %36 : vector<32x512xf32>
    %38 = tpu.concatenate %9, %13, %17, %21, %4, %25, %29, %33, %37 in 0 : vector<32x512xf32>, vector<32x512xf32>, vector<32x512xf32>, vector<32x512xf32>, vector<32x512xf32>, vector<32x512xf32>, vector<32x512xf32>, vector<32x512xf32>, vector<32x512xf32> -> vector<288x512xf32>
    %c0_6 = arith.constant 0 : index
    %c0_7 = arith.constant 0 : index
    %39 = vector.load %arg4[%c0_6, %c0_7] : memref<32x288xf32, #tpu.memory_space<vmem>>, vector<32x288xf32>
    %cst = arith.constant dense<0.000000e+00> : vector<32x512xf32>
    %40 = tpu.matmul %39, %38, %cst {dimension_numbers = #tpu.dot_dimension_numbers<[1], [0], [0], [1], [0, 0, 1, 1], [], []>} : vector<32x288xf32>, vector<288x512xf32>, vector<32x512xf32> -> vector<32x512xf32>
    %41 = vector.extract_strided_slice %40 {offsets = [0, 0], sizes = [32, 256], strides = [1, 1]} : vector<32x512xf32> to vector<32x256xf32>
    %c0_8 = arith.constant 0 : index
    %c0_9 = arith.constant 0 : index
    %42 = vector.load %arg5[%c0_8, %c0_9] : memref<32x3xf32, #tpu.memory_space<vmem>>, vector<32x1xf32>
    %c0_10 = arith.constant 0 : index
    %c1_11 = arith.constant 1 : index
    %43 = vector.load %arg5[%c0_10, %c1_11] : memref<32x3xf32, #tpu.memory_space<vmem>>, vector<32x1xf32>
    %c0_12 = arith.constant 0 : index
    %c2 = arith.constant 2 : index
    %44 = vector.load %arg5[%c0_12, %c2] : memref<32x3xf32, #tpu.memory_space<vmem>>, vector<32x1xf32>
    %cst_13 = arith.constant dense<0.000000e+00> : vector<32xf32>
    %45 = vector.multi_reduction <add>, %41, %cst_13 [1] : vector<32x256xf32> to vector<32xf32>
    %46 = vector.shape_cast %45 : vector<32xf32> to vector<32x1xf32>
    %47 = arith.mulf %41, %41 : vector<32x256xf32>
    %cst_14 = arith.constant dense<0.000000e+00> : vector<32xf32>
    %48 = vector.multi_reduction <add>, %47, %cst_14 [1] : vector<32x256xf32> to vector<32xf32>
    %49 = vector.shape_cast %48 : vector<32xf32> to vector<32x1xf32>
    %cst_15 = arith.constant 2.560000e+02 : f32
    %50 = vector.broadcast %cst_15 : f32 to vector<32x1xf32>
    %51 = arith.mulf %50, %42 : vector<32x1xf32>
    %52 = arith.addf %46, %51 : vector<32x1xf32>
    %cst_16 = arith.constant 2.000000e+00 : f32
    %53 = vector.broadcast %cst_16 : f32 to vector<32x1xf32>
    %54 = arith.mulf %53, %42 : vector<32x1xf32>
    %55 = arith.mulf %54, %46 : vector<32x1xf32>
    %56 = arith.addf %49, %55 : vector<32x1xf32>
    %57 = arith.mulf %42, %42 : vector<32x1xf32>
    %cst_17 = arith.constant 2.560000e+02 : f32
    %58 = vector.broadcast %cst_17 : f32 to vector<32x1xf32>
    %59 = arith.mulf %58, %57 : vector<32x1xf32>
    %60 = arith.addf %56, %59 : vector<32x1xf32>
    %cst_18 = arith.constant 3.906250e-03 : f32
    %61 = vector.broadcast %cst_18 : f32 to vector<32x1xf32>
    %62 = arith.mulf %52, %61 : vector<32x1xf32>
    %cst_19 = arith.constant 3.906250e-03 : f32
    %63 = vector.broadcast %cst_19 : f32 to vector<32x1xf32>
    %64 = arith.mulf %60, %63 : vector<32x1xf32>
    %65 = arith.mulf %62, %62 : vector<32x1xf32>
    %66 = arith.subf %64, %65 : vector<32x1xf32>
    %cst_20 = arith.constant 0.000000e+00 : f32
    %67 = vector.broadcast %cst_20 : f32 to vector<32x1xf32>
    %68 = arith.maximumf %66, %67 : vector<32x1xf32>
    %cst_21 = arith.constant 9.99999974E-6 : f32
    %69 = vector.broadcast %cst_21 : f32 to vector<32x1xf32>
    %70 = arith.addf %68, %69 : vector<32x1xf32>
    %71 = math.rsqrt %70 : vector<32x1xf32>
    %72 = arith.mulf %43, %71 : vector<32x1xf32>
    %73 = arith.subf %42, %62 : vector<32x1xf32>
    %74 = arith.mulf %73, %72 : vector<32x1xf32>
    %75 = arith.addf %44, %74 : vector<32x1xf32>
    %76 = vector.broadcast %72 : vector<32x1xf32> to vector<32x256xf32>
    %77 = arith.mulf %41, %76 : vector<32x256xf32>
    %78 = vector.broadcast %75 : vector<32x1xf32> to vector<32x256xf32>
    %79 = arith.addf %77, %78 : vector<32x256xf32>
    %cst_22 = arith.constant 0.000000e+00 : f32
    %80 = vector.broadcast %cst_22 : f32 to vector<32x256xf32>
    %81 = arith.maximumf %79, %80 : vector<32x256xf32>
    %82 = vector.extract_strided_slice %40 {offsets = [0, 256], sizes = [32, 256], strides = [1, 1]} : vector<32x512xf32> to vector<32x256xf32>
    %c0_23 = arith.constant 0 : index
    %c0_24 = arith.constant 0 : index
    %83 = vector.load %arg5[%c0_23, %c0_24] : memref<32x3xf32, #tpu.memory_space<vmem>>, vector<32x1xf32>
    %c0_25 = arith.constant 0 : index
    %c1_26 = arith.constant 1 : index
    %84 = vector.load %arg5[%c0_25, %c1_26] : memref<32x3xf32, #tpu.memory_space<vmem>>, vector<32x1xf32>
    %c0_27 = arith.constant 0 : index
    %c2_28 = arith.constant 2 : index
    %85 = vector.load %arg5[%c0_27, %c2_28] : memref<32x3xf32, #tpu.memory_space<vmem>>, vector<32x1xf32>
    %cst_29 = arith.constant dense<0.000000e+00> : vector<32xf32>
    %86 = vector.multi_reduction <add>, %82, %cst_29 [1] : vector<32x256xf32> to vector<32xf32>
    %87 = vector.shape_cast %86 : vector<32xf32> to vector<32x1xf32>
    %88 = arith.mulf %82, %82 : vector<32x256xf32>
    %cst_30 = arith.constant dense<0.000000e+00> : vector<32xf32>
    %89 = vector.multi_reduction <add>, %88, %cst_30 [1] : vector<32x256xf32> to vector<32xf32>
    %90 = vector.shape_cast %89 : vector<32xf32> to vector<32x1xf32>
    %cst_31 = arith.constant 2.560000e+02 : f32
    %91 = vector.broadcast %cst_31 : f32 to vector<32x1xf32>
    %92 = arith.mulf %91, %83 : vector<32x1xf32>
    %93 = arith.addf %87, %92 : vector<32x1xf32>
    %cst_32 = arith.constant 2.000000e+00 : f32
    %94 = vector.broadcast %cst_32 : f32 to vector<32x1xf32>
    %95 = arith.mulf %94, %83 : vector<32x1xf32>
    %96 = arith.mulf %95, %87 : vector<32x1xf32>
    %97 = arith.addf %90, %96 : vector<32x1xf32>
    %98 = arith.mulf %83, %83 : vector<32x1xf32>
    %cst_33 = arith.constant 2.560000e+02 : f32
    %99 = vector.broadcast %cst_33 : f32 to vector<32x1xf32>
    %100 = arith.mulf %99, %98 : vector<32x1xf32>
    %101 = arith.addf %97, %100 : vector<32x1xf32>
    %cst_34 = arith.constant 3.906250e-03 : f32
    %102 = vector.broadcast %cst_34 : f32 to vector<32x1xf32>
    %103 = arith.mulf %93, %102 : vector<32x1xf32>
    %cst_35 = arith.constant 3.906250e-03 : f32
    %104 = vector.broadcast %cst_35 : f32 to vector<32x1xf32>
    %105 = arith.mulf %101, %104 : vector<32x1xf32>
    %106 = arith.mulf %103, %103 : vector<32x1xf32>
    %107 = arith.subf %105, %106 : vector<32x1xf32>
    %cst_36 = arith.constant 0.000000e+00 : f32
    %108 = vector.broadcast %cst_36 : f32 to vector<32x1xf32>
    %109 = arith.maximumf %107, %108 : vector<32x1xf32>
    %cst_37 = arith.constant 9.99999974E-6 : f32
    %110 = vector.broadcast %cst_37 : f32 to vector<32x1xf32>
    %111 = arith.addf %109, %110 : vector<32x1xf32>
    %112 = math.rsqrt %111 : vector<32x1xf32>
    %113 = arith.mulf %84, %112 : vector<32x1xf32>
    %114 = arith.subf %83, %103 : vector<32x1xf32>
    %115 = arith.mulf %114, %113 : vector<32x1xf32>
    %116 = arith.addf %85, %115 : vector<32x1xf32>
    %117 = vector.broadcast %113 : vector<32x1xf32> to vector<32x256xf32>
    %118 = arith.mulf %82, %117 : vector<32x256xf32>
    %119 = vector.broadcast %116 : vector<32x1xf32> to vector<32x256xf32>
    %120 = arith.addf %118, %119 : vector<32x256xf32>
    %cst_38 = arith.constant 0.000000e+00 : f32
    %121 = vector.broadcast %cst_38 : f32 to vector<32x256xf32>
    %122 = arith.maximumf %120, %121 : vector<32x256xf32>
    %123 = tpu.concatenate %81, %122 in 1 : vector<32x256xf32>, vector<32x256xf32> -> vector<32x512xf32>
    %c0_39 = arith.constant 0 : index
    %c0_40 = arith.constant 0 : index
    %124 = vector.load %arg7[%c0_39, %c0_40] : memref<9x512xf32, #tpu.memory_space<vmem>>, vector<9x512xf32>
    %c17_i32_41 = arith.constant 17 : i32
    %125 = tpu.dynamic_rotate %123 by %c17_i32_41 dim 1 : vector<32x512xf32>, i32 -> vector<32x512xf32>
    %126 = vector.extract_strided_slice %124 {offsets = [0, 0], sizes = [1, 512], strides = [1, 1]} : vector<9x512xf32> to vector<1x512xf32>
    %127 = vector.broadcast %126 : vector<1x512xf32> to vector<32x512xf32>
    %128 = arith.mulf %125, %127 : vector<32x512xf32>
    %c16_i32_42 = arith.constant 16 : i32
    %129 = tpu.dynamic_rotate %123 by %c16_i32_42 dim 1 : vector<32x512xf32>, i32 -> vector<32x512xf32>
    %130 = vector.extract_strided_slice %124 {offsets = [1, 0], sizes = [1, 512], strides = [1, 1]} : vector<9x512xf32> to vector<1x512xf32>
    %131 = vector.broadcast %130 : vector<1x512xf32> to vector<32x512xf32>
    %132 = arith.mulf %129, %131 : vector<32x512xf32>
    %c15_i32_43 = arith.constant 15 : i32
    %133 = tpu.dynamic_rotate %123 by %c15_i32_43 dim 1 : vector<32x512xf32>, i32 -> vector<32x512xf32>
    %134 = vector.extract_strided_slice %124 {offsets = [2, 0], sizes = [1, 512], strides = [1, 1]} : vector<9x512xf32> to vector<1x512xf32>
    %135 = vector.broadcast %134 : vector<1x512xf32> to vector<32x512xf32>
    %136 = arith.mulf %133, %135 : vector<32x512xf32>
    %c1_i32_44 = arith.constant 1 : i32
    %137 = tpu.dynamic_rotate %123 by %c1_i32_44 dim 1 : vector<32x512xf32>, i32 -> vector<32x512xf32>
    %138 = vector.extract_strided_slice %124 {offsets = [3, 0], sizes = [1, 512], strides = [1, 1]} : vector<9x512xf32> to vector<1x512xf32>
    %139 = vector.broadcast %138 : vector<1x512xf32> to vector<32x512xf32>
    %140 = arith.mulf %137, %139 : vector<32x512xf32>
    %c511_i32_45 = arith.constant 511 : i32
    %141 = tpu.dynamic_rotate %123 by %c511_i32_45 dim 1 : vector<32x512xf32>, i32 -> vector<32x512xf32>
    %142 = vector.extract_strided_slice %124 {offsets = [5, 0], sizes = [1, 512], strides = [1, 1]} : vector<9x512xf32> to vector<1x512xf32>
    %143 = vector.broadcast %142 : vector<1x512xf32> to vector<32x512xf32>
    %144 = arith.mulf %141, %143 : vector<32x512xf32>
    %c497_i32_46 = arith.constant 497 : i32
    %145 = tpu.dynamic_rotate %123 by %c497_i32_46 dim 1 : vector<32x512xf32>, i32 -> vector<32x512xf32>
    %146 = vector.extract_strided_slice %124 {offsets = [6, 0], sizes = [1, 512], strides = [1, 1]} : vector<9x512xf32> to vector<1x512xf32>
    %147 = vector.broadcast %146 : vector<1x512xf32> to vector<32x512xf32>
    %148 = arith.mulf %145, %147 : vector<32x512xf32>
    %c496_i32_47 = arith.constant 496 : i32
    %149 = tpu.dynamic_rotate %123 by %c496_i32_47 dim 1 : vector<32x512xf32>, i32 -> vector<32x512xf32>
    %150 = vector.extract_strided_slice %124 {offsets = [7, 0], sizes = [1, 512], strides = [1, 1]} : vector<9x512xf32> to vector<1x512xf32>
    %151 = vector.broadcast %150 : vector<1x512xf32> to vector<32x512xf32>
    %152 = arith.mulf %149, %151 : vector<32x512xf32>
    %c495_i32_48 = arith.constant 495 : i32
    %153 = tpu.dynamic_rotate %123 by %c495_i32_48 dim 1 : vector<32x512xf32>, i32 -> vector<32x512xf32>
    %154 = vector.extract_strided_slice %124 {offsets = [8, 0], sizes = [1, 512], strides = [1, 1]} : vector<9x512xf32> to vector<1x512xf32>
    %155 = vector.broadcast %154 : vector<1x512xf32> to vector<32x512xf32>
    %156 = arith.mulf %153, %155 : vector<32x512xf32>
    %157 = tpu.concatenate %128, %132, %136, %140, %123, %144, %148, %152, %156 in 0 : vector<32x512xf32>, vector<32x512xf32>, vector<32x512xf32>, vector<32x512xf32>, vector<32x512xf32>, vector<32x512xf32>, vector<32x512xf32>, vector<32x512xf32>, vector<32x512xf32> -> vector<288x512xf32>
    %c0_49 = arith.constant 0 : index
    %c0_50 = arith.constant 0 : index
    %158 = vector.load %arg8[%c0_49, %c0_50] : memref<32x288xf32, #tpu.memory_space<vmem>>, vector<32x288xf32>
    %cst_51 = arith.constant dense<0.000000e+00> : vector<32x512xf32>
    %159 = tpu.matmul %158, %157, %cst_51 {dimension_numbers = #tpu.dot_dimension_numbers<[1], [0], [0], [1], [0, 0, 1, 1], [], []>} : vector<32x288xf32>, vector<288x512xf32>, vector<32x512xf32> -> vector<32x512xf32>
    %160 = vector.extract_strided_slice %159 {offsets = [0, 0], sizes = [32, 256], strides = [1, 1]} : vector<32x512xf32> to vector<32x256xf32>
    %c0_52 = arith.constant 0 : index
    %c0_53 = arith.constant 0 : index
    %161 = vector.load %arg9[%c0_52, %c0_53] : memref<32x3xf32, #tpu.memory_space<vmem>>, vector<32x1xf32>
    %c0_54 = arith.constant 0 : index
    %c1_55 = arith.constant 1 : index
    %162 = vector.load %arg9[%c0_54, %c1_55] : memref<32x3xf32, #tpu.memory_space<vmem>>, vector<32x1xf32>
    %c0_56 = arith.constant 0 : index
    %c2_57 = arith.constant 2 : index
    %163 = vector.load %arg9[%c0_56, %c2_57] : memref<32x3xf32, #tpu.memory_space<vmem>>, vector<32x1xf32>
    %cst_58 = arith.constant dense<0.000000e+00> : vector<32xf32>
    %164 = vector.multi_reduction <add>, %160, %cst_58 [1] : vector<32x256xf32> to vector<32xf32>
    %165 = vector.shape_cast %164 : vector<32xf32> to vector<32x1xf32>
    %166 = arith.mulf %160, %160 : vector<32x256xf32>
    %cst_59 = arith.constant dense<0.000000e+00> : vector<32xf32>
    %167 = vector.multi_reduction <add>, %166, %cst_59 [1] : vector<32x256xf32> to vector<32xf32>
    %168 = vector.shape_cast %167 : vector<32xf32> to vector<32x1xf32>
    %cst_60 = arith.constant 2.560000e+02 : f32
    %169 = vector.broadcast %cst_60 : f32 to vector<32x1xf32>
    %170 = arith.mulf %169, %161 : vector<32x1xf32>
    %171 = arith.addf %165, %170 : vector<32x1xf32>
    %cst_61 = arith.constant 2.000000e+00 : f32
    %172 = vector.broadcast %cst_61 : f32 to vector<32x1xf32>
    %173 = arith.mulf %172, %161 : vector<32x1xf32>
    %174 = arith.mulf %173, %165 : vector<32x1xf32>
    %175 = arith.addf %168, %174 : vector<32x1xf32>
    %176 = arith.mulf %161, %161 : vector<32x1xf32>
    %cst_62 = arith.constant 2.560000e+02 : f32
    %177 = vector.broadcast %cst_62 : f32 to vector<32x1xf32>
    %178 = arith.mulf %177, %176 : vector<32x1xf32>
    %179 = arith.addf %175, %178 : vector<32x1xf32>
    %cst_63 = arith.constant 3.906250e-03 : f32
    %180 = vector.broadcast %cst_63 : f32 to vector<32x1xf32>
    %181 = arith.mulf %171, %180 : vector<32x1xf32>
    %cst_64 = arith.constant 3.906250e-03 : f32
    %182 = vector.broadcast %cst_64 : f32 to vector<32x1xf32>
    %183 = arith.mulf %179, %182 : vector<32x1xf32>
    %184 = arith.mulf %181, %181 : vector<32x1xf32>
    %185 = arith.subf %183, %184 : vector<32x1xf32>
    %cst_65 = arith.constant 0.000000e+00 : f32
    %186 = vector.broadcast %cst_65 : f32 to vector<32x1xf32>
    %187 = arith.maximumf %185, %186 : vector<32x1xf32>
    %cst_66 = arith.constant 9.99999974E-6 : f32
    %188 = vector.broadcast %cst_66 : f32 to vector<32x1xf32>
    %189 = arith.addf %187, %188 : vector<32x1xf32>
    %190 = math.rsqrt %189 : vector<32x1xf32>
    %191 = arith.mulf %162, %190 : vector<32x1xf32>
    %192 = arith.subf %161, %181 : vector<32x1xf32>
    %193 = arith.mulf %192, %191 : vector<32x1xf32>
    %194 = arith.addf %163, %193 : vector<32x1xf32>
    %195 = vector.broadcast %191 : vector<32x1xf32> to vector<32x256xf32>
    %196 = arith.mulf %160, %195 : vector<32x256xf32>
    %197 = vector.broadcast %194 : vector<32x1xf32> to vector<32x256xf32>
    %198 = arith.addf %196, %197 : vector<32x256xf32>
    %cst_67 = arith.constant 0.000000e+00 : f32
    %199 = vector.broadcast %cst_67 : f32 to vector<32x256xf32>
    %200 = arith.maximumf %198, %199 : vector<32x256xf32>
    %c0_68 = arith.constant 0 : index
    %c0_69 = arith.constant 0 : index
    %c0_70 = arith.constant 0 : index
    %201 = vector.load %arg11[%c0_68, %c0_69, %c0_70] : memref<2x32x256xf32, #tpu.memory_space<vmem>>, vector<1x32x256xf32>
    %202 = vector.shape_cast %201 : vector<1x32x256xf32> to vector<32x256xf32>
    %203 = vector.shape_cast %200 : vector<32x256xf32> to vector<1x32x256xf32>
    tpu.vector_store %arg11[%c0_68, %c0_69, %c0_70], %203 {strides = array<i32>} : memref<2x32x256xf32, #tpu.memory_space<vmem>>, vector<1x32x256xf32>,
    %204 = vector.extract_strided_slice %159 {offsets = [0, 256], sizes = [32, 256], strides = [1, 1]} : vector<32x512xf32> to vector<32x256xf32>
    %c0_71 = arith.constant 0 : index
    %c0_72 = arith.constant 0 : index
    %205 = vector.load %arg9[%c0_71, %c0_72] : memref<32x3xf32, #tpu.memory_space<vmem>>, vector<32x1xf32>
    %c0_73 = arith.constant 0 : index
    %c1_74 = arith.constant 1 : index
    %206 = vector.load %arg9[%c0_73, %c1_74] : memref<32x3xf32, #tpu.memory_space<vmem>>, vector<32x1xf32>
    %c0_75 = arith.constant 0 : index
    %c2_76 = arith.constant 2 : index
    %207 = vector.load %arg9[%c0_75, %c2_76] : memref<32x3xf32, #tpu.memory_space<vmem>>, vector<32x1xf32>
    %cst_77 = arith.constant dense<0.000000e+00> : vector<32xf32>
    %208 = vector.multi_reduction <add>, %204, %cst_77 [1] : vector<32x256xf32> to vector<32xf32>
    %209 = vector.shape_cast %208 : vector<32xf32> to vector<32x1xf32>
    %210 = arith.mulf %204, %204 : vector<32x256xf32>
    %cst_78 = arith.constant dense<0.000000e+00> : vector<32xf32>
    %211 = vector.multi_reduction <add>, %210, %cst_78 [1] : vector<32x256xf32> to vector<32xf32>
    %212 = vector.shape_cast %211 : vector<32xf32> to vector<32x1xf32>
    %cst_79 = arith.constant 2.560000e+02 : f32
    %213 = vector.broadcast %cst_79 : f32 to vector<32x1xf32>
    %214 = arith.mulf %213, %205 : vector<32x1xf32>
    %215 = arith.addf %209, %214 : vector<32x1xf32>
    %cst_80 = arith.constant 2.000000e+00 : f32
    %216 = vector.broadcast %cst_80 : f32 to vector<32x1xf32>
    %217 = arith.mulf %216, %205 : vector<32x1xf32>
    %218 = arith.mulf %217, %209 : vector<32x1xf32>
    %219 = arith.addf %212, %218 : vector<32x1xf32>
    %220 = arith.mulf %205, %205 : vector<32x1xf32>
    %cst_81 = arith.constant 2.560000e+02 : f32
    %221 = vector.broadcast %cst_81 : f32 to vector<32x1xf32>
    %222 = arith.mulf %221, %220 : vector<32x1xf32>
    %223 = arith.addf %219, %222 : vector<32x1xf32>
    %cst_82 = arith.constant 3.906250e-03 : f32
    %224 = vector.broadcast %cst_82 : f32 to vector<32x1xf32>
    %225 = arith.mulf %215, %224 : vector<32x1xf32>
    %cst_83 = arith.constant 3.906250e-03 : f32
    %226 = vector.broadcast %cst_83 : f32 to vector<32x1xf32>
    %227 = arith.mulf %223, %226 : vector<32x1xf32>
    %228 = arith.mulf %225, %225 : vector<32x1xf32>
    %229 = arith.subf %227, %228 : vector<32x1xf32>
    %cst_84 = arith.constant 0.000000e+00 : f32
    %230 = vector.broadcast %cst_84 : f32 to vector<32x1xf32>
    %231 = arith.maximumf %229, %230 : vector<32x1xf32>
    %cst_85 = arith.constant 9.99999974E-6 : f32
    %232 = vector.broadcast %cst_85 : f32 to vector<32x1xf32>
    %233 = arith.addf %231, %232 : vector<32x1xf32>
    %234 = math.rsqrt %233 : vector<32x1xf32>
    %235 = arith.mulf %206, %234 : vector<32x1xf32>
    %236 = arith.subf %205, %225 : vector<32x1xf32>
    %237 = arith.mulf %236, %235 : vector<32x1xf32>
    %238 = arith.addf %207, %237 : vector<32x1xf32>
    %239 = vector.broadcast %235 : vector<32x1xf32> to vector<32x256xf32>
    %240 = arith.mulf %204, %239 : vector<32x256xf32>
    %241 = vector.broadcast %238 : vector<32x1xf32> to vector<32x256xf32>
    %242 = arith.addf %240, %241 : vector<32x256xf32>
    %cst_86 = arith.constant 0.000000e+00 : f32
    %243 = vector.broadcast %cst_86 : f32 to vector<32x256xf32>
    %244 = arith.maximumf %242, %243 : vector<32x256xf32>
    %c1_87 = arith.constant 1 : index
    %c0_88 = arith.constant 0 : index
    %c0_89 = arith.constant 0 : index
    %245 = vector.load %arg11[%c1_87, %c0_88, %c0_89] : memref<2x32x256xf32, #tpu.memory_space<vmem>>, vector<1x32x256xf32>
    %246 = vector.shape_cast %245 : vector<1x32x256xf32> to vector<32x256xf32>
    %247 = vector.shape_cast %244 : vector<32x256xf32> to vector<1x32x256xf32>
    tpu.vector_store %arg11[%c1_87, %c0_88, %c0_89], %247 {strides = array<i32>} : memref<2x32x256xf32, #tpu.memory_space<vmem>>, vector<1x32x256xf32>,
    return
  }
  func.func @transform_0(%arg0: i32) -> (i32, i32, i32) {
    %c0_i32 = arith.constant 0 : i32
    %c0_i32_0 = arith.constant 0 : i32
    %c0_i32_1 = arith.constant 0 : i32
    return %arg0, %c0_i32, %c0_i32_0 : i32, i32, i32
  }
  func.func @transform_1(%arg0: i32) -> (i32, i32) {
    %c0_i32 = arith.constant 0 : i32
    %c0_i32_0 = arith.constant 0 : i32
    %c0_i32_1 = arith.constant 0 : i32
    return %c0_i32, %c0_i32_0 : i32, i32
  }
  func.func @transform_2(%arg0: i32) -> (i32, i32) {
    %c0_i32 = arith.constant 0 : i32
    %c0_i32_0 = arith.constant 0 : i32
    %c0_i32_1 = arith.constant 0 : i32
    return %c0_i32, %c0_i32_0 : i32, i32
  }
  func.func @transform_3(%arg0: i32) -> (i32, i32) {
    %c0_i32 = arith.constant 0 : i32
    %c0_i32_0 = arith.constant 0 : i32
    %c0_i32_1 = arith.constant 0 : i32
    return %c0_i32, %c0_i32_0 : i32, i32
  }
  func.func @transform_4(%arg0: i32) -> (i32, i32) {
    %c0_i32 = arith.constant 0 : i32
    %c0_i32_0 = arith.constant 0 : i32
    %c0_i32_1 = arith.constant 0 : i32
    return %c0_i32, %c0_i32_0 : i32, i32
  }
  func.func @transform_5(%arg0: i32) -> (i32, i32) {
    %c0_i32 = arith.constant 0 : i32
    %c0_i32_0 = arith.constant 0 : i32
    %c0_i32_1 = arith.constant 0 : i32
    return %c0_i32, %c0_i32_0 : i32, i32
  }
  func.func @transform_6(%arg0: i32) -> (i32, i32) {
    %c0_i32 = arith.constant 0 : i32
    %c0_i32_0 = arith.constant 0 : i32
    %c0_i32_1 = arith.constant 0 : i32
    return %c0_i32, %c0_i32_0 : i32, i32
  }
  func.func @transform_7(%arg0: i32) -> (i32, i32) {
    %c0_i32 = arith.constant 0 : i32
    %c0_i32_0 = arith.constant 0 : i32
    %c0_i32_1 = arith.constant 0 : i32
    return %c0_i32, %c0_i32_0 : i32, i32
  }
  func.func @transform_8(%arg0: i32) -> (i32, i32) {
    %c0_i32 = arith.constant 0 : i32
    %c0_i32_0 = arith.constant 0 : i32
    %c0_i32_1 = arith.constant 0 : i32
    return %c0_i32, %c0_i32_0 : i32, i32
  }
  func.func @transform_9(%arg0: i32) -> (i32, i32) {
    %c0_i32 = arith.constant 0 : i32
    %c0_i32_0 = arith.constant 0 : i32
    %c0_i32_1 = arith.constant 0 : i32
    return %c0_i32, %c0_i32_0 : i32, i32
  }
  func.func @transform_10(%arg0: i32) -> (i32, i32, i32) {
    %c0_i32 = arith.constant 0 : i32
    %c0_i32_0 = arith.constant 0 : i32
    %c0_i32_1 = arith.constant 0 : i32
    return %arg0, %c0_i32, %c0_i32_0 : i32, i32, i32
  }
}

</mosaic_0001>

<bundles_post_ra>
// kernel: sepconv_forward.1
= control target key start
LH: loop header
LB: loop body
LE: loop exit
PB: predicated region body
PF: predicated region fallthrough
CT: control target
= control target key end

     0   :  { %s3906_s12 = smov 0   ;;  %s6378_s0 = inlined_call_operand.vmem [shape: f32[4,32,256], index: 0, kind: input, shape index: {}]   ;;  %s6379_s1 = inlined_call_operand.<no memory space> [shape: f32[1,1], index: 1, kind: input, shape index: {}, may-alias: {1,5,9}]   ;;  %s6380_s2 = inlined_call_operand.vmem [shape: f32[9,512], index: 2, kind: input, shape index: {}, may-alias: {2,6}]   ;;  %s6381_s3 = inlined_call_operand.vmem [shape: f32[32,288], index: 3, kind: input, shape index: {}]   ;;  %s6382_s4 = inlined_call_operand.vmem [shape: f32[32,3], index: 4, kind: input, shape index: {}]   ;;  %s6383_s6 = inlined_call_operand.vmem [shape: f32[9,512], index: 6, kind: input, shape index: {}, may-alias: {2,6}]   ;;  %s6384_s7 = inlined_call_operand.vmem [shape: f32[32,288], index: 7, kind: input, shape index: {}]   ;;  %s6385_s8 = inlined_call_operand.vmem [shape: f32[32,3], index: 8, kind: input, shape index: {}]   ;;  %s6386_s10 = inlined_call_operand.vmem [shape: f32[4,32,256], index: 10, kind: output, shape index: {}]   ;;  %s6387_s5 = inlined_call_operand.<no memory space> [shape: f32[1,1], index: 5, kind: input, shape index: {}, may-alias: {1,5,9}]   ;;  %s6388_s9 = inlined_call_operand.<no memory space> [shape: f32[1,1], index: 9, kind: input, shape index: {}, may-alias: {1,5,9}]  }
   0x1 LB: > { %s3393_s13 = sadd.s32 4294967295, %s3837_s12   ;;  %p3397_p0 = scmp.ge.s32.totalorder %s3837_s12, 1  ;;  %s3837_s12 = sphi %s3906_s12, %s26_s12  }
   0x2   : > { %p320_p1 = scmp.lt.s32.totalorder %s3837_s12, 3 }
   0x4   : > { %p321_p2 = pnand %p3397_p0, %p320_p1 }
   0x6   : > { %324 = sbr.rel (%p321_p2) target bundleno = 2551 (0x9f7), region = 60 }
   0xd   : > { %s3398_s14 = sshll.u32 %s3393_s13, 1  ;;  %s3839_s17 = smov 17   ;;  %v431_v16 = vlaneseq  ;;  %v4098_v20 = vld [vmem:[%s6380_s2 + $0x8] sm:$0xff]  ;;  %v4114_v28 = vld [vmem:[%s6380_s2 + $0x10] sm:$0xff]  ;;  %v4123_v31 = vld [vmem:[%s6380_s2] sm:$0xff]  ;;  %vm1061_vm8 = vcmask 261120  }
   0xe   : > { %p361_p3 = scmp.lt.s32.totalorder %s3398_s14, 3  ;;  %s3840_s18 = smov 16   ;;  %v4128_v32 = vld [vmem:[%s6380_s2 + $0x18] sm:$0xff] }
   0xf   : > { %s3841_s19 = smov 15   ;;  %s3842_s20 = smov 1   ;;  %v4084_v17 = vshrl.u32 %v431_v16, 7  ;;  %v4086_v18 = vand.u32 127, %v431_v16 }
  0x10   : > { %s6551_s14 = smov (!%p361_p3, %s3398_s14), 3  ;;  %s3843_s28 = smov 127  }
  0x11   : > { %s3446_s5 = sshll.u32 %s6551_s14, 6  ;;  %v4093_v19 = vsub.s32 0, %v4084_v17  ;;  %vm433_vm0 = vcmp.lt.s32.totalorder %v4086_v18, 17  ;;  %vm514_vm1 = vcmp.lt.s32.totalorder %v4086_v18, 16  ;;  %s3844_s29 = smov 113   ;;  %vm595_vm2 = vcmp.lt.s32.totalorder %v4086_v18, 15 }
  0x12   : > { %s3922_s16 = scalar_lea.vmem %s6378_s0, %s3446_s5  ;;  %s3845_s30 = smov 112   ;;  %vm676_vm3 = vcmp.lt.s32.totalorder %v4086_v18, 1  ;;  %vm757_vm4 = vcmp.lt.s32.totalorder %v4086_v18, 127  ;;  %vm838_vm5 = vcmp.lt.s32.totalorder %v4086_v18, 113  ;;  %vm919_vm6 = vcmp.lt.s32.totalorder %v4086_v18, 112 }
  0x13   : > { %v3925_v0 = vld [vmem:[%s3922_s16 + $0x8] sm:$0xff]  ;;  %v3928_v1 = vld [vmem:[%s3922_s16] sm:$0xff]  ;;  %v3935_v2 = vld [vmem:[%s3922_s16 + $0x18] sm:$0xff]  ;;  %v457_v23 = vrot.slane %v4098_v20, %v4093_v19  ;;  %v461_v36 = vrot.slane %v4114_v28, %v4093_v19  ;;  %v453_v39 = vrot.slane %v4123_v31, %v4093_v19  ;;  %v465_v40 = vrot.slane %v4128_v32, %v4093_v19  ;;  %s3846_s9 = smov 111   ;;  %s3850_s27 = smov 2  }
  0x14   : > { %407 = vrot.lane.b32.xlu1 %v3925_v0, %s3839_s17  ;;  %399 = vrot.lane.b32.xlu0 %v3928_v1, %s3839_s17  ;;  %v3938_v3 = vld [vmem:[%s3922_s16 + $0x10] sm:$0xff]  ;;  %v3948_v5 = vld [vmem:[%s3922_s16 + $0x40] sm:$0xff]  ;;  %vm1000_vm7 = vcmp.lt.s32.totalorder %v4086_v18, 111 }
  0x15   : > { %v3945_v4 = vld [vmem:[%s3922_s16 + $0x50] sm:$0xff]  ;;  %v3955_v6 = vld [vmem:[%s3922_s16 + $0x58] sm:$0xff]  ;;  %v3958_v7 = vld [vmem:[%s3922_s16 + $0x48] sm:$0xff] }
  0x16   : > { %v3965_v8 = vld [vmem:[%s3922_s16 + $0x30] sm:$0xff]  ;;  %v3968_v9 = vld [vmem:[%s3922_s16 + $0x20] sm:$0xff]  ;;  %v3975_v10 = vld [vmem:[%s3922_s16 + $0x38] sm:$0xff] }
  0x17   : > { %v3978_v11 = vld [vmem:[%s3922_s16 + $0x28] sm:$0xff]  ;;  %v3985_v12 = vld [vmem:[%s3922_s16 + $0x70] sm:$0xff]  ;;  %v3988_v13 = vld [vmem:[%s3922_s16 + $0x60] sm:$0xff] }
  0x18   : > { %409 = vrot.lane.b32.xlu1 %v3935_v2, %s3839_s17  ;;  %401 = vrot.lane.b32.xlu0 %v3938_v3, %s3839_s17  ;;  %v3995_v14 = vld [vmem:[%s3922_s16 + $0x78] sm:$0xff]  ;;  %v3998_v15 = vld [vmem:[%s3922_s16 + $0x68] sm:$0xff] }
  0x19   : > { %v2503_v18 = vld [vmem:[%s6384_s7 + $0x28] sm:$0xff] }
  0x1c   : > { %417 = vrot.lane.b32.xlu1 %v3945_v4, %s3839_s17  ;;  %415 = vrot.lane.b32.xlu0 %v3948_v5, %s3839_s17 }
  0x20   : > { %425 = vrot.lane.b32.xlu1 %v3955_v6, %s3839_s17  ;;  %423 = vrot.lane.b32.xlu0 %v3958_v7, %s3839_s17 }
  0x24   : > { %405 = vrot.lane.b32.xlu1 %v3965_v8, %s3839_s17  ;;  %403 = vrot.lane.b32.xlu0 %v3968_v9, %s3839_s17 }
  0x28   : > { %413 = vrot.lane.b32.xlu1 %v3975_v10, %s3839_s17  ;;  %411 = vrot.lane.b32.xlu0 %v3978_v11, %s3839_s17 }
  0x2c   : > { %421 = vrot.lane.b32.xlu1 %v3985_v12, %s3839_s17  ;;  %419 = vrot.lane.b32.xlu0 %v3988_v13, %s3839_s17 }
  0x30   : > { %429 = vrot.lane.b32.xlu1 %v3995_v14, %s3839_s17  ;;  %427 = vrot.lane.b32.xlu0 %v3998_v15, %s3839_s17 }
  0x34   : > { %484 = vrot.lane.b32.xlu1 %v3938_v3, %s3840_s18  ;;  %482 = vrot.lane.b32.xlu0 %v3928_v1, %s3840_s18 }
  0x38   : > { %492 = vrot.lane.b32.xlu1 %v3935_v2, %s3840_s18  ;;  %490 = vrot.lane.b32.xlu0 %v3925_v0, %s3840_s18 }
  0x3c   : > { %500 = vrot.lane.b32.xlu1 %v3945_v4, %s3840_s18  ;;  %498 = vrot.lane.b32.xlu0 %v3948_v5, %s3840_s18 }
  0x40   : > { %508 = vrot.lane.b32.xlu1 %v3955_v6, %s3840_s18  ;;  %506 = vrot.lane.b32.xlu0 %v3958_v7, %s3840_s18 }
  0x44   : > { %488 = vrot.lane.b32.xlu1 %v3965_v8, %s3840_s18  ;;  %486 = vrot.lane.b32.xlu0 %v3968_v9, %s3840_s18 }
  0x48   : > { %496 = vrot.lane.b32.xlu1 %v3975_v10, %s3840_s18  ;;  %494 = vrot.lane.b32.xlu0 %v3978_v11, %s3840_s18 }
  0x4c   : > { %504 = vrot.lane.b32.xlu1 %v3985_v12, %s3840_s18  ;;  %502 = vrot.lane.b32.xlu0 %v3988_v13, %s3840_s18 }
  0x50   : > { %512 = vrot.lane.b32.xlu1 %v3995_v14, %s3840_s18  ;;  %510 = vrot.lane.b32.xlu0 %v3998_v15, %s3840_s18 }
  0x54   : > { %565 = vrot.lane.b32.xlu1 %v3938_v3, %s3841_s19  ;;  %563 = vrot.lane.b32.xlu0 %v3928_v1, %s3841_s19 }
  0x58   : > { %573 = vrot.lane.b32.xlu1 %v3935_v2, %s3841_s19  ;;  %571 = vrot.lane.b32.xlu0 %v3925_v0, %s3841_s19 }
  0x5c   : > { %581 = vrot.lane.b32.xlu1 %v3945_v4, %s3841_s19  ;;  %579 = vrot.lane.b32.xlu0 %v3948_v5, %s3841_s19 }
  0x60   : > { %589 = vrot.lane.b32.xlu1 %v3955_v6, %s3841_s19  ;;  %587 = vrot.lane.b32.xlu0 %v3958_v7, %s3841_s19 }
  0x64   : > { %569 = vrot.lane.b32.xlu1 %v3965_v8, %s3841_s19  ;;  %567 = vrot.lane.b32.xlu0 %v3968_v9, %s3841_s19 }
  0x68   : > { %577 = vrot.lane.b32.xlu1 %v3975_v10, %s3841_s19  ;;  %575 = vrot.lane.b32.xlu0 %v3978_v11, %s3841_s19 }
  0x6c   : > { %585 = vrot.lane.b32.xlu1 %v3985_v12, %s3841_s19  ;;  %583 = vrot.lane.b32.xlu0 %v3988_v13, %s3841_s19 }
  0x70   : > { %593 = vrot.lane.b32.xlu1 %v3995_v14, %s3841_s19  ;;  %591 = vrot.lane.b32.xlu0 %v3998_v15, %s3841_s19 }
  0x74   : > { %646 = vrot.lane.b32.xlu1 %v3938_v3, %s3842_s20  ;;  %644 = vrot.lane.b32.xlu0 %v3928_v1, %s3842_s20 }
  0x78   : > { %654 = vrot.lane.b32.xlu1 %v3935_v2, %s3842_s20  ;;  %652 = vrot.lane.b32.xlu0 %v3925_v0, %s3842_s20 }
  0x7c   : > { %662 = vrot.lane.b32.xlu1 %v3945_v4, %s3842_s20  ;;  %660 = vrot.lane.b32.xlu0 %v3948_v5, %s3842_s20 }
  0x80   : > { %670 = vrot.lane.b32.xlu1 %v3955_v6, %s3842_s20  ;;  %668 = vrot.lane.b32.xlu0 %v3958_v7, %s3842_s20 }
  0x84   : > { %650 = vrot.lane.b32.xlu1 %v3965_v8, %s3842_s20  ;;  %648 = vrot.lane.b32.xlu0 %v3968_v9, %s3842_s20 }
  0x86   : > { %v408_v21 = vpop.permute.xlu1 %407  ;;  %v400_v22 = vpop.permute.xlu0 %399 }
  0x87   : > { %v442_v24 = vsel %vm433_vm0, %v400_v22, %v408_v21 }
  0x88   : > { %658 = vrot.lane.b32.xlu1 %v3975_v10, %s3842_s20  ;;  %656 = vrot.lane.b32.xlu0 %v3978_v11, %s3842_s20  ;;  %v467_v29 = vmul.f32 %v457_v23, %v442_v24 }
  0x8a   : > { %v410_v25 = vpop.permute.xlu1 %409  ;;  %v402_v26 = vpop.permute.xlu0 %401 }
  0x8b   : > { %v443_v27 = vsel %vm433_vm0, %v402_v26, %v410_v25 }
  0x8c   : > { %666 = vrot.lane.b32.xlu1 %v3985_v12, %s3842_s20  ;;  %664 = vrot.lane.b32.xlu0 %v3988_v13, %s3842_s20  ;;  %v471_v30 = vmul.f32 %v457_v23, %v443_v27 }
  0x8e   : > { %v418_v33 = vpop.permute.xlu1 %417  ;;  %v416_v34 = vpop.permute.xlu0 %415  ;;  %v3448_v35 = vpack.c.bf16 %v471_v30, %v467_v29  ;;  %v4177_v30 = vsub.s32 1, %v4084_v17 }
  0x8f   : > { %v439_v37 = vsel %vm433_vm0, %v410_v25, %v418_v33  ;;  %v438_v38 = vsel %vm433_vm0, %v408_v21, %v416_v34 }
  0x90   : > { %674 = vrot.lane.b32.xlu1 %v3995_v14, %s3842_s20  ;;  %672 = vrot.lane.b32.xlu0 %v3998_v15, %s3842_s20  ;;  %v468_v43 = vmul.f32 %v461_v36, %v438_v38  ;;  %v472_v44 = vmul.f32 %v461_v36, %v439_v37 }
  0x91   : > { %3449 = vmatprep.subr.bf16.mxu0 %v3448_v35 }
  0x92   : > { %v426_v41 = vpop.permute.xlu1 %425  ;;  %v424_v42 = vpop.permute.xlu0 %423  ;;  %v3522_v57 = vpack.c.bf16 %v472_v44, %v468_v43 }
  0x93   : > { %v447_v45 = vsel %vm433_vm0, %v426_v41, %v402_v26  ;;  %v446_v46 = vsel %vm433_vm0, %v424_v42, %v400_v22  ;;  %v434_v47 = vsel %vm433_vm0, %v416_v34, %v424_v42  ;;  %v435_v48 = vsel %vm433_vm0, %v418_v33, %v426_v41 }
  0x94   : > { %735 = vrot.lane.b32.xlu1 %v3935_v2, %s3843_s28  ;;  %733 = vrot.lane.b32.xlu0 %v3925_v0, %s3843_s28  ;;  %v466_v49 = vmul.f32 %v453_v39, %v446_v46  ;;  %v470_v50 = vmul.f32 %v453_v39, %v447_v45  ;;  %v469_v51 = vmul.f32 %v465_v40, %v434_v47 }
  0x95   : > { %v473_v52 = vmul.f32 %v465_v40, %v435_v48 }
  0x96   : > { %v406_v53 = vpop.permute.xlu1 %405  ;;  %v404_v54 = vpop.permute.xlu0 %403  ;;  %v3450_v55 = vpack.c.bf16 %v470_v50, %v466_v49 }
  0x97   : > { %v3520_v56 = vpack.c.bf16 %v473_v52, %v469_v51 }
  0x98   : > { %743 = vrot.lane.b32.xlu1 %v3945_v4, %s3843_s28  ;;  %741 = vrot.lane.b32.xlu0 %v3948_v5, %s3843_s28 }
  0x99   : > { %3451 = vmatpush1.bf16.msra.mxu0 %v3450_v55  ;;  %3521 = vmatprep.subr.bf16.mxu1 %v3520_v56 }
  0x9a   : > { %3523 = vmatpush1.bf16.msra.mxu1 %v3522_v57  ;;  %v414_v58 = vpop.permute.xlu1 %413  ;;  %v412_v59 = vpop.permute.xlu0 %411 }
  0x9b   : > { %v445_v60 = vsel %vm433_vm0, %v406_v53, %v414_v58  ;;  %v444_v61 = vsel %vm433_vm0, %v404_v54, %v412_v59 }
  0x9c   : > { %v479_v62 = vmul.f32 %v457_v23, %v445_v60  ;;  %v475_v63 = vmul.f32 %v457_v23, %v444_v61  ;;  %727 = vrot.lane.b32.xlu1 %v3938_v3, %s3843_s28  ;;  %725 = vrot.lane.b32.xlu0 %v3928_v1, %s3843_s28  ;;  %v546_v60 = vrot.slane %v4128_v32, %v4177_v30 }
  0x9e   : > { %v422_v16 = vpop.permute.xlu1 %421  ;;  %v420_v21 = vpop.permute.xlu0 %419  ;;  %v3452_v22 = vpack.c.bf16 %v479_v62, %v475_v63 }
  0x9f   : > { %v441_v24 = vsel %vm433_vm0, %v414_v58, %v422_v16  ;;  %v440_v25 = vsel %vm433_vm0, %v412_v59, %v420_v21  ;;  %v534_v59 = vrot.slane %v4123_v31, %v4177_v30 }
  0xa0   : > { %751 = vrot.lane.b32.xlu1 %v3955_v6, %s3843_s28  ;;  %749 = vrot.lane.b32.xlu0 %v3958_v7, %s3843_s28  ;;  %v480_v23 = vmul.f32 %v461_v36, %v441_v24  ;;  %v476_v26 = vmul.f32 %v461_v36, %v440_v25 }
  0xa1   : > { %3453 = vmatprep.subr.bf16.mxu0 %v3452_v22 }
  0xa2   : > { %v430_v27 = vpop.permute.xlu1 %429  ;;  %v428_v29 = vpop.permute.xlu0 %427  ;;  %v3526_v47 = vpack.c.bf16 %v480_v23, %v476_v26 }
  0xa3   : > { %v437_v33 = vsel %vm433_vm0, %v422_v16, %v430_v27  ;;  %v449_v34 = vsel %vm433_vm0, %v430_v27, %v406_v53  ;;  %v436_v35 = vsel %vm433_vm0, %v420_v21, %v428_v29  ;;  %v448_v37 = vsel %vm433_vm0, %v428_v29, %v404_v54 }
  0xa4   : > { %v478_v38 = vmul.f32 %v453_v39, %v449_v34  ;;  %v481_v41 = vmul.f32 %v465_v40, %v437_v33  ;;  %v474_v36 = vmul.f32 %v453_v39, %v448_v37  ;;  %v477_v42 = vmul.f32 %v465_v40, %v436_v35  ;;  %739 = vrot.lane.b32.xlu1 %v3975_v10, %s3843_s28 }
  0xa5   : > { %737 = vrot.lane.b32.xlu0 %v3978_v11, %s3843_s28  ;;  %v538_v39 = vrot.slane %v4098_v20, %v4177_v30  ;;  %v542_v53 = vrot.slane %v4114_v28, %v4177_v30 }
  0xa6   : > { %v485_v43 = vpop.permute.xlu1 %484  ;;  %v483_v44 = vpop.permute.xlu0 %482  ;;  %v3454_v45 = vpack.c.bf16 %v478_v38, %v474_v36  ;;  %v3524_v46 = vpack.c.bf16 %v481_v41, %v477_v42 }
  0xa8   : > { %747 = vrot.lane.b32.xlu1 %v3985_v12, %s3843_s28  ;;  %3455 = vmatpush1.bf16.msra.mxu0 %v3454_v45 }
  0xa9   : > { %745 = vrot.lane.b32.xlu0 %v3988_v13, %s3843_s28  ;;  %3525 = vmatprep.subr.bf16.mxu1 %v3524_v46 }
  0xaa   : > { %3527 = vmatpush1.bf16.msra.mxu1 %v3526_v47  ;;  %v493_v40 = vpop.permute.xlu1 %492  ;;  %v491_v48 = vpop.permute.xlu0 %490 }
  0xab   : > { %v524_v49 = vsel %vm514_vm1, %v485_v43, %v493_v40  ;;  %v523_v50 = vsel %vm514_vm1, %v483_v44, %v491_v48 }
  0xac   : > { %v552_v51 = vmul.f32 %v538_v39, %v524_v49  ;;  %v548_v52 = vmul.f32 %v538_v39, %v523_v50  ;;  %731 = vrot.lane.b32.xlu1 %v3965_v8, %s3843_s28 }
  0xad   : > { %729 = vrot.lane.b32.xlu0 %v3968_v9, %s3843_s28 }
  0xae   : > { %v501_v54 = vpop.permute.xlu1 %500  ;;  %v499_v55 = vpop.permute.xlu0 %498  ;;  %v3456_v56 = vpack.c.bf16 %v552_v51, %v548_v52 }
  0xaf   : > { %v520_v57 = vsel %vm514_vm1, %v493_v40, %v501_v54  ;;  %v519_v58 = vsel %vm514_vm1, %v491_v48, %v499_v55 }
  0xb0   : > { %755 = vrot.lane.b32.xlu1 %v3995_v14, %s3843_s28  ;;  %3457 = vmatprep.subr.bf16.mxu0 %v3456_v56  ;;  %v553_v61 = vmul.f32 %v542_v53, %v520_v57  ;;  %v549_v62 = vmul.f32 %v542_v53, %v519_v58 }
  0xb1   : > { %753 = vrot.lane.b32.xlu0 %v3998_v15, %s3843_s28 }
  0xb2   : > { %v509_v63 = vpop.permute.xlu1 %508  ;;  %v507_v16 = vpop.permute.xlu0 %506  ;;  %v3530_v38 = vpack.c.bf16 %v553_v61, %v549_v62 }
  0xb3   : > { %v516_v21 = vsel %vm514_vm1, %v501_v54, %v509_v63  ;;  %v528_v22 = vsel %vm514_vm1, %v509_v63, %v485_v43  ;;  %v515_v24 = vsel %vm514_vm1, %v499_v55, %v507_v16  ;;  %v527_v25 = vsel %vm514_vm1, %v507_v16, %v483_v44 }
  0xb4   : > { %v551_v23 = vmul.f32 %v534_v59, %v528_v22  ;;  %v554_v26 = vmul.f32 %v546_v60, %v516_v21  ;;  %v547_v27 = vmul.f32 %v534_v59, %v527_v25  ;;  %v550_v29 = vmul.f32 %v546_v60, %v515_v24  ;;  %816 = vrot.lane.b32.xlu1 %v3935_v2, %s3844_s29 }
  0xb5   : > { %814 = vrot.lane.b32.xlu0 %v3925_v0, %s3844_s29  ;;  %v4253_v54 = vsub.s32 2, %v4084_v17 }
  0xb6   : > { %v489_v33 = vpop.permute.xlu1 %488  ;;  %v487_v34 = vpop.permute.xlu0 %486  ;;  %v3458_v35 = vpack.c.bf16 %v551_v23, %v547_v27  ;;  %v3528_v37 = vpack.c.bf16 %v554_v26, %v550_v29 }
  0xb8   : > { %824 = vrot.lane.b32.xlu1 %v3945_v4, %s3844_s29  ;;  %3459 = vmatpush1.bf16.msra.mxu0 %v3458_v35 }
  0xb9   : > { %822 = vrot.lane.b32.xlu0 %v3948_v5, %s3844_s29  ;;  %3529 = vmatprep.subr.bf16.mxu1 %v3528_v37 }
  0xba   : > { %3531 = vmatpush1.bf16.msra.mxu1 %v3530_v38  ;;  %v497_v41 = vpop.permute.xlu1 %496  ;;  %v495_v36 = vpop.permute.xlu0 %494 }
  0xbb   : > { %v526_v42 = vsel %vm514_vm1, %v489_v33, %v497_v41  ;;  %v525_v43 = vsel %vm514_vm1, %v487_v34, %v495_v36 }
  0xbc   : > { %v560_v44 = vmul.f32 %v538_v39, %v526_v42  ;;  %v556_v45 = vmul.f32 %v538_v39, %v525_v43  ;;  %808 = vrot.lane.b32.xlu1 %v3938_v3, %s3844_s29  ;;  %v615_v42 = vrot.slane %v4123_v31, %v4253_v54  ;;  %v627_v43 = vrot.slane %v4128_v32, %v4253_v54 }
  0xbd   : > { %806 = vrot.lane.b32.xlu0 %v3928_v1, %s3844_s29 }
  0xbe   : > { %v505_v46 = vpop.permute.xlu1 %504  ;;  %v503_v47 = vpop.permute.xlu0 %502  ;;  %v3460_v40 = vpack.c.bf16 %v560_v44, %v556_v45 }
  0xbf   : > { %v522_v48 = vsel %vm514_vm1, %v497_v41, %v505_v46  ;;  %v521_v49 = vsel %vm514_vm1, %v495_v36, %v503_v47 }
  0xc0   : > { %832 = vrot.lane.b32.xlu1 %v3955_v6, %s3844_s29  ;;  %3461 = vmatprep.subr.bf16.mxu0 %v3460_v40  ;;  %v561_v39 = vmul.f32 %v542_v53, %v522_v48  ;;  %v557_v50 = vmul.f32 %v542_v53, %v521_v49 }
  0xc1   : > { %830 = vrot.lane.b32.xlu0 %v3958_v7, %s3844_s29 }
  0xc2   : > { %v513_v51 = vpop.permute.xlu1 %512  ;;  %v511_v52 = vpop.permute.xlu0 %510  ;;  %v3534_v25 = vpack.c.bf16 %v561_v39, %v557_v50 }
  0xc3   : > { %v518_v55 = vsel %vm514_vm1, %v505_v46, %v513_v51  ;;  %v530_v56 = vsel %vm514_vm1, %v513_v51, %v489_v33  ;;  %v517_v57 = vsel %vm514_vm1, %v503_v47, %v511_v52  ;;  %v529_v58 = vsel %vm514_vm1, %v511_v52, %v487_v34 }
  0xc4   : > { %v559_v61 = vmul.f32 %v534_v59, %v530_v56  ;;  %v562_v62 = vmul.f32 %v546_v60, %v518_v55  ;;  %v555_v53 = vmul.f32 %v534_v59, %v529_v58  ;;  %v558_v63 = vmul.f32 %v546_v60, %v517_v57  ;;  %820 = vrot.lane.b32.xlu1 %v3975_v10, %s3844_s29 }
  0xc5   : > { %818 = vrot.lane.b32.xlu0 %v3978_v11, %s3844_s29  ;;  %v619_v59 = vrot.slane %v4098_v20, %v4253_v54  ;;  %v623_v34 = vrot.slane %v4114_v28, %v4253_v54 }
  0xc6   : > { %v566_v16 = vpop.permute.xlu1 %565  ;;  %v564_v21 = vpop.permute.xlu0 %563  ;;  %v3462_v22 = vpack.c.bf16 %v559_v61, %v555_v53  ;;  %v3532_v24 = vpack.c.bf16 %v562_v62, %v558_v63 }
  0xc8   : > { %828 = vrot.lane.b32.xlu1 %v3985_v12, %s3844_s29  ;;  %3463 = vmatpush1.bf16.msra.mxu0 %v3462_v22 }
  0xc9   : > { %826 = vrot.lane.b32.xlu0 %v3988_v13, %s3844_s29  ;;  %3533 = vmatprep.subr.bf16.mxu1 %v3532_v24 }
  0xca   : > { %3535 = vmatpush1.bf16.msra.mxu1 %v3534_v25  ;;  %v574_v60 = vpop.permute.xlu1 %573  ;;  %v572_v23 = vpop.permute.xlu0 %571 }
  0xcb   : > { %v605_v26 = vsel %vm595_vm2, %v566_v16, %v574_v60  ;;  %v604_v27 = vsel %vm595_vm2, %v564_v21, %v572_v23 }
  0xcc   : > { %v633_v29 = vmul.f32 %v619_v59, %v605_v26  ;;  %v629_v33 = vmul.f32 %v619_v59, %v604_v27  ;;  %812 = vrot.lane.b32.xlu1 %v3965_v8, %s3844_s29 }
  0xcd   : > { %810 = vrot.lane.b32.xlu0 %v3968_v9, %s3844_s29 }
  0xce   : > { %v582_v35 = vpop.permute.xlu1 %581  ;;  %v580_v37 = vpop.permute.xlu0 %579  ;;  %v3464_v38 = vpack.c.bf16 %v633_v29, %v629_v33 }
  0xcf   : > { %v601_v41 = vsel %vm595_vm2, %v574_v60, %v582_v35  ;;  %v600_v36 = vsel %vm595_vm2, %v572_v23, %v580_v37 }
  0xd0   : > { %836 = vrot.lane.b32.xlu1 %v3995_v14, %s3844_s29  ;;  %3465 = vmatprep.subr.bf16.mxu0 %v3464_v38  ;;  %v634_v44 = vmul.f32 %v623_v34, %v601_v41  ;;  %v630_v45 = vmul.f32 %v623_v34, %v600_v36 }
  0xd1   : > { %834 = vrot.lane.b32.xlu0 %v3998_v15, %s3844_s29 }
  0xd2   : > { %v590_v46 = vpop.permute.xlu1 %589  ;;  %v588_v47 = vpop.permute.xlu0 %587  ;;  %v3538_v62 = vpack.c.bf16 %v634_v44, %v630_v45 }
  0xd3   : > { %v597_v40 = vsel %vm595_vm2, %v582_v35, %v590_v46  ;;  %v609_v48 = vsel %vm595_vm2, %v590_v46, %v566_v16  ;;  %v596_v49 = vsel %vm595_vm2, %v580_v37, %v588_v47  ;;  %v608_v39 = vsel %vm595_vm2, %v588_v47, %v564_v21 }
  0xd4   : > { %v632_v50 = vmul.f32 %v615_v42, %v609_v48  ;;  %v635_v51 = vmul.f32 %v627_v43, %v597_v40  ;;  %v628_v52 = vmul.f32 %v615_v42, %v608_v39  ;;  %v631_v55 = vmul.f32 %v627_v43, %v596_v49  ;;  %897 = vrot.lane.b32.xlu1 %v3935_v2, %s3845_s30 }
  0xd5   : > { %895 = vrot.lane.b32.xlu0 %v3925_v0, %s3845_s30  ;;  %v4329_v37 = vsub.s32 3, %v4084_v17 }
  0xd6   : > { %v570_v56 = vpop.permute.xlu1 %569  ;;  %v568_v57 = vpop.permute.xlu0 %567  ;;  %v3466_v58 = vpack.c.bf16 %v632_v50, %v628_v52  ;;  %v3536_v61 = vpack.c.bf16 %v635_v51, %v631_v55 }
  0xd8   : > { %905 = vrot.lane.b32.xlu1 %v3945_v4, %s3845_s30  ;;  %3467 = vmatpush1.bf16.msra.mxu0 %v3466_v58  ;;  %v704_v58 = vrot.slane %v4114_v28, %v4329_v37 }
  0xd9   : > { %903 = vrot.lane.b32.xlu0 %v3948_v5, %s3845_s30  ;;  %3537 = vmatprep.subr.bf16.mxu1 %v3536_v61 }
  0xda   : > { %3539 = vmatpush1.bf16.msra.mxu1 %v3538_v62  ;;  %v578_v53 = vpop.permute.xlu1 %577  ;;  %v576_v63 = vpop.permute.xlu0 %575 }
  0xdb   : > { %v607_v16 = vsel %vm595_vm2, %v570_v56, %v578_v53  ;;  %v606_v21 = vsel %vm595_vm2, %v568_v57, %v576_v63 }
  0xdc   : > { %v641_v22 = vmul.f32 %v619_v59, %v607_v16  ;;  %v637_v24 = vmul.f32 %v619_v59, %v606_v21  ;;  %889 = vrot.lane.b32.xlu1 %v3938_v3, %s3845_s30  ;;  %v696_v21 = vrot.slane %v4123_v31, %v4329_v37 }
  0xdd   : > { %887 = vrot.lane.b32.xlu0 %v3928_v1, %s3845_s30 }
  0xde   : > { %v586_v25 = vpop.permute.xlu1 %585  ;;  %v584_v60 = vpop.permute.xlu0 %583  ;;  %v3468_v23 = vpack.c.bf16 %v641_v22, %v637_v24  ;;  %v708_v22 = vrot.slane %v4128_v32, %v4329_v37 }
  0xdf   : > { %v603_v26 = vsel %vm595_vm2, %v578_v53, %v586_v25  ;;  %v602_v27 = vsel %vm595_vm2, %v576_v63, %v584_v60 }
  0xe0   : > { %913 = vrot.lane.b32.xlu1 %v3955_v6, %s3845_s30  ;;  %3469 = vmatprep.subr.bf16.mxu0 %v3468_v23  ;;  %v642_v59 = vmul.f32 %v623_v34, %v603_v26  ;;  %v638_v29 = vmul.f32 %v623_v34, %v602_v27 }
  0xe1   : > { %911 = vrot.lane.b32.xlu0 %v3958_v7, %s3845_s30 }
  0xe2   : > { %v594_v33 = vpop.permute.xlu1 %593  ;;  %v592_v35 = vpop.permute.xlu0 %591  ;;  %v3542_v50 = vpack.c.bf16 %v642_v59, %v638_v29 }
  0xe3   : > { %v599_v38 = vsel %vm595_vm2, %v586_v25, %v594_v33  ;;  %v611_v41 = vsel %vm595_vm2, %v594_v33, %v570_v56  ;;  %v598_v36 = vsel %vm595_vm2, %v584_v60, %v592_v35  ;;  %v610_v44 = vsel %vm595_vm2, %v592_v35, %v568_v57  ;;  %v1050_v33 = vld [vmem:[%s6381_s3 + $0x8] sm:$0xff] }
  0xe4   : > { %v640_v45 = vmul.f32 %v615_v42, %v611_v41  ;;  %v643_v46 = vmul.f32 %v627_v43, %v599_v38  ;;  %v636_v34 = vmul.f32 %v615_v42, %v610_v44  ;;  %v639_v47 = vmul.f32 %v627_v43, %v598_v36  ;;  %901 = vrot.lane.b32.xlu1 %v3975_v10, %s3845_s30 }
  0xe5   : > { %899 = vrot.lane.b32.xlu0 %v3978_v11, %s3845_s30  ;;  %v700_v42 = vrot.slane %v4098_v20, %v4329_v37  ;;  %1138 = vmatprep.mubr.f32.mxu0 %v1050_v33 }
  0xe6   : > { %v647_v40 = vpop.permute.xlu1 %646  ;;  %v645_v48 = vpop.permute.xlu0 %644  ;;  %v3470_v49 = vpack.c.bf16 %v640_v45, %v636_v34  ;;  %v3540_v39 = vpack.c.bf16 %v643_v46, %v639_v47  ;;  %1316 = vmatprep.mubr.f32.mxu1 %v1050_v33 }
  0xe8   : > { %909 = vrot.lane.b32.xlu1 %v3985_v12, %s3845_s30  ;;  %3471 = vmatpush1.bf16.msra.mxu0 %v3470_v49 }
  0xe9   : > { %907 = vrot.lane.b32.xlu0 %v3988_v13, %s3845_s30  ;;  %3541 = vmatprep.subr.bf16.mxu1 %v3540_v39 }
  0xea   : > { %3543 = vmatpush1.bf16.msra.mxu1 %v3542_v50  ;;  %v655_v43 = vpop.permute.xlu1 %654  ;;  %v653_v51 = vpop.permute.xlu0 %652 }
  0xeb   : > { %v686_v52 = vsel %vm676_vm3, %v647_v40, %v655_v43  ;;  %v685_v55 = vsel %vm676_vm3, %v645_v48, %v653_v51 }
  0xec   : > { %v714_v56 = vmul.f32 %v700_v42, %v686_v52  ;;  %v710_v57 = vmul.f32 %v700_v42, %v685_v55  ;;  %893 = vrot.lane.b32.xlu1 %v3965_v8, %s3845_s30 }
  0xed   : > { %891 = vrot.lane.b32.xlu0 %v3968_v9, %s3845_s30 }
  0xee   : > { %v663_v61 = vpop.permute.xlu1 %662  ;;  %v661_v62 = vpop.permute.xlu0 %660  ;;  %v3472_v53 = vpack.c.bf16 %v714_v56, %v710_v57 }
  0xef   : > { %v682_v63 = vsel %vm676_vm3, %v655_v43, %v663_v61  ;;  %v681_v16 = vsel %vm676_vm3, %v653_v51, %v661_v62 }
  0xf0   : > { %917 = vrot.lane.b32.xlu1 %v3995_v14, %s3845_s30  ;;  %3473 = vmatprep.subr.bf16.mxu0 %v3472_v53  ;;  %v715_v24 = vmul.f32 %v704_v58, %v682_v63  ;;  %v711_v25 = vmul.f32 %v704_v58, %v681_v16  ;;  %v4408_v63 = vsub.s32 5, %v4084_v17 }
  0xf1   : > { %915 = vrot.lane.b32.xlu0 %v3998_v15, %s3845_s30 }
  0xf2   : > { %v671_v60 = vpop.permute.xlu1 %670  ;;  %v669_v23 = vpop.permute.xlu0 %668  ;;  %v3546_v47 = vpack.c.bf16 %v715_v24, %v711_v25  ;;  %6448 = vst [vmem:[#allocation5_spill] sm:$0xff] %v4408_v63 }
  0xf3   : > { %v678_v26 = vsel %vm676_vm3, %v663_v61, %v671_v60  ;;  %v690_v27 = vsel %vm676_vm3, %v671_v60, %v647_v40  ;;  %v677_v59 = vsel %vm676_vm3, %v661_v62, %v669_v23  ;;  %v689_v29 = vsel %vm676_vm3, %v669_v23, %v645_v48 }
  0xf4   : > { %v713_v35 = vmul.f32 %v696_v21, %v690_v27  ;;  %v716_v38 = vmul.f32 %v708_v22, %v678_v26  ;;  %v709_v41 = vmul.f32 %v696_v21, %v689_v29  ;;  %v712_v36 = vmul.f32 %v708_v22, %v677_v59  ;;  %978 = vrot.lane.b32.xlu1 %v3935_v2, %s3846_s9 }
  0xf5   : > { %976 = vrot.lane.b32.xlu0 %v3925_v0, %s3846_s9 }
  0xf6   : > { %v651_v44 = vpop.permute.xlu1 %650  ;;  %v649_v45 = vpop.permute.xlu0 %648  ;;  %v3474_v46 = vpack.c.bf16 %v713_v35, %v709_v41  ;;  %v3544_v34 = vpack.c.bf16 %v716_v38, %v712_v36  ;;  %v3480_v38 = vpack.c.bf16 %v3935_v2, %v3925_v0  ;;  %v3552_v41 = vpack.c.bf16 %v3955_v6, %v3958_v7 }
  0xf7   : > { %v3482_v36 = vpack.c.bf16 %v3938_v3, %v3928_v1  ;;  %v3484_v0 = vpack.c.bf16 %v3975_v10, %v3978_v11 }
  0xf8   : > { %986 = vrot.lane.b32.xlu1 %v3945_v4, %s3846_s9  ;;  %3475 = vmatpush1.bf16.msra.mxu0 %v3474_v46 }
  0xf9   : > { %984 = vrot.lane.b32.xlu0 %v3948_v5, %s3846_s9  ;;  %3545 = vmatprep.subr.bf16.mxu1 %v3544_v34 }
  0xfa   : > { %3547 = vmatpush1.bf16.msra.mxu1 %v3546_v47  ;;  %v659_v40 = vpop.permute.xlu1 %658  ;;  %v657_v48 = vpop.permute.xlu0 %656  ;;  %v3558_v47 = vpack.c.bf16 %v3985_v12, %v3988_v13 }
  0xfb   : > { %v688_v49 = vsel %vm676_vm3, %v651_v44, %v659_v40  ;;  %v687_v39 = vsel %vm676_vm3, %v649_v45, %v657_v48 }
  0xfc   : > { %v722_v50 = vmul.f32 %v700_v42, %v688_v49  ;;  %v718_v43 = vmul.f32 %v700_v42, %v687_v39  ;;  %970 = vrot.lane.b32.xlu1 %v3938_v3, %s3846_s9  ;;  %v777_v3 = vrot.slane %v4123_v31, %v4408_v63  ;;  %v789_v39 = vrot.slane %v4128_v32, %v4408_v63 }
  0xfd   : > { %968 = vrot.lane.b32.xlu0 %v3928_v1, %s3846_s9 }
  0xfe   : > { %v667_v51 = vpop.permute.xlu1 %666  ;;  %v665_v52 = vpop.permute.xlu0 %664  ;;  %v3476_v55 = vpack.c.bf16 %v722_v50, %v718_v43 }
  0xff   : > { %v684_v56 = vsel %vm676_vm3, %v659_v40, %v667_v51  ;;  %v683_v57 = vsel %vm676_vm3, %v657_v48, %v665_v52 }
 0x100   : > { %994 = vrot.lane.b32.xlu1 %v3955_v6, %s3846_s9  ;;  %3477 = vmatprep.subr.bf16.mxu0 %v3476_v55  ;;  %v723_v42 = vmul.f32 %v704_v58, %v684_v56  ;;  %v719_v61 = vmul.f32 %v704_v58, %v683_v57 }
 0x101   : > { %992 = vrot.lane.b32.xlu0 %v3958_v7, %s3846_s9  ;;  %v3554_v7 = vpack.c.bf16 %v3945_v4, %v3948_v5  ;;  %v3486_v4 = vpack.c.bf16 %v3965_v8, %v3968_v9 }
 0x102   : > { %v675_v62 = vpop.permute.xlu1 %674  ;;  %v673_v53 = vpop.permute.xlu0 %672 }
 0x103   : > { %v680_v16 = vsel %vm676_vm3, %v667_v51, %v675_v62  ;;  %v692_v24 = vsel %vm676_vm3, %v675_v62, %v651_v44  ;;  %v679_v25 = vsel %vm676_vm3, %v665_v52, %v673_v53  ;;  %v691_v60 = vsel %vm676_vm3, %v673_v53, %v649_v45 }
 0x104   : > { %v721_v23 = vmul.f32 %v696_v21, %v692_v24  ;;  %v724_v26 = vmul.f32 %v708_v22, %v680_v16  ;;  %v717_v58 = vmul.f32 %v696_v21, %v691_v60  ;;  %v720_v27 = vmul.f32 %v708_v22, %v679_v25  ;;  %982 = vrot.lane.b32.xlu1 %v3975_v10, %s3846_s9 }
 0x105   : > { %980 = vrot.lane.b32.xlu0 %v3978_v11, %s3846_s9  ;;  %v3550_v21 = vpack.c.bf16 %v723_v42, %v719_v61  ;;  %v4431_v22 = vrot.slane %v4098_v20, %v4408_v63  ;;  %v3556_v10 = vpack.c.bf16 %v3995_v14, %v3998_v15 }
 0x106   : > { %v736_v59 = vpop.permute.xlu1 %735  ;;  %v734_v29 = vpop.permute.xlu0 %733  ;;  %v3478_v33 = vpack.c.bf16 %v721_v23, %v717_v58  ;;  %v3548_v35 = vpack.c.bf16 %v724_v26, %v720_v27 }
 0x108   : > { %990 = vrot.lane.b32.xlu1 %v3985_v12, %s3846_s9  ;;  %3479 = vmatpush1.bf16.msra.mxu0 %v3478_v33 }
 0x109   : > { %988 = vrot.lane.b32.xlu0 %v3988_v13, %s3846_s9  ;;  %3549 = vmatprep.subr.bf16.mxu1 %v3548_v35 }
 0x10a   : > { %3551 = vmatpush1.bf16.msra.mxu1 %v3550_v21  ;;  %v744_v2 = vpop.permute.xlu1 %743  ;;  %v742_v6 = vpop.permute.xlu0 %741  ;;  %3481 = vmatprep.subr.bf16.mxu0 %v3480_v38 }
 0x10b   : > { %v763_v44 = vsel %vm757_vm4, %v736_v59, %v744_v2  ;;  %v762_v1 = vsel %vm757_vm4, %v734_v29, %v742_v6  ;;  %3553 = vmatprep.subr.bf16.mxu1 %v3552_v41 }
 0x10c   : > { %v795_v11 = vmul.f32 %v4431_v22, %v763_v44  ;;  %v791_v45 = vmul.f32 %v4431_v22, %v762_v1  ;;  %974 = vrot.lane.b32.xlu1 %v3965_v8, %s3846_s9  ;;  %3483 = vmatpush1.bf16.msra.mxu0 %v3482_v36  ;;  %v785_v8 = vrot.slane %v4114_v28, %v4408_v63 }
 0x10d   : > { %972 = vrot.lane.b32.xlu0 %v3968_v9, %s3846_s9  ;;  %3485 = vmatprep.subr.bf16.mxu0 %v3484_v0 }
 0x10e   : > { %v728_v5 = vpop.permute.xlu1 %727  ;;  %v726_v46 = vpop.permute.xlu0 %725  ;;  %v3488_v34 = vpack.c.bf16 %v795_v11, %v791_v45  ;;  %3555 = vmatpush1.bf16.msra.mxu1 %v3554_v7 }
 0x10f   : > { %v767_v40 = vsel %vm757_vm4, %v728_v5, %v736_v59  ;;  %v766_v48 = vsel %vm757_vm4, %v726_v46, %v734_v29  ;;  %3557 = vmatprep.subr.bf16.mxu1 %v3556_v10 }
 0x110   : > { %v794_v49 = vmul.f32 %v777_v3, %v767_v40  ;;  %v790_v9 = vmul.f32 %v777_v3, %v766_v48  ;;  %998 = vrot.lane.b32.xlu1 %v3995_v14, %s3846_s9  ;;  %3487 = vmatpush1.bf16.msra.mxu0 %v3486_v4 }
 0x111   : > { %996 = vrot.lane.b32.xlu0 %v3998_v15, %s3846_s9  ;;  %3489 = vmatprep.subr.bf16.mxu0 %v3488_v34 }
 0x112   : > { %v752_v12 = vpop.permute.xlu1 %751  ;;  %v750_v13 = vpop.permute.xlu0 %749  ;;  %v3490_v50 = vpack.c.bf16 %v794_v49, %v790_v9  ;;  %3559 = vmatpush1.bf16.msra.mxu1 %v3558_v47 }
 0x113   : > { %v759_v43 = vsel %vm757_vm4, %v744_v2, %v752_v12  ;;  %v771_v51 = vsel %vm757_vm4, %v752_v12, %v728_v5  ;;  %v758_v14 = vsel %vm757_vm4, %v742_v6, %v750_v13  ;;  %v770_v52 = vsel %vm757_vm4, %v750_v13, %v726_v46 }
 0x114   : > { %v796_v55 = vmul.f32 %v785_v8, %v759_v43  ;;  %v797_v56 = vmul.f32 %v789_v39, %v771_v51  ;;  %v792_v15 = vmul.f32 %v785_v8, %v758_v14  ;;  %v793_v57 = vmul.f32 %v789_v39, %v770_v52  ;;  %3491 = vmatpush1.bf16.msra.mxu0 %v3490_v50 }
 0x115   : > { %v4494_v2 = vsub.s32 6, %v4084_v17 }
 0x116   : > { %v740_v42 = vpop.permute.xlu1 %739  ;;  %v3560_v61 = vpack.c.bf16 %v797_v56, %v793_v57  ;;  %v3562_v62 = vpack.c.bf16 %v796_v55, %v792_v15 }
 0x117   : > { %v738_v53 = vpop.permute.xlu0 %737  ;;  %6449 = vst [vmem:[#allocation6_spill] sm:$0xff] %v4494_v2  ;;  %v862_v46 = vrot.slane %v4098_v20, %v4494_v2  ;;  %v858_v49 = vrot.slane %v4123_v31, %v4494_v2  ;;  %v866_v51 = vrot.slane %v4114_v28, %v4494_v2  ;;  %v870_v14 = vrot.slane %v4128_v32, %v4494_v2 }
 0x118   : > { %3561 = vmatprep.subr.bf16.mxu1 %v3560_v61 }
 0x119   : > { %3563 = vmatpush1.bf16.msra.mxu1 %v3562_v62 }
 0x11a   : > { %v748_v16 = vpop.permute.xlu1 %747 }
 0x11b   : > { %v765_v24 = vsel %vm757_vm4, %v740_v42, %v748_v16  ;;  %v746_v25 = vpop.permute.xlu0 %745 }
 0x11c   : > { %v803_v60 = vmul.f32 %v4431_v22, %v765_v24  ;;  %v764_v23 = vsel %vm757_vm4, %v738_v53, %v746_v25 }
 0x11d   : > { %v799_v26 = vmul.f32 %v4431_v22, %v764_v23 }
 0x11e   : > { %v732_v58 = vpop.permute.xlu1 %731 }
 0x11f   : > { %v769_v27 = vsel %vm757_vm4, %v732_v58, %v740_v42  ;;  %v730_v59 = vpop.permute.xlu0 %729  ;;  %v3492_v29 = vpack.c.bf16 %v803_v60, %v799_v26 }
 0x120   : > { %v802_v33 = vmul.f32 %v777_v3, %v769_v27  ;;  %v768_v35 = vsel %vm757_vm4, %v730_v59, %v738_v53 }
 0x121   : > { %v798_v38 = vmul.f32 %v777_v3, %v768_v35  ;;  %3493 = vmatprep.subr.bf16.mxu0 %v3492_v29 }
 0x122   : > { %v756_v41 = vpop.permute.xlu1 %755 }
 0x123   : > { %v761_v21 = vsel %vm757_vm4, %v748_v16, %v756_v41  ;;  %v773_v36 = vsel %vm757_vm4, %v756_v41, %v732_v58  ;;  %v754_v22 = vpop.permute.xlu0 %753  ;;  %v3494_v0 = vpack.c.bf16 %v802_v33, %v798_v38 }
 0x124   : > { %v804_v6 = vmul.f32 %v785_v8, %v761_v21  ;;  %v805_v7 = vmul.f32 %v789_v39, %v773_v36  ;;  %v760_v44 = vsel %vm757_vm4, %v746_v25, %v754_v22  ;;  %v772_v1 = vsel %vm757_vm4, %v754_v22, %v730_v59 }
 0x125   : > { %v800_v3 = vmul.f32 %v785_v8, %v760_v44  ;;  %v801_v10 = vmul.f32 %v789_v39, %v772_v1  ;;  %3495 = vmatpush1.bf16.msra.mxu0 %v3494_v0 }
 0x126   : > { %v817_v11 = vpop.permute.xlu1 %816 }
 0x127   : > { %v815_v45 = vpop.permute.xlu0 %814  ;;  %v3564_v4 = vpack.c.bf16 %v805_v7, %v801_v10  ;;  %v3566_v5 = vpack.c.bf16 %v804_v6, %v800_v3  ;;  %v4538_v10 = vsub.s32 7, %v4084_v17  ;;  %v3828_v17 = vld [vmem:[%s6380_s2 + $0x8] sm:$0xff] }
 0x129   : > { %3565 = vmatprep.subr.bf16.mxu1 %v3564_v4  ;;  %6450 = vst [vmem:[#allocation7_spill] sm:$0xff] %v4538_v10 }
 0x12a   : > { %3567 = vmatpush1.bf16.msra.mxu1 %v3566_v5  ;;  %v825_v34 = vpop.permute.xlu1 %824 }
 0x12b   : > { %v844_v47 = vsel %vm838_vm5, %v817_v11, %v825_v34  ;;  %v823_v40 = vpop.permute.xlu0 %822 }
 0x12c   : > { %v876_v48 = vmul.f32 %v862_v46, %v844_v47  ;;  %v843_v8 = vsel %vm838_vm5, %v815_v45, %v823_v40 }
 0x12d   : > { %v872_v9 = vmul.f32 %v862_v46, %v843_v8 }
 0x12e   : > { %v809_v39 = vpop.permute.xlu1 %808 }
 0x12f   : > { %v848_v12 = vsel %vm838_vm5, %v809_v39, %v817_v11  ;;  %v807_v20 = vpop.permute.xlu0 %806  ;;  %v3496_v13 = vpack.c.bf16 %v876_v48, %v872_v9 }
 0x130   : > { %v875_v50 = vmul.f32 %v858_v49, %v848_v12  ;;  %v847_v43 = vsel %vm838_vm5, %v807_v20, %v815_v45 }
 0x131   : > { %v871_v52 = vmul.f32 %v858_v49, %v847_v43  ;;  %3497 = vmatprep.subr.bf16.mxu0 %v3496_v13 }
 0x132   : > { %v833_v55 = vpop.permute.xlu1 %832 }
 0x133   : > { %v840_v56 = vsel %vm838_vm5, %v825_v34, %v833_v55  ;;  %v852_v15 = vsel %vm838_vm5, %v833_v55, %v809_v39  ;;  %v831_v57 = vpop.permute.xlu0 %830  ;;  %v3498_v42 = vpack.c.bf16 %v875_v50, %v871_v52  ;;  %v939_v50 = vrot.slane %v4123_v31, %v4538_v10  ;;  %v3830_v31 = vld [vmem:[%s6380_s2 + $0x18] sm:$0xff] }
 0x134   : > { %v877_v61 = vmul.f32 %v866_v51, %v840_v56  ;;  %v878_v62 = vmul.f32 %v870_v14, %v852_v15  ;;  %v839_v53 = vsel %vm838_vm5, %v823_v40, %v831_v57  ;;  %v851_v28 = vsel %vm838_vm5, %v831_v57, %v807_v20  ;;  %v3829_v57 = vld [vmem:[%s6380_s2 + $0x10] sm:$0xff] }
 0x135   : > { %v873_v32 = vmul.f32 %v866_v51, %v839_v53  ;;  %v874_v16 = vmul.f32 %v870_v14, %v851_v28  ;;  %3499 = vmatpush1.bf16.msra.mxu0 %v3498_v42  ;;  %v947_v42 = vrot.slane %v3829_v57, %v4538_v10 }
 0x136   : > { %v821_v24 = vpop.permute.xlu1 %820 }
 0x137   : > { %v819_v25 = vpop.permute.xlu0 %818  ;;  %v3568_v60 = vpack.c.bf16 %v878_v62, %v874_v16  ;;  %v3570_v23 = vpack.c.bf16 %v877_v61, %v873_v32  ;;  %v951_v61 = vrot.slane %v3830_v31, %v4538_v10 }
 0x139   : > { %3569 = vmatprep.subr.bf16.mxu1 %v3568_v60 }
 0x13a   : > { %3571 = vmatpush1.bf16.msra.mxu1 %v3570_v23  ;;  %v829_v26 = vpop.permute.xlu1 %828 }
 0x13b   : > { %v846_v58 = vsel %vm838_vm5, %v821_v24, %v829_v26  ;;  %v827_v27 = vpop.permute.xlu0 %826 }
 0x13c   : > { %v884_v59 = vmul.f32 %v862_v46, %v846_v58  ;;  %v845_v29 = vsel %vm838_vm5, %v819_v25, %v827_v27 }
 0x13d   : > { %v880_v33 = vmul.f32 %v862_v46, %v845_v29 }
 0x13e   : > { %v813_v35 = vpop.permute.xlu1 %812 }
 0x13f   : > { %v850_v38 = vsel %vm838_vm5, %v813_v35, %v821_v24  ;;  %v811_v41 = vpop.permute.xlu0 %810  ;;  %v3500_v21 = vpack.c.bf16 %v884_v59, %v880_v33 }
 0x140   : > { %v883_v36 = vmul.f32 %v858_v49, %v850_v38  ;;  %v849_v22 = vsel %vm838_vm5, %v811_v41, %v819_v25 }
 0x141   : > { %v879_v0 = vmul.f32 %v858_v49, %v849_v22  ;;  %3501 = vmatprep.subr.bf16.mxu0 %v3500_v21  ;;  %v943_v49 = vrot.slane %v3828_v17, %v4538_v10 }
 0x142   : > { %v837_v6 = vpop.permute.xlu1 %836 }
 0x143   : > { %v842_v7 = vsel %vm838_vm5, %v829_v26, %v837_v6  ;;  %v854_v44 = vsel %vm838_vm5, %v837_v6, %v813_v35  ;;  %v835_v1 = vpop.permute.xlu0 %834  ;;  %v3502_v3 = vpack.c.bf16 %v883_v36, %v879_v0 }
 0x144   : > { %v885_v11 = vmul.f32 %v866_v51, %v842_v7  ;;  %v886_v45 = vmul.f32 %v870_v14, %v854_v44  ;;  %v841_v4 = vsel %vm838_vm5, %v827_v27, %v835_v1  ;;  %v853_v5 = vsel %vm838_vm5, %v835_v1, %v811_v41 }
 0x145   : > { %v881_v46 = vmul.f32 %v866_v51, %v841_v4  ;;  %v882_v34 = vmul.f32 %v870_v14, %v853_v5  ;;  %3503 = vmatpush1.bf16.msra.mxu0 %v3502_v3 }
 0x146   : > { %v898_v47 = vpop.permute.xlu1 %897 }
 0x147   : > { %v896_v40 = vpop.permute.xlu0 %895  ;;  %v3572_v48 = vpack.c.bf16 %v886_v45, %v882_v34  ;;  %v3574_v8 = vpack.c.bf16 %v885_v11, %v881_v46 }
 0x149   : > { %3573 = vmatprep.subr.bf16.mxu1 %v3572_v48 }
 0x14a   : > { %3575 = vmatpush1.bf16.msra.mxu1 %v3574_v8  ;;  %v906_v9 = vpop.permute.xlu1 %905 }
 0x14b   : > { %v925_v39 = vsel %vm919_vm6, %v898_v47, %v906_v9  ;;  %v904_v12 = vpop.permute.xlu0 %903 }
 0x14c   : > { %v957_v20 = vmul.f32 %v943_v49, %v925_v39  ;;  %v924_v13 = vsel %vm919_vm6, %v896_v40, %v904_v12  ;;  %v1049_v39 = vld [vmem:[%s6381_s3] sm:$0xff] }
 0x14d   : > { %v953_v43 = vmul.f32 %v943_v49, %v924_v13 }
 0x14e   : > { %v890_v51 = vpop.permute.xlu1 %889 }
 0x14f   : > { %v929_v14 = vsel %vm919_vm6, %v890_v51, %v898_v47  ;;  %v888_v52 = vpop.permute.xlu0 %887  ;;  %v3504_v55 = vpack.c.bf16 %v957_v20, %v953_v43  ;;  %v1053_v20 = vld [vmem:[%s6381_s3 + $0x20] sm:$0xff] }
 0x150   : > { %v956_v56 = vmul.f32 %v939_v50, %v929_v14  ;;  %v928_v15 = vsel %vm919_vm6, %v888_v52, %v896_v40  ;;  %v1052_v14 = vld [vmem:[%s6381_s3 + $0x18] sm:$0xff] }
 0x151   : > { %v952_v62 = vmul.f32 %v939_v50, %v928_v15  ;;  %3505 = vmatprep.subr.bf16.mxu0 %v3504_v55  ;;  %v1056_v55 = vld [vmem:[%s6381_s3 + $0x38] sm:$0xff] }
 0x152   : > { %v914_v53 = vpop.permute.xlu1 %913 }
 0x153   : > { %v921_v28 = vsel %vm919_vm6, %v906_v9, %v914_v53  ;;  %v933_v32 = vsel %vm919_vm6, %v914_v53, %v890_v51  ;;  %v912_v16 = vpop.permute.xlu0 %911  ;;  %v3506_v24 = vpack.c.bf16 %v956_v56, %v952_v62  ;;  %v4601_v51 = vld [vmem:[%s6380_s2 + $0x28] ss:$0 sm:$0xff]  ;;  %v1055_v62 = vld [vmem:[%s6381_s3 + $0x30] sm:$0xff] }
 0x154   : > { %v958_v25 = vmul.f32 %v947_v42, %v921_v28  ;;  %v959_v60 = vmul.f32 %v951_v61, %v933_v32  ;;  %v920_v23 = vsel %vm919_vm6, %v904_v12, %v912_v16  ;;  %v932_v26 = vsel %vm919_vm6, %v912_v16, %v888_v52 }
 0x155   : > { %v954_v58 = vmul.f32 %v947_v42, %v920_v23  ;;  %v955_v27 = vmul.f32 %v951_v61, %v932_v26  ;;  %3507 = vmatpush1.bf16.msra.mxu0 %v3506_v24  ;;  %v1059_v24 = vld [vmem:[%s6381_s3 + $0x50] sm:$0xff] }
 0x156   : > { %v902_v59 = vpop.permute.xlu1 %901  ;;  %v3414_v26 = vld [vmem:[%s6380_s2 + $0x30] ss:$0 sm:$0xff] }
 0x157   : > { %v900_v29 = vpop.permute.xlu0 %899  ;;  %v3576_v33 = vpack.c.bf16 %v959_v60, %v955_v27  ;;  %v3578_v35 = vpack.c.bf16 %v958_v25, %v954_v58  ;;  %v3415_v58 = vld [vmem:[%s6380_s2 + $0x38] ss:$0 sm:$0xff]  ;;  %v1058_v27 = vld [vmem:[%s6381_s3 + $0x48] sm:$0xff] }
 0x159   : > { %3577 = vmatprep.subr.bf16.mxu1 %v3576_v33 }
 0x15a   : > { %3579 = vmatpush1.bf16.msra.mxu1 %v3578_v35  ;;  %v910_v38 = vpop.permute.xlu1 %909 }
 0x15b   : > { %v927_v41 = vsel %vm919_vm6, %v902_v59, %v910_v38  ;;  %v908_v21 = vpop.permute.xlu0 %907 }
 0x15c   : > { %v965_v36 = vmul.f32 %v943_v49, %v927_v41  ;;  %v926_v22 = vsel %vm919_vm6, %v900_v29, %v908_v21 }
 0x15d   : > { %v961_v0 = vmul.f32 %v943_v49, %v926_v22 }
 0x15e   : > { %v894_v6 = vpop.permute.xlu1 %893 }
 0x15f   : > { %v931_v7 = vsel %vm919_vm6, %v894_v6, %v902_v59  ;;  %v892_v44 = vpop.permute.xlu0 %891  ;;  %v3508_v1 = vpack.c.bf16 %v965_v36, %v961_v0 }
 0x160   : > { %v964_v3 = vmul.f32 %v939_v50, %v931_v7  ;;  %v930_v11 = vsel %vm919_vm6, %v892_v44, %v900_v29 }
 0x161   : > { %v960_v45 = vmul.f32 %v939_v50, %v930_v11  ;;  %3509 = vmatprep.subr.bf16.mxu0 %v3508_v1 }
 0x162   : > { %v918_v4 = vpop.permute.xlu1 %917 }
 0x163   : > { %v923_v5 = vsel %vm919_vm6, %v910_v38, %v918_v4  ;;  %v935_v46 = vsel %vm919_vm6, %v918_v4, %v894_v6  ;;  %v916_v34 = vpop.permute.xlu0 %915  ;;  %v3510_v47 = vpack.c.bf16 %v964_v3, %v960_v45 }
 0x164   : > { %v966_v40 = vmul.f32 %v947_v42, %v923_v5  ;;  %v967_v48 = vmul.f32 %v951_v61, %v935_v46  ;;  %v922_v8 = vsel %vm919_vm6, %v908_v21, %v916_v34  ;;  %v934_v17 = vsel %vm919_vm6, %v916_v34, %v892_v44 }
 0x165   : > { %v962_v49 = vmul.f32 %v947_v42, %v922_v8  ;;  %v963_v9 = vmul.f32 %v951_v61, %v934_v17  ;;  %3511 = vmatpush1.bf16.msra.mxu0 %v3510_v47  ;;  %v3412_v61 = vld [vmem:[%s6380_s2 + $0x20] ss:$0 sm:$0xff]  ;;  %v6391_v44 = vmov 0.0  }
 0x166   : > { %v979_v12 = vpop.permute.xlu1 %978 }
 0x167   : > { %v977_v13 = vpop.permute.xlu0 %976  ;;  %v3580_v50 = vpack.c.bf16 %v967_v48, %v963_v9  ;;  %v3582_v43 = vpack.c.bf16 %v966_v40, %v962_v49 }
 0x168   : > { %1139 = vmatmul.mubr.f32.vlgmr.msra.gmra.mrb[0].mxu0 %v1049_v39 }
 0x169   : > { %3581 = vmatprep.subr.bf16.mxu1 %v3580_v50  ;;  %1144 = vmatprep.mubr.f32.mxu0 %v1053_v20 }
 0x16a   : > { %3583 = vmatpush1.bf16.msra.mxu1 %v3582_v43  ;;  %v987_v52 = vpop.permute.xlu1 %986 }
 0x16b   : > { %v1006_v56 = vsel %vm1000_vm7, %v979_v12, %v987_v52  ;;  %v985_v15 = vpop.permute.xlu0 %984 }
 0x16c   : > { %v1038_v57 = vmul.f32 %v4601_v51, %v1006_v56  ;;  %v1005_v42 = vsel %vm1000_vm7, %v977_v13, %v985_v15  ;;  %1145 = vmatmul.mubr.f32.gmra.mrb[2].mxu0 %v1052_v14 }
 0x16d   : > { %v1034_v31 = vmul.f32 %v4601_v51, %v1005_v42  ;;  %1317 = vmatmul.mubr.f32.vlgmr.msra.gmra.mrb[0].mxu1 %v1049_v39  ;;  %1150 = vmatprep.mubr.f32.mxu0 %v1056_v55 }
 0x16e   : > { %v971_v53 = vpop.permute.xlu1 %970  ;;  %1322 = vmatprep.mubr.f32.mxu1 %v1053_v20 }
 0x16f   : > { %v1010_v28 = vsel %vm1000_vm7, %v971_v53, %v979_v12  ;;  %v969_v32 = vpop.permute.xlu0 %968  ;;  %v3512_v16 = vpack.c.bf16 %v1038_v57, %v1034_v31  ;;  %v1051_v57 = vld [vmem:[%s6381_s3 + $0x10] sm:$0xff] }
 0x170   : > { %v1037_v25 = vmul.f32 %v3412_v61, %v1010_v28  ;;  %v1009_v60 = vsel %vm1000_vm7, %v969_v32, %v977_v13  ;;  %1151 = vmatmul.mubr.f32.gmra.mrb[4].mxu0 %v1055_v62 }
 0x171   : > { %v1033_v23 = vmul.f32 %v3412_v61, %v1009_v60  ;;  %3513 = vmatprep.subr.bf16.mxu0 %v3512_v16  ;;  %1323 = vmatmul.mubr.f32.gmra.mrb[2].mxu1 %v1052_v14 }
 0x172   : > { %v995_v59 = vpop.permute.xlu1 %994  ;;  %1156 = vmatprep.mubr.f32.mxu0 %v1059_v24  ;;  %1328 = vmatprep.mubr.f32.mxu1 %v1056_v55 }
 0x173   : > { %v3514_v29 = vpack.c.bf16 %v1037_v25, %v1033_v23  ;;  %v1002_v33 = vsel %vm1000_vm7, %v987_v52, %v995_v59  ;;  %v1014_v35 = vsel %vm1000_vm7, %v995_v59, %v971_v53  ;;  %v993_v38 = vpop.permute.xlu0 %992  ;;  %v1060_v53 = vld [vmem:[%s6381_s3 + $0x58] sm:$0xff] }
 0x174   : > { %v1039_v41 = vmul.f32 %v3414_v26, %v1002_v33  ;;  %v1040_v21 = vmul.f32 %v3415_v58, %v1014_v35  ;;  %v1001_v36 = vsel %vm1000_vm7, %v985_v15, %v993_v38  ;;  %v1013_v22 = vsel %vm1000_vm7, %v993_v38, %v969_v32  ;;  %1157 = vmatmul.mubr.f32.gmra.mrb[6].mxu0 %v1058_v27 }
 0x175   : > { %v1035_v0 = vmul.f32 %v3414_v26, %v1001_v36  ;;  %v1036_v6 = vmul.f32 %v3415_v58, %v1013_v22  ;;  %3515 = vmatpush1.bf16.msra.mxu0 %v3514_v29  ;;  %1329 = vmatmul.mubr.f32.gmra.mrb[4].mxu1 %v1055_v62  ;;  %v1057_v62 = vld [vmem:[%s6381_s3 + $0x40] sm:$0xff] }
 0x176   : > { %v983_v7 = vpop.permute.xlu1 %982  ;;  %1227 = vmatprep.mubr.f32.mxu0 %v6391_v44  ;;  %1334 = vmatprep.mubr.f32.mxu1 %v1059_v24 }
 0x177   : > { %v3586_v1 = vpack.c.bf16 %v1039_v41, %v1035_v0  ;;  %v981_v3 = vpop.permute.xlu0 %980  ;;  %v3584_v11 = vpack.c.bf16 %v1040_v21, %v1036_v6 }
 0x179   : > { %3585 = vmatprep.subr.bf16.mxu1 %v3584_v11  ;;  %1335 = vmatmul.mubr.f32.gmra.mrb[6].mxu1 %v1058_v27 }
 0x17a   : > { %3587 = vmatpush1.bf16.msra.mxu1 %v3586_v1  ;;  %v991_v45 = vpop.permute.xlu1 %990  ;;  %1405 = vmatprep.mubr.f32.mxu1 %v6391_v44 }
 0x17b   : > { %v1008_v4 = vsel %vm1000_vm7, %v983_v7, %v991_v45  ;;  %v989_v5 = vpop.permute.xlu0 %988 }
 0x17c   : > { %v1046_v46 = vmul.f32 %v4601_v51, %v1008_v4  ;;  %v1007_v34 = vsel %vm1000_vm7, %v981_v3, %v989_v5 }
 0x17d   : > { %v1042_v47 = vmul.f32 %v4601_v51, %v1007_v34 }
 0x17e   : > { %v975_v40 = vpop.permute.xlu1 %974 }
 0x17f   : > { %v1012_v48 = vsel %vm1000_vm7, %v975_v40, %v983_v7  ;;  %v973_v8 = vpop.permute.xlu0 %972  ;;  %v3516_v17 = vpack.c.bf16 %v1046_v46, %v1042_v47 }
 0x180   : > { %v1045_v49 = vmul.f32 %v3412_v61, %v1012_v48  ;;  %v1011_v9 = vsel %vm1000_vm7, %v973_v8, %v981_v3 }
 0x181   : > { %v1041_v39 = vmul.f32 %v3412_v61, %v1011_v9  ;;  %3517 = vmatprep.subr.bf16.mxu0 %v3516_v17  ;;  %v1054_v61 = vld [vmem:[%s6381_s3 + $0x28] sm:$0xff] }
 0x182   : > { %v999_v12 = vpop.permute.xlu1 %998 }
 0x183   : > { %v3518_v20 = vpack.c.bf16 %v1045_v49, %v1041_v39  ;;  %v1004_v13 = vsel %vm1000_vm7, %v991_v45, %v999_v12  ;;  %v1016_v50 = vsel %vm1000_vm7, %v999_v12, %v975_v40  ;;  %v997_v43 = vpop.permute.xlu0 %996 }
 0x184   : > { %v1047_v51 = vmul.f32 %v3414_v26, %v1004_v13  ;;  %v1048_v14 = vmul.f32 %v3415_v58, %v1016_v50  ;;  %v1003_v52 = vsel %vm1000_vm7, %v989_v5, %v997_v43  ;;  %v1015_v55 = vsel %vm1000_vm7, %v997_v43, %v973_v8 }
 0x185   : > { %v1043_v56 = vmul.f32 %v3414_v26, %v1003_v52  ;;  %v1044_v15 = vmul.f32 %v3415_v58, %v1015_v55  ;;  %3519 = vmatpush1.bf16.msra.mxu0 %v3518_v20 }
 0x187   : > { %v3590_v42 = vpack.c.bf16 %v1047_v51, %v1043_v56  ;;  %v3588_v31 = vpack.c.bf16 %v1048_v14, %v1044_v15  ;;  %v4774_v15 = vld [vmem:[%s6382_s4] sm:$0xff] }
 0x188   : > { %3416 = vmatmul.mubr.msk.f32.vlgmr.msra.gmra.mrb[0].mxu0 %vm1061_vm8, %v1051_v57 }
 0x189   : > { %3589 = vmatprep.subr.bf16.mxu1 %v3588_v31  ;;  %1233 = vmatprep.mubr.f32.mxu0 %v6391_v44  ;;  %v1486_v31 = vmul.f32 %v4774_v15, %v4774_v15 }
 0x18a   : > { %3591 = vmatpush1.bf16.msra.mxu1 %v3590_v42  ;;  %v1474_v42 = vmul.f32 2.0, %v4774_v15 }
 0x18c   : > { %3417 = vmatmul.mubr.msk.f32.gmra.mrb[2].mxu0 %vm1061_vm8, %v1054_v61 }
 0x18d   : > { %3420 = vmatmul.mubr.msk.f32.vlgmr.msra.gmra.mrb[0].mxu1 %vm1061_vm8, %v1051_v57  ;;  %1239 = vmatprep.mubr.f32.mxu0 %v6391_v44  ;;  %v1466_v57 = vmul.f32 256.0, %v4774_v15 }
 0x18e   : > { %1411 = vmatprep.mubr.f32.mxu1 %v6391_v44 }
 0x190   : > { %3418 = vmatmul.mubr.msk.f32.gmra.mrb[4].mxu0 %vm1061_vm8, %v1057_v62 }
 0x191   : > { %3421 = vmatmul.mubr.msk.f32.gmra.mrb[2].mxu1 %vm1061_vm8, %v1054_v61  ;;  %1245 = vmatprep.mubr.f32.mxu0 %v6391_v44 }
 0x192   : > { %1417 = vmatprep.mubr.f32.mxu1 %v6391_v44 }
 0x194   : > { %3419 = vmatmul.mubr.msk.f32.gmra.mrb[6].mxu0 %vm1061_vm8, %v1060_v53 }
 0x195   : > { %3422 = vmatmul.mubr.msk.f32.gmra.mrb[4].mxu1 %vm1061_vm8, %v1057_v62 }
 0x196   : > { %1423 = vmatprep.mubr.f32.mxu1 %v6391_v44 }
 0x199   : > { %3423 = vmatmul.mubr.msk.f32.gmra.mrb[6].mxu1 %vm1061_vm8, %v1060_v53 }
 0x25b   : > { %v4691_v28 = vpop.f32.mrb[0].mxu0 }
 0x25c   : > { %v1446_v32 = vmul.f32 %v4691_v28, %v4691_v28  ;;  %v4695_v16 = vpop.f32.mrb[1].mxu0 }
 0x25d   : > { %v1434_v24 = vadd.f32 %v4695_v16, %v4691_v28  ;;  %v1447_v25 = vmul.f32 %v4695_v16, %v4695_v16 }
 0x25f   : > { %1435 = vadd.xlane.f32.xlu0 %v1434_v24  ;;  %v4701_v60 = vpop.f32.mrb[2].mxu0  ;;  %v1454_v23 = vadd.f32 %v1447_v25, %v1446_v32  ;;  %v1490_v32 = vmul.f32 256.0, %v1486_v31 }
 0x260   : > { %v1448_v26 = vmul.f32 %v4701_v60, %v4701_v60  ;;  %v4705_v58 = vpop.f32.mrb[3].mxu0  ;;  %v4707_v27 = vpop.f32.mrb[0].mxu1 }
 0x261   : > { %v1437_v59 = vadd.f32 %v4705_v58, %v4701_v60  ;;  %v1449_v29 = vmul.f32 %v4705_v58, %v4705_v58  ;;  %v1662_v33 = vmul.f32 %v4707_v27, %v4707_v27  ;;  %v4715_v35 = vpop.f32.mrb[1].mxu1  ;;  %1455 = vadd.xlane.f32.xlu1 %v1454_v23 }
 0x262   : > { %v1650_v38 = vadd.f32 %v4715_v35, %v4707_v27  ;;  %v1663_v41 = vmul.f32 %v4715_v35, %v4715_v35 }
 0x263   : > { %v4721_v21 = vpop.f32.mrb[4].mxu0  ;;  %v1457_v36 = vadd.f32 %v1449_v29, %v1448_v26 }
 0x264   : > { %v1450_v22 = vmul.f32 %v4721_v21, %v4721_v21  ;;  %v4725_v0 = vpop.f32.mrb[2].mxu1  ;;  %1651 = vadd.xlane.f32.xlu0 %v1650_v38  ;;  %v4727_v6 = vpop.f32.mrb[5].mxu0  ;;  %v1670_v7 = vadd.f32 %v1663_v41, %v1662_v33  ;;  %v4785_v38 = vld [vmem:[%s6382_s4 + $0x8] sm:$0xff] }
 0x265   : > { %v1664_v1 = vmul.f32 %v4725_v0, %v4725_v0  ;;  %v1440_v3 = vadd.f32 %v4727_v6, %v4721_v21  ;;  %v1451_v11 = vmul.f32 %v4727_v6, %v4727_v6  ;;  %v4735_v45 = vpop.f32.mrb[3].mxu1 }
 0x266   : > { %v1653_v4 = vadd.f32 %v4735_v45, %v4725_v0  ;;  %v1665_v5 = vmul.f32 %v4735_v45, %v4735_v45  ;;  %1671 = vadd.xlane.f32.xlu1 %v1670_v7  ;;  %v1487_v7 = vmul.f32 %v4785_v38, %v4785_v38 }
 0x267   : > { %v4741_v46 = vpop.f32.mrb[6].mxu0  ;;  %v1460_v34 = vadd.f32 %v1451_v11, %v1450_v22 }
 0x268   : > { %v1452_v47 = vmul.f32 %v4741_v46, %v4741_v46  ;;  %v4745_v40 = vpop.f32.mrb[4].mxu1  ;;  %1654 = vadd.xlane.f32.xlu0 %v1653_v4  ;;  %v4747_v48 = vpop.f32.mrb[7].mxu0  ;;  %v1673_v8 = vadd.f32 %v1665_v5, %v1664_v1  ;;  %v1467_v4 = vmul.f32 256.0, %v4785_v38 }
 0x269   : > { %v1666_v17 = vmul.f32 %v4745_v40, %v4745_v40  ;;  %v1443_v49 = vadd.f32 %v4747_v48, %v4741_v46  ;;  %v1453_v9 = vmul.f32 %v4747_v48, %v4747_v48  ;;  %v4755_v39 = vpop.f32.mrb[5].mxu1 }
 0x26a   : > { %v1656_v12 = vadd.f32 %v4755_v39, %v4745_v40  ;;  %v1667_v20 = vmul.f32 %v4755_v39, %v4755_v39  ;;  %1438 = vadd.xlane.f32.xlu1 %v1437_v59 }
 0x26b   : > { %v1463_v13 = vadd.f32 %v1453_v9, %v1452_v47  ;;  %v1475_v47 = vmul.f32 2.0, %v4785_v38 }
 0x26c   : > { %v4761_v50 = vpop.f32.mrb[6].mxu1  ;;  %1458 = vadd.xlane.f32.xlu0 %v1457_v36  ;;  %v1676_v43 = vadd.f32 %v1667_v20, %v1666_v17 }
 0x26d   : > { %v1668_v51 = vmul.f32 %v4761_v50, %v4761_v50  ;;  %v4765_v14 = vpop.f32.mrb[7].mxu1 }
 0x26e   : > { %v1659_v52 = vadd.f32 %v4765_v14, %v4761_v50  ;;  %v1669_v55 = vmul.f32 %v4765_v14, %v4765_v14  ;;  %1441 = vadd.xlane.f32.xlu1 %v1440_v3 }
 0x270   : > { %1674 = vadd.xlane.f32.xlu0 %v1673_v8  ;;  %v1679_v56 = vadd.f32 %v1669_v55, %v1668_v51 }
 0x272   : > { %1657 = vadd.xlane.f32.xlu1 %v1656_v12 }
 0x274   : > { %1444 = vadd.xlane.f32.xlu0 %v1443_v49  ;;  %v1491_v49 = vmul.f32 256.0, %v1487_v7 }
 0x276   : > { %1461 = vadd.xlane.f32.xlu1 %v1460_v34 }
 0x278   : > { %1660 = vadd.xlane.f32.xlu0 %v1659_v52 }
 0x27a   : > { %1677 = vadd.xlane.f32.xlu1 %v1676_v43  ;;  %v4800_v43 = vld [vmem:[%s6382_s4 + $0x10] sm:$0xff] }
 0x27b   : > { %v1468_v31 = vmul.f32 256.0, %v4800_v43 }
 0x27c   : > { %1464 = vadd.xlane.f32.xlu0 %v1463_v13 }
 0x280   : > { %1680 = vadd.xlane.f32.xlu0 %v1679_v56 }
 0x2ec   : > { %v1436_v61 = vpop.xlane.xlu0 %1435 }
 0x2ed   : > { %v1470_v62 = vadd.f32 %v1466_v57, %v1436_v61  ;;  %v1478_v53 = vmul.f32 %v1474_v42, %v1436_v61 }
 0x2ee   : > { %v1456_v24 = vpop.xlane.xlu1 %1455 }
 0x2ef   : > { %v4780_v25 = vmul.f32 0.00390625, %v1470_v62  ;;  %v1482_v23 = vadd.f32 %v1478_v53, %v1456_v24 }
 0x2f1   : > { %v1494_v26 = vadd.f32 %v1490_v32, %v1482_v23  ;;  %v1652_v59 = vpop.xlane.xlu0 %1651  ;;  %v1506_v41 = vmul.f32 %v4780_v25, %v4780_v25  ;;  %v1476_v23 = vmul.f32 2.0, %v4800_v43 }
 0x2f2   : > { %v1682_v29 = vadd.f32 %v1652_v59, %v1466_v57  ;;  %v1686_v33 = vmul.f32 %v1652_v59, %v1474_v42  ;;  %v1488_v59 = vmul.f32 %v4800_v43, %v4800_v43 }
 0x2f3   : > { %v1502_v36 = vmul.f32 0.00390625, %v1494_v26  ;;  %v1672_v22 = vpop.xlane.xlu1 %1671 }
 0x2f4   : > { %v4791_v1 = vmul.f32 0.00390625, %v1682_v29  ;;  %v1690_v3 = vadd.f32 %v1686_v33, %v1672_v22  ;;  %v4815_v22 = vld [vmem:[%s6382_s4 + $0x18] sm:$0xff] }
 0x2f5   : > { %v1510_v11 = vsub.f32 %v1502_v36, %v1506_v41  ;;  %v1655_v5 = vpop.xlane.xlu0 %1654 }
 0x2f6   : > { %v1694_v34 = vadd.f32 %v1690_v3, %v1490_v32  ;;  %v1706_v9 = vmul.f32 %v4791_v1, %v4791_v1  ;;  %v1683_v52 = vadd.f32 %v1655_v5, %v1467_v4  ;;  %v1687_v53 = vmul.f32 %v1655_v5, %v1475_v47 }
 0x2f7   : > { %v1514_v8 = vmax.f32 %v1510_v11, 0.0  ;;  %v1439_v17 = vpop.xlane.xlu1 %1438  ;;  %v3848_v5 = vmov 1  }
 0x2f8   : > { %v1702_v12 = vmul.f32 0.00390625, %v1694_v34  ;;  %v1471_v20 = vadd.f32 %v1467_v4, %v1439_v17  ;;  %v1479_v13 = vmul.f32 %v1475_v47, %v1439_v17  ;;  %v4805_v24 = vmul.f32 0.00390625, %v1683_v52  ;;  %3789 = vset.pattern.permute.xlu1 %v3848_v5  ;;  %3788 = vset.pattern.permute.xlu0 %v3848_v5 }
 0x2f9   : > { %v1518_v51 = vadd.f32 1e-05, %v1514_v8  ;;  %v1459_v55 = vpop.xlane.xlu0 %1458  ;;  %v1469_v34 = vmul.f32 256.0, %v4815_v22  ;;  %v1492_v8 = vmul.f32 256.0, %v1488_v59 }
 0x2fa   : > { %v1710_v56 = vsub.f32 %v1702_v12, %v1706_v9  ;;  %v4802_v57 = vmul.f32 0.00390625, %v1471_v20  ;;  %v1483_v42 = vadd.f32 %v1479_v13, %v1459_v55  ;;  %v1707_v17 = vmul.f32 %v4805_v24, %v4805_v24 }
 0x2fb   : > { %3796 = vrsqrt.f32 %v1518_v51  ;;  %v1442_v61 = vpop.xlane.xlu1 %1441 }
 0x2fc   : > { %v1714_v62 = vmax.f32 %v1710_v56, 0.0  ;;  %v1495_v32 = vadd.f32 %v1491_v49, %v1483_v42  ;;  %v1507_v33 = vmul.f32 %v4802_v57, %v4802_v57  ;;  %v1472_v7 = vadd.f32 %v1468_v31, %v1442_v61 }
 0x2fd   : > { %v1675_v26 = vpop.xlane.xlu0 %1674  ;;  %v1480_v12 = vmul.f32 %v1476_v23, %v1442_v61  ;;  %v1477_v42 = vmul.f32 2.0, %v4815_v22 }
 0x2fe   : > { %v1718_v29 = vadd.f32 1e-05, %v1714_v62  ;;  %v1503_v41 = vmul.f32 0.00390625, %v1495_v32  ;;  %v1691_v36 = vadd.f32 %v1687_v53, %v1675_v26  ;;  %v4822_v13 = vmul.f32 0.00390625, %v1472_v7 }
 0x2ff   : > { %v1658_v3 = vpop.xlane.xlu1 %1657 }
 0x300   : > { %3798 = vrsqrt.f32 %v1718_v29  ;;  %v1511_v11 = vsub.f32 %v1503_v41, %v1507_v33  ;;  %v1695_v4 = vadd.f32 %v1691_v36, %v1491_v49  ;;  %v1684_v51 = vadd.f32 %v1658_v3, %v1468_v31 }
 0x301   : > { %v1445_v47 = vpop.xlane.xlu0 %1444  ;;  %v1489_v49 = vmul.f32 %v4815_v22, %v4815_v22  ;;  %v1688_v29 = vmul.f32 %v1658_v3, %v1476_v23  ;;  %v1508_v31 = vmul.f32 %v4822_v13, %v4822_v13 }
 0x302   : > { %v1515_v9 = vmax.f32 %v1511_v11, 0.0  ;;  %v1703_v20 = vmul.f32 0.00390625, %v1695_v4  ;;  %v1473_v32 = vadd.f32 %v1469_v34, %v1445_v47  ;;  %v4830_v33 = vmul.f32 0.00390625, %v1684_v51 }
 0x303   : > { %v1462_v52 = vpop.xlane.xlu1 %1461  ;;  %v1493_v36 = vmul.f32 256.0, %v1489_v49  ;;  %v1481_v11 = vmul.f32 %v1477_v42, %v1445_v47 }
 0x304   : > { %v1519_v55 = vadd.f32 1e-05, %v1515_v9  ;;  %v1711_v56 = vsub.f32 %v1703_v20, %v1707_v17  ;;  %v1484_v62 = vadd.f32 %v1480_v12, %v1462_v52  ;;  %v4832_v9 = vmul.f32 0.00390625, %v1473_v32 }
 0x305   : > { %v3797_v53 = vpop.eup %3796  ;;  %v1661_v26 = vpop.xlane.xlu0 %1660 }
 0x306   : > { %3800 = vrsqrt.f32 %v1519_v55  ;;  %v1715_v59 = vmax.f32 %v1711_v56, 0.0  ;;  %v1496_v61 = vadd.f32 %v1492_v8, %v1484_v62  ;;  %1530 = vrot.lane.b32.xlu1 %v3797_v53, %s3842_s20  ;;  %v1685_v12 = vadd.f32 %v1661_v26, %v1469_v34 }
 0x307   : > { %v1678_v41 = vpop.xlane.xlu1 %1677  ;;  %v1708_v56 = vmul.f32 %v4830_v33, %v4830_v33  ;;  %v1689_v49 = vmul.f32 %v1661_v26, %v1477_v42  ;;  %v1509_v53 = vmul.f32 %v4832_v9, %v4832_v9 }
 0x308   : > { %v1719_v7 = vadd.f32 1e-05, %v1715_v59  ;;  %v1504_v4 = vmul.f32 0.00390625, %v1496_v61  ;;  %v1692_v17 = vadd.f32 %v1688_v29, %v1678_v41  ;;  %v4839_v32 = vmul.f32 0.00390625, %v1685_v12 }
 0x309   : > { %v1465_v20 = vpop.xlane.xlu0 %1464 }
 0x30a   : > { %v3799_v52 = vpop.eup %3798  ;;  %3802 = vrsqrt.f32 %v1719_v7  ;;  %v1512_v23 = vsub.f32 %v1504_v4, %v1508_v31  ;;  %v1696_v3 = vadd.f32 %v1692_v17, %v1492_v8  ;;  %v1485_v55 = vadd.f32 %v1481_v11, %v1465_v20 }
 0x30b   : > { %1730 = vrot.lane.b32.xlu1 %v3799_v52, %s3842_s20  ;;  %v1709_v42 = vmul.f32 %v4839_v32, %v4839_v32 }
 0x30c   : > { %v1516_v51 = vmax.f32 %v1512_v23, 0.0  ;;  %v1704_v62 = vmul.f32 0.00390625, %v1696_v3  ;;  %v1497_v47 = vadd.f32 %v1493_v36, %v1485_v55 }
 0x30d   : > { %v1681_v34 = vpop.xlane.xlu0 %1680 }
 0x30e   : > { %v1520_v59 = vadd.f32 1e-05, %v1516_v51  ;;  %v1712_v29 = vsub.f32 %v1704_v62, %v1708_v56  ;;  %v1505_v61 = vmul.f32 0.00390625, %v1497_v47  ;;  %v1693_v8 = vadd.f32 %v1689_v49, %v1681_v34 }
 0x310   : > { %v3801_v31 = vpop.eup %3800  ;;  %3804 = vrsqrt.f32 %v1520_v59  ;;  %v1716_v41 = vmax.f32 %v1712_v29, 0.0  ;;  %v1513_v7 = vsub.f32 %v1505_v61, %v1509_v53  ;;  %v1697_v11 = vadd.f32 %v1693_v8, %v1493_v36 }
 0x311   : > { %1532 = vrot.lane.b32.xlu0 %v3801_v31, %s3842_s20 }
 0x312   : > { %v1720_v26 = vadd.f32 1e-05, %v1716_v41  ;;  %v1517_v4 = vmax.f32 %v1513_v7, 0.0  ;;  %v1705_v17 = vmul.f32 0.00390625, %v1697_v11 }
 0x314   : > { %v3803_v12 = vpop.eup %3802  ;;  %3806 = vrsqrt.f32 %v1720_v26  ;;  %v1521_v20 = vadd.f32 1e-05, %v1517_v4  ;;  %v1713_v52 = vsub.f32 %v1705_v17, %v1709_v42  ;;  %v6389_v17 = vmov 2  }
 0x315   : > { %1732 = vrot.lane.b32.xlu1 %v3803_v12, %s3842_s20  ;;  %v1546_v12 = vsub.f32 %v4774_v15, %v4780_v25 }
 0x316   : > { %3808 = vrsqrt.f32 %v1521_v20  ;;  %v1717_v23 = vmax.f32 %v1713_v52, 0.0 }
 0x318   : > { %v1721_v3 = vadd.f32 1e-05, %v1717_v23  ;;  %v1746_v23 = vsub.f32 %v4774_v15, %v4791_v1 }
 0x31a   : > { %v3805_v55 = vpop.eup %3804  ;;  %3810 = vrsqrt.f32 %v1721_v3 }
 0x31b   : > { %1534 = vrot.lane.b32.xlu0 %v3805_v55, %s3842_s20 }
 0x31e   : > { %v3807_v36 = vpop.eup %3806 }
 0x31f   : > { %1734 = vrot.lane.b32.xlu0 %v3807_v36, %s3842_s20 }
 0x320   : > { %v3809_v56 = vpop.eup %3808 }
 0x321   : > { %1536 = vrot.lane.b32.xlu1 %v3809_v56, %s3842_s20  ;;  %v1547_v56 = vsub.f32 %v4785_v38, %v4802_v57 }
 0x324   : > { %v3811_v51 = vpop.eup %3810 }
 0x325   : > { %1736 = vrot.lane.b32.xlu1 %v3811_v51, %s3842_s20 }
 0x378   : > { %v1531_v49 = vpop.permute.xlu1 %1530 }
 0x379   : > { %v1542_v62 = vmul.f32 %v1531_v49, %v4774_v15 }
 0x37b   : > { %1554 = vrot.lane.b32.xlu0 %v1542_v62, %s3843_s28 }
 0x37d   : > { %v1731_v47 = vpop.permute.xlu1 %1730 }
 0x37e   : > { %v1742_v53 = vmul.f32 %v1731_v47, %v4774_v15 }
 0x380   : > { %1754 = vrot.lane.b32.xlu0 %v1742_v53, %s3843_s28  ;;  %1791 = vperm.xlu1 %3789, %v1742_v53  }
 0x383   : > { %v1533_v34 = vpop.permute.xlu0 %1532 }
 0x384   : > { %v1543_v59 = vmul.f32 %v1533_v34, %v4785_v38  ;;  %1591 = vperm.xlu0 %3788, %v1542_v62   ;;  %v1747_v62 = vsub.f32 %v4785_v38, %v4805_v24  ;;  %v1548_v34 = vsub.f32 %v4800_v43, %v4822_v13 }
 0x386   : > { %1556 = vrot.lane.b32.xlu1 %v1543_v59, %s3843_s28 }
 0x387   : > { %v1733_v29 = vpop.permute.xlu1 %1732 }
 0x388   : > { %v1743_v61 = vmul.f32 %v1733_v29, %v4785_v38 }
 0x38a   : > { %1795 = vperm.xlu0 %3788, %v1743_v61   ;;  %1756 = vrot.lane.b32.xlu1 %v1743_v61, %s3843_s28  ;;  %v1748_v61 = vsub.f32 %v4800_v43, %v4830_v33 }
 0x38d   : > { %v1535_v8 = vpop.permute.xlu0 %1534 }
 0x38e   : > { %v1544_v31 = vmul.f32 %v1535_v8, %v4800_v43  ;;  %1595 = vperm.xlu1 %3789, %v1543_v59  }
 0x390   : > { %1558 = vrot.lane.b32.xlu0 %v1544_v31, %s3843_s28 }
 0x391   : > { %v1735_v41 = vpop.permute.xlu0 %1734 }
 0x392   : > { %v1744_v7 = vmul.f32 %v1735_v41, %v4800_v43  ;;  %v1549_v41 = vsub.f32 %v4815_v22, %v4832_v9 }
 0x393   : > { %v1537_v11 = vpop.permute.xlu1 %1536 }
 0x394   : > { %1799 = vperm.xlu1 %3789, %v1744_v7   ;;  %1758 = vrot.lane.b32.xlu0 %v1744_v7, %s3843_s28  ;;  %v1545_v42 = vmul.f32 %v1537_v11, %v4815_v22  ;;  %v1749_v11 = vsub.f32 %v4815_v22, %v4839_v32 }
 0x397   : > { %v1737_v26 = vpop.permute.xlu1 %1736 }
 0x398   : > { %1560 = vrot.lane.b32.xlu1 %v1545_v42, %s3843_s28  ;;  %1599 = vperm.xlu0 %3788, %v1544_v31   ;;  %v1745_v4 = vmul.f32 %v1737_v26, %v4815_v22 }
 0x39c   : > { %1760 = vrot.lane.b32.xlu1 %v1745_v4, %s3843_s28  ;;  %1803 = vperm.xlu0 %3788, %v1745_v4  }
 0x3a0   : > { %1603 = vperm.xlu1 %3789, %v1545_v42   ;;  %3791 = vset.pattern.permute.xlu0 %v6389_v17 }
 0x3a4   : > { %3790 = vset.pattern.permute.xlu1 %v6389_v17 }
 0x3ed   : > { %v1555_v20 = vpop.permute.xlu0 %1554 }
 0x3ee   : > { %v1566_v52 = vmul.f32 %v1555_v20, %v1546_v12 }
 0x3f0   : > { %1574 = vrot.lane.b32.xlu0 %v1566_v52, %s3850_s27 }
 0x3f2   : > { %v1755_v3 = vpop.permute.xlu0 %1754 }
 0x3f3   : > { %v1766_v55 = vmul.f32 %v1755_v3, %v1746_v23 }
 0x3f5   : > { %1774 = vrot.lane.b32.xlu0 %v1766_v55, %s3850_s27 }
 0x3ff   : > { %v4873_v36 = vpop.permute.xlu1 %1791 }
 0x403   : > { %v1557_v51 = vpop.permute.xlu1 %1556  ;;  %v1592_v25 = vpop.permute.xlu0 %1591 }
 0x404   : > { %v1567_v49 = vmul.f32 %v1557_v51, %v1547_v56 }
 0x406   : > { %1576 = vrot.lane.b32.xlu1 %v1567_v49, %s3850_s27 }
 0x407   : > { %v1757_v47 = vpop.permute.xlu1 %1756 }
 0x408   : > { %v1767_v53 = vmul.f32 %v1757_v47, %v1747_v62 }
 0x409   : > { %v4880_v1 = vpop.permute.xlu0 %1795 }
 0x40a   : > { %1776 = vrot.lane.b32.xlu1 %v1767_v53, %s3850_s27 }
 0x40d   : > { %v1559_v59 = vpop.permute.xlu0 %1558  ;;  %v4885_v57 = vpop.permute.xlu1 %1595 }
 0x40e   : > { %v1568_v29 = vmul.f32 %v1559_v59, %v1548_v34 }
 0x410   : > { %1578 = vrot.lane.b32.xlu0 %v1568_v29, %s3850_s27 }
 0x411   : > { %v1759_v8 = vpop.permute.xlu0 %1758 }
 0x412   : > { %v1768_v24 = vmul.f32 %v1759_v8, %v1748_v61  ;;  %v1607_v61 = vmul.f32 %v1592_v25, %v4695_v16 }
 0x413   : > { %v4890_v31 = vpop.permute.xlu1 %1799 }
 0x414   : > { %1778 = vrot.lane.b32.xlu0 %v1768_v24, %s3850_s27 }
 0x417   : > { %v1561_v7 = vpop.permute.xlu1 %1560  ;;  %v4899_v33 = vpop.permute.xlu0 %1599 }
 0x418   : > { %v1569_v13 = vmul.f32 %v1561_v7, %v1549_v41  ;;  %v1806_v41 = vmul.f32 %v4873_v36, %v4707_v27 }
 0x41a   : > { %1580 = vrot.lane.b32.xlu1 %v1569_v13, %s3850_s27 }
 0x41b   : > { %v1761_v42 = vpop.permute.xlu1 %1760  ;;  %v4901_v4 = vpop.permute.xlu0 %1803 }
 0x41c   : > { %v1769_v26 = vmul.f32 %v1761_v42, %v1749_v11 }
 0x41e   : > { %1780 = vrot.lane.b32.xlu1 %v1769_v26, %s3850_s27 }
 0x41f   : > { %v4905_v23 = vpop.permute.xlu1 %1603 }
 0x462   : > { %v1575_v12 = vpop.permute.xlu0 %1574 }
 0x463   : > { %v1586_v20 = vadd.f32 %v1575_v12, %v4774_v15 }
 0x465   : > { %1616 = vperm.xlu1 %3790, %v1586_v20   ;;  %v1808_v20 = vmul.f32 %v4880_v1, %v4725_v0 }
 0x467   : > { %v1775_v9 = vpop.permute.xlu0 %1774 }
 0x468   : > { %v1786_v52 = vadd.f32 %v1775_v9, %v4774_v15 }
 0x46a   : > { %1816 = vperm.xlu1 %3790, %v1786_v52  }
 0x478   : > { %v1577_v3 = vpop.permute.xlu1 %1576 }
 0x479   : > { %v1587_v32 = vadd.f32 %v1577_v3, %v4785_v38 }
 0x47b   : > { %1621 = vperm.xlu0 %3791, %v1587_v32  }
 0x47c   : > { %v1777_v55 = vpop.permute.xlu1 %1776 }
 0x47d   : > { %v1787_v56 = vadd.f32 %v1777_v55, %v4785_v38  ;;  %v1606_v38 = vmul.f32 %v1592_v25, %v4691_v28  ;;  %v1807_v28 = vmul.f32 %v4873_v36, %v4715_v35  ;;  %v1608_v25 = vmul.f32 %v4885_v57, %v4701_v60 }
 0x47e   : > { %v1609_v36 = vmul.f32 %v4885_v57, %v4705_v58  ;;  %v1809_v58 = vmul.f32 %v4880_v1, %v4735_v45  ;;  %v1610_v55 = vmul.f32 %v4899_v33, %v4721_v21 }
 0x47f   : > { %1821 = vperm.xlu1 %3790, %v1787_v56  }
 0x482   : > { %v1579_v51 = vpop.permute.xlu0 %1578 }
 0x483   : > { %v1588_v49 = vadd.f32 %v1579_v51, %v4800_v43 }
 0x485   : > { %1626 = vperm.xlu1 %3790, %v1588_v49   ;;  %v1611_v49 = vmul.f32 %v4899_v33, %v4727_v6 }
 0x486   : > { %v1779_v62 = vpop.permute.xlu0 %1778 }
 0x487   : > { %v1788_v47 = vadd.f32 %v1779_v62, %v4800_v43 }
 0x489   : > { %1826 = vperm.xlu1 %3790, %v1788_v47  }
 0x48c   : > { %v1581_v15 = vpop.permute.xlu1 %1580 }
 0x48d   : > { %v1589_v53 = vadd.f32 %v1581_v15, %v4815_v22 }
 0x48f   : > { %1631 = vperm.xlu0 %3791, %v1589_v53   ;;  %v1810_v53 = vmul.f32 %v4890_v31, %v4745_v40 }
 0x490   : > { %v1781_v34 = vpop.permute.xlu1 %1780 }
 0x491   : > { %v1789_v59 = vadd.f32 %v1781_v34, %v4815_v22 }
 0x493   : > { %1831 = vperm.xlu1 %3790, %v1789_v59   ;;  %3792 = vset.pattern.permute.xlu0 %v3848_v5  ;;  %v1811_v59 = vmul.f32 %v4890_v31, %v4755_v39 }
 0x497   : > { %3793 = vset.pattern.permute.xlu1 %v3848_v5 }
 0x4e4   : > { %v1617_v29 = vpop.permute.xlu1 %1616 }
 0x4e5   : > { %v1634_v8 = vadd.f32 %v1617_v29, %v1606_v38  ;;  %v1635_v43 = vadd.f32 %v1617_v29, %v1607_v61 }
 0x4e7   : > { %v4917_v24 = vmax.f32 %v1634_v8, 0.0  ;;  %v4923_v7 = vmax.f32 %v1635_v43, 0.0  ;;  %v5098_v8 = vld [vmem:[%s6383_s6 + $0x8] sm:$0xff] }
 0x4e8   : > { %v5106_v43 = vrot.slane %v5098_v8, %v4093_v19 }
 0x4e9   : > { %6451 = vst [vmem:[#allocation8_spill] sm:$0xff] %v4917_v24  ;;  %1858 = vrot.lane.b32.xlu0 %v4917_v24, %s3839_s17  ;;  %v1817_v22 = vpop.permute.xlu1 %1816 }
 0x4ea   : > { %v1834_v13 = vadd.f32 %v1817_v22, %v1806_v41  ;;  %v1835_v16 = vadd.f32 %v1817_v22, %v1807_v28 }
 0x4ec   : > { %v4929_v5 = vmax.f32 %v1834_v13, 0.0  ;;  %v4933_v27 = vmax.f32 %v1835_v16, 0.0  ;;  %v1612_v16 = vmul.f32 %v4905_v23, %v4741_v46 }
 0x4ed   : > { %1866 = vrot.lane.b32.xlu0 %v4923_v7, %s3839_s17 }
 0x4ee   : > { %6452 = vst [vmem:[#allocation9_spill] sm:$0xff] %v4929_v5  ;;  %6453 = vst [vmem:[#allocation10_spill] sm:$0xff] %v4933_v27 }
 0x4f1   : > { %1874 = vrot.lane.b32.xlu0 %v4929_v5, %s3839_s17 }
 0x4f5   : > { %1882 = vrot.lane.b32.xlu0 %v4933_v27, %s3839_s17 }
 0x4f9   : > { %1938 = vrot.lane.b32.xlu0 %v4917_v24, %s3840_s18 }
 0x4fa   : > { %v1622_v35 = vpop.permute.xlu0 %1621 }
 0x4fb   : > { %v1636_v11 = vadd.f32 %v1622_v35, %v1608_v25  ;;  %v1637_v42 = vadd.f32 %v1622_v35, %v1609_v36  ;;  %v5125_v35 = vld [vmem:[%s6383_s6] sm:$0xff] }
 0x4fd   : > { %v4943_v26 = vmax.f32 %v1636_v11, 0.0  ;;  %1946 = vrot.lane.b32.xlu0 %v4923_v7, %s3840_s18  ;;  %v4951_v60 = vmax.f32 %v1637_v42, 0.0  ;;  %v5135_v42 = vld [vmem:[%s6383_s6 + $0x18] sm:$0xff] }
 0x4fe   : > { %v1822_v12 = vpop.permute.xlu1 %1821 }
 0x4ff   : > { %6454 = vst [vmem:[#allocation11_spill] sm:$0xff] %v4943_v26  ;;  %1860 = vrot.lane.b32.xlu1 %v4943_v26, %s3839_s17  ;;  %6455 = vst [vmem:[#allocation12_spill] sm:$0xff] %v4951_v60  ;;  %v1836_v9 = vadd.f32 %v1822_v12, %v1808_v20  ;;  %v1837_v57 = vadd.f32 %v1822_v12, %v1809_v58  ;;  %v5145_v58 = vld [vmem:[%s6383_s6 + $0x10] sm:$0xff] }
 0x501   : > { %1954 = vrot.lane.b32.xlu0 %v4929_v5, %s3840_s18  ;;  %v4959_v52 = vmax.f32 %v1836_v9, 0.0  ;;  %v4965_v0 = vmax.f32 %v1837_v57, 0.0  ;;  %v1613_v9 = vmul.f32 %v4905_v23, %v4747_v48  ;;  %v5149_v57 = vrot.slane %v5125_v35, %v4093_v19 }
 0x503   : > { %1868 = vrot.lane.b32.xlu1 %v4951_v60, %s3839_s17  ;;  %6456 = vst [vmem:[#allocation13_spill] sm:$0xff] %v4959_v52  ;;  %6457 = vst [vmem:[#allocation14_spill] sm:$0xff] %v4965_v0 }
 0x504   : > { %v1627_v32 = vpop.permute.xlu1 %1626 }
 0x505   : > { %1962 = vrot.lane.b32.xlu0 %v4933_v27, %s3840_s18  ;;  %v1638_v56 = vadd.f32 %v1627_v32, %v1610_v55  ;;  %v1639_v62 = vadd.f32 %v1627_v32, %v1611_v49  ;;  %v5153_v32 = vrot.slane %v5135_v42, %v4093_v19 }
 0x507   : > { %1876 = vrot.lane.b32.xlu1 %v4959_v52, %s3839_s17  ;;  %v5069_v47 = vmax.f32 %v1638_v56, 0.0  ;;  %v5077_v34 = vmax.f32 %v1639_v62, 0.0  ;;  %v1812_v62 = vmul.f32 %v4901_v4, %v4761_v50 }
 0x508   : > { %v1827_v15 = vpop.permute.xlu1 %1826 }
 0x509   : > { %2018 = vrot.lane.b32.xlu0 %v4917_v24, %s3841_s19  ;;  %6458 = vst [vmem:[#allocation15_spill] sm:$0xff] %v5069_v47  ;;  %6459 = vst [vmem:[#allocation16_spill] sm:$0xff] %v5077_v34  ;;  %v1838_v6 = vadd.f32 %v1827_v15, %v1810_v53  ;;  %v1839_v40 = vadd.f32 %v1827_v15, %v1811_v59 }
 0x50b   : > { %1884 = vrot.lane.b32.xlu1 %v4965_v0, %s3839_s17  ;;  %v5089_v29 = vmax.f32 %v1838_v6, 0.0  ;;  %v5102_v31 = vmax.f32 %v1839_v40, 0.0 }
 0x50d   : > { %2026 = vrot.lane.b32.xlu0 %v4923_v7, %s3841_s19  ;;  %6460 = vst [vmem:[#allocation17_spill] sm:$0xff] %v5089_v29  ;;  %6461 = vst [vmem:[#allocation18_spill] sm:$0xff] %v5102_v31 }
 0x50e   : > { %v5045_v45 = vpop.permute.xlu0 %1631 }
 0x50f   : > { %1940 = vrot.lane.b32.xlu1 %v4943_v26, %s3840_s18  ;;  %v1640_v46 = vadd.f32 %v5045_v45, %v1612_v16  ;;  %v1641_v23 = vadd.f32 %v5045_v45, %v1613_v9 }
 0x511   : > { %2034 = vrot.lane.b32.xlu0 %v4929_v5, %s3841_s19  ;;  %v5168_v15 = vmax.f32 %v1640_v46, 0.0 }
 0x512   : > { %v5085_v38 = vpop.permute.xlu1 %1831 }
 0x513   : > { %1948 = vrot.lane.b32.xlu1 %v4951_v60, %s3840_s18  ;;  %6462 = vst [vmem:[#allocation19_spill] sm:$0xff] %v5168_v15 }
 0x515   : > { %2042 = vrot.lane.b32.xlu0 %v4933_v27, %s3841_s19 }
 0x517   : > { %1956 = vrot.lane.b32.xlu1 %v4959_v52, %s3840_s18 }
 0x519   : > { %2098 = vrot.lane.b32.xlu0 %v4917_v24, %s3842_s20 }
 0x51b   : > { %1964 = vrot.lane.b32.xlu1 %v4965_v0, %s3840_s18 }
 0x51d   : > { %2106 = vrot.lane.b32.xlu0 %v4923_v7, %s3842_s20 }
 0x51f   : > { %2020 = vrot.lane.b32.xlu1 %v4943_v26, %s3841_s19 }
 0x521   : > { %2114 = vrot.lane.b32.xlu0 %v4929_v5, %s3842_s20 }
 0x523   : > { %2028 = vrot.lane.b32.xlu1 %v4951_v60, %s3841_s19 }
 0x525   : > { %2122 = vrot.lane.b32.xlu0 %v4933_v27, %s3842_s20 }
 0x527   : > { %2036 = vrot.lane.b32.xlu1 %v4959_v52, %s3841_s19 }
 0x529   : > { %2186 = vrot.lane.b32.xlu0 %v4923_v7, %s3843_s28 }
 0x52b   : > { %2044 = vrot.lane.b32.xlu1 %v4965_v0, %s3841_s19 }
 0x52d   : > { %2194 = vrot.lane.b32.xlu0 %v4929_v5, %s3843_s28 }
 0x52f   : > { %2100 = vrot.lane.b32.xlu1 %v4943_v26, %s3842_s20 }
 0x531   : > { %2178 = vrot.lane.b32.xlu0 %v4917_v24, %s3843_s28 }
 0x533   : > { %2108 = vrot.lane.b32.xlu1 %v4951_v60, %s3842_s20 }
 0x535   : > { %2202 = vrot.lane.b32.xlu0 %v4933_v27, %s3843_s28 }
 0x537   : > { %2116 = vrot.lane.b32.xlu1 %v4959_v52, %s3842_s20 }
 0x539   : > { %2266 = vrot.lane.b32.xlu0 %v4923_v7, %s3844_s29 }
 0x53b   : > { %2124 = vrot.lane.b32.xlu1 %v4965_v0, %s3842_s20 }
 0x53d   : > { %2274 = vrot.lane.b32.xlu0 %v4929_v5, %s3844_s29 }
 0x53f   : > { %2188 = vrot.lane.b32.xlu1 %v4951_v60, %s3843_s28 }
 0x541   : > { %2258 = vrot.lane.b32.xlu0 %v4917_v24, %s3844_s29 }
 0x543   : > { %2196 = vrot.lane.b32.xlu1 %v4959_v52, %s3843_s28 }
 0x545   : > { %2282 = vrot.lane.b32.xlu0 %v4933_v27, %s3844_s29 }
 0x547   : > { %2180 = vrot.lane.b32.xlu1 %v4943_v26, %s3843_s28 }
 0x549   : > { %2346 = vrot.lane.b32.xlu0 %v4923_v7, %s3845_s30 }
 0x54b   : > { %2204 = vrot.lane.b32.xlu1 %v4965_v0, %s3843_s28 }
 0x54d   : > { %2354 = vrot.lane.b32.xlu0 %v4929_v5, %s3845_s30 }
 0x54f   : > { %2268 = vrot.lane.b32.xlu1 %v4951_v60, %s3844_s29 }
 0x551   : > { %2338 = vrot.lane.b32.xlu0 %v4917_v24, %s3845_s30 }
 0x553   : > { %2276 = vrot.lane.b32.xlu1 %v4959_v52, %s3844_s29 }
 0x555   : > { %2362 = vrot.lane.b32.xlu0 %v4933_v27, %s3845_s30 }
 0x557   : > { %2260 = vrot.lane.b32.xlu1 %v4943_v26, %s3844_s29 }
 0x559   : > { %2426 = vrot.lane.b32.xlu0 %v4923_v7, %s3846_s9 }
 0x55b   : > { %2284 = vrot.lane.b32.xlu1 %v4965_v0, %s3844_s29  ;;  %v1859_v1 = vpop.permute.xlu0 %1858 }
 0x55d   : > { %2434 = vrot.lane.b32.xlu0 %v4929_v5, %s3846_s9  ;;  %v5436_v5 = vrot.slane %v5145_v58, %v4177_v30 }
 0x55f   : > { %2348 = vrot.lane.b32.xlu1 %v4951_v60, %s3845_s30  ;;  %v5057_v3 = vpop.permute.xlu0 %1866 }
 0x560   : > { %v1898_v22 = vsel %vm433_vm0, %v1859_v1, %v5057_v3 }
 0x561   : > { %2418 = vrot.lane.b32.xlu0 %v4917_v24, %s3846_s9  ;;  %v1923_v25 = vmul.f32 %v5106_v43, %v1898_v22 }
 0x563   : > { %2356 = vrot.lane.b32.xlu1 %v4959_v52, %s3845_s30  ;;  %v1875_v51 = vpop.permute.xlu0 %1874 }
 0x564   : > { %v1894_v45 = vsel %vm433_vm0, %v5057_v3, %v1875_v51 }
 0x565   : > { %2442 = vrot.lane.b32.xlu0 %v4933_v27, %s3846_s9 }
 0x567   : > { %2340 = vrot.lane.b32.xlu1 %v4943_v26, %s3845_s30  ;;  %v1883_v21 = vpop.permute.xlu0 %1882 }
 0x568   : > { %v1902_v55 = vsel %vm433_vm0, %v1883_v21, %v1859_v1  ;;  %v1890_v56 = vsel %vm433_vm0, %v1875_v51, %v1883_v21  ;;  %v5172_v1 = vrot.slane %v5145_v58, %v4093_v19  ;;  %v5192_v51 = vmax.f32 %v1641_v23, 0.0 }
 0x569   : > { %1862 = vrot.lane.b32.xlu0 %v5069_v47, %s3839_s17  ;;  %v1922_v21 = vmul.f32 %v5149_v57, %v1902_v55  ;;  %v1925_v59 = vmul.f32 %v5153_v32, %v1890_v56 }
 0x56a   : > { %6463 = vst [vmem:[#allocation20_spill] sm:$0xff] %v5192_v51 }
 0x56b   : > { %2364 = vrot.lane.b32.xlu1 %v4965_v0, %s3845_s30  ;;  %v5081_v33 = vpop.permute.xlu0 %1938 }
 0x56d   : > { %1870 = vrot.lane.b32.xlu0 %v5077_v34, %s3839_s17 }
 0x56f   : > { %2428 = vrot.lane.b32.xlu1 %v4951_v60, %s3846_s9  ;;  %v5093_v61 = vpop.permute.xlu0 %1946 }
 0x571   : > { %1878 = vrot.lane.b32.xlu0 %v5089_v29, %s3839_s17  ;;  %v1861_v39 = vpop.permute.xlu1 %1860 }
 0x573   : > { %2436 = vrot.lane.b32.xlu1 %v4959_v52, %s3846_s9  ;;  %v5110_v41 = vpop.permute.xlu0 %1954  ;;  %v1993_v52 = vrot.slane %v5098_v8, %v4177_v30 }
 0x575   : > { %1886 = vrot.lane.b32.xlu0 %v5102_v31, %s3839_s17  ;;  %v1869_v13 = vpop.permute.xlu1 %1868 }
 0x576   : > { %v1899_v28 = vsel %vm433_vm0, %v1861_v39, %v1869_v13 }
 0x577   : > { %v1927_v36 = vmul.f32 %v5106_v43, %v1899_v28  ;;  %2420 = vrot.lane.b32.xlu1 %v4943_v26, %s3846_s9  ;;  %v5130_v11 = vpop.permute.xlu0 %1962  ;;  %v1924_v28 = vmul.f32 %v5172_v1, %v1894_v45 }
 0x579   : > { %1942 = vrot.lane.b32.xlu0 %v5069_v47, %s3840_s18  ;;  %v1877_v12 = vpop.permute.xlu1 %1876  ;;  %v3592_v20 = vpack.c.bf16 %v1927_v36, %v1923_v25  ;;  %v1813_v36 = vmul.f32 %v4901_v4, %v4765_v14 }
 0x57a   : > { %v1895_v49 = vsel %vm433_vm0, %v1869_v13, %v1877_v12  ;;  %v1840_v13 = vadd.f32 %v5085_v38, %v1812_v62 }
 0x57b   : > { %2444 = vrot.lane.b32.xlu1 %v4965_v0, %s3846_s9  ;;  %3593 = vmatprep.subr.bf16.mxu0 %v3592_v20  ;;  %v5159_v48 = vpop.permute.xlu0 %2018  ;;  %v1928_v19 = vmul.f32 %v5172_v1, %v1895_v49  ;;  %v1841_v20 = vadd.f32 %v5085_v38, %v1813_v36 }
 0x57c   : > { %v5207_v9 = vmax.f32 %v1840_v13, 0.0 }
 0x57d   : > { %1950 = vrot.lane.b32.xlu0 %v5077_v34, %s3840_s18  ;;  %v1885_v53 = vpop.permute.xlu1 %1884  ;;  %v3666_v46 = vpack.c.bf16 %v1928_v19, %v1924_v28  ;;  %v5217_v4 = vmax.f32 %v1841_v20, 0.0 }
 0x57e   : > { %v1891_v6 = vsel %vm433_vm0, %v1877_v12, %v1885_v53  ;;  %v1903_v50 = vsel %vm433_vm0, %v1885_v53, %v1861_v39  ;;  %6464 = vst [vmem:[#allocation21_spill] sm:$0xff] %v5207_v9 }
 0x57f   : > { %v1926_v40 = vmul.f32 %v5149_v57, %v1903_v50  ;;  %v1929_v22 = vmul.f32 %v5153_v32, %v1891_v6  ;;  %1864 = vrot.lane.b32.xlu1 %v5168_v15, %s3839_s17  ;;  %v5190_v3 = vpop.permute.xlu0 %2026  ;;  %6465 = vst [vmem:[#allocation22_spill] sm:$0xff] %v5217_v4 }
 0x581   : > { %v3594_v39 = vpack.c.bf16 %v1926_v40, %v1922_v21  ;;  %1958 = vrot.lane.b32.xlu0 %v5089_v29, %s3840_s18  ;;  %v5198_v16 = vpop.permute.xlu1 %1940  ;;  %v3664_v25 = vpack.c.bf16 %v1929_v22, %v1925_v59 }
 0x583   : > { %1872 = vrot.lane.b32.xlu1 %v5192_v51, %s3839_s17  ;;  %3595 = vmatpush1.bf16.msra.mxu0 %v3594_v39  ;;  %v5204_v12 = vpop.permute.xlu0 %2034 }
 0x584   : > { %3665 = vmatprep.subr.bf16.mxu1 %v3664_v25 }
 0x585   : > { %3667 = vmatpush1.bf16.msra.mxu1 %v3666_v46  ;;  %1966 = vrot.lane.b32.xlu0 %v5102_v31, %s3840_s18  ;;  %v5211_v55 = vpop.permute.xlu1 %1948 }
 0x587   : > { %1880 = vrot.lane.b32.xlu1 %v5207_v9, %s3839_s17  ;;  %v5215_v14 = vpop.permute.xlu0 %2042 }
 0x589   : > { %2022 = vrot.lane.b32.xlu0 %v5069_v47, %s3841_s19  ;;  %v5221_v23 = vpop.permute.xlu1 %1956 }
 0x58b   : > { %1888 = vrot.lane.b32.xlu1 %v5217_v4, %s3839_s17  ;;  %v5225_v38 = vpop.permute.xlu0 %2098 }
 0x58d   : > { %2030 = vrot.lane.b32.xlu0 %v5077_v34, %s3841_s19  ;;  %v5229_v56 = vpop.permute.xlu1 %1964 }
 0x58e   : > { %v1983_v0 = vsel %vm514_vm1, %v5229_v56, %v5198_v16 }
 0x58f   : > { %1944 = vrot.lane.b32.xlu1 %v5168_v15, %s3840_s18  ;;  %v5233_v49 = vpop.permute.xlu0 %2106 }
 0x591   : > { %2038 = vrot.lane.b32.xlu0 %v5089_v29, %s3841_s19  ;;  %v5237_v62 = vpop.permute.xlu1 %2020 }
 0x593   : > { %1952 = vrot.lane.b32.xlu1 %v5192_v51, %s3840_s18  ;;  %v5241_v53 = vpop.permute.xlu0 %2114 }
 0x595   : > { %2046 = vrot.lane.b32.xlu0 %v5102_v31, %s3841_s19  ;;  %v5245_v45 = vpop.permute.xlu1 %2028 }
 0x597   : > { %1960 = vrot.lane.b32.xlu1 %v5207_v9, %s3840_s18  ;;  %v5249_v21 = vpop.permute.xlu0 %2122 }
 0x599   : > { %2102 = vrot.lane.b32.xlu0 %v5069_v47, %s3842_s20  ;;  %v5253_v6 = vpop.permute.xlu1 %2036 }
 0x59b   : > { %1968 = vrot.lane.b32.xlu1 %v5217_v4, %s3840_s18  ;;  %v5257_v50 = vpop.permute.xlu0 %2186 }
 0x59c   : > { %6466 = vst [vmem:[#allocation23_spill] sm:$0xff] %v5257_v50 }
 0x59d   : > { %2110 = vrot.lane.b32.xlu0 %v5077_v34, %s3842_s20  ;;  %v5261_v59 = vpop.permute.xlu1 %2044 }
 0x59f   : > { %2024 = vrot.lane.b32.xlu1 %v5168_v15, %s3841_s19  ;;  %v5265_v19 = vpop.permute.xlu0 %2194 }
 0x5a0   : > { %6467 = vst [vmem:[#allocation24_spill] sm:$0xff] %v5265_v19 }
 0x5a1   : > { %2118 = vrot.lane.b32.xlu0 %v5089_v29, %s3842_s20  ;;  %v5269_v40 = vpop.permute.xlu1 %2100 }
 0x5a3   : > { %2032 = vrot.lane.b32.xlu1 %v5192_v51, %s3841_s19  ;;  %v5273_v22 = vpop.permute.xlu0 %2178 }
 0x5a4   : > { %6468 = vst [vmem:[#allocation25_spill] sm:$0xff] %v5273_v22 }
 0x5a5   : > { %v5275_v13 = vpop.permute.xlu1 %2108  ;;  %2126 = vrot.lane.b32.xlu0 %v5102_v31, %s3842_s20 }
 0x5a7   : > { %2040 = vrot.lane.b32.xlu1 %v5207_v9, %s3841_s19  ;;  %v5281_v28 = vpop.permute.xlu0 %2202 }
 0x5a8   : > { %6469 = vst [vmem:[#allocation26_spill] sm:$0xff] %v5281_v28 }
 0x5a9   : > { %v5283_v39 = vpop.permute.xlu1 %2116  ;;  %2190 = vrot.lane.b32.xlu0 %v5077_v34, %s3843_s28 }
 0x5ab   : > { %2048 = vrot.lane.b32.xlu1 %v5217_v4, %s3841_s19  ;;  %v5289_v25 = vpop.permute.xlu0 %2266 }
 0x5ac   : > { %6470 = vst [vmem:[#allocation27_spill] sm:$0xff] %v5289_v25 }
 0x5ad   : > { %v5291_v36 = vpop.permute.xlu1 %2124  ;;  %2198 = vrot.lane.b32.xlu0 %v5089_v29, %s3843_s28 }
 0x5af   : > { %2104 = vrot.lane.b32.xlu1 %v5168_v15, %s3842_s20  ;;  %v5297_v46 = vpop.permute.xlu0 %2274 }
 0x5b0   : > { %6471 = vst [vmem:[#allocation28_spill] sm:$0xff] %v5297_v46 }
 0x5b1   : > { %v5299_v20 = vpop.permute.xlu1 %2188  ;;  %2182 = vrot.lane.b32.xlu0 %v5069_v47, %s3843_s28 }
 0x5b2   : > { %6472 = vst [vmem:[#allocation29_spill] sm:$0xff] %v5299_v20 }
 0x5b3   : > { %2112 = vrot.lane.b32.xlu1 %v5192_v51, %s3842_s20  ;;  %v5305_v17 = vpop.permute.xlu0 %2258 }
 0x5b4   : > { %6473 = vst [vmem:[#allocation30_spill] sm:$0xff] %v5305_v17 }
 0x5b5   : > { %v5307_v44 = vpop.permute.xlu1 %2196  ;;  %2206 = vrot.lane.b32.xlu0 %v5102_v31, %s3843_s28 }
 0x5b6   : > { %6474 = vst [vmem:[#allocation31_spill] sm:$0xff] %v5307_v44 }
 0x5b7   : > { %2120 = vrot.lane.b32.xlu1 %v5207_v9, %s3842_s20  ;;  %v5313_v10 = vpop.permute.xlu0 %2282 }
 0x5b8   : > { %6475 = vst [vmem:[#allocation32_spill] sm:$0xff] %v5313_v10 }
 0x5b9   : > { %v5315_v25 = vpop.permute.xlu1 %2180  ;;  %2270 = vrot.lane.b32.xlu0 %v5077_v34, %s3844_s29 }
 0x5ba   : > { %6476 = vst [vmem:[#allocation33_spill] sm:$0xff] %v5315_v25 }
 0x5bb   : > { %2128 = vrot.lane.b32.xlu1 %v5217_v4, %s3842_s20  ;;  %v5321_v46 = vpop.permute.xlu0 %2346 }
 0x5bc   : > { %6477 = vst [vmem:[#allocation34_spill] sm:$0xff] %v5321_v46 }
 0x5bd   : > { %v5323_v17 = vpop.permute.xlu1 %2204  ;;  %2278 = vrot.lane.b32.xlu0 %v5089_v29, %s3844_s29 }
 0x5be   : > { %6478 = vst [vmem:[#allocation35_spill] sm:$0xff] %v5323_v17 }
 0x5bf   : > { %2192 = vrot.lane.b32.xlu1 %v5192_v51, %s3843_s28  ;;  %v5329_v28 = vpop.permute.xlu0 %2354 }
 0x5c0   : > { %6479 = vst [vmem:[#allocation36_spill] sm:$0xff] %v5329_v28 }
 0x5c1   : > { %v5331_v10 = vpop.permute.xlu1 %2268  ;;  %2262 = vrot.lane.b32.xlu0 %v5069_v47, %s3844_s29 }
 0x5c2   : > { %6480 = vst [vmem:[#allocation37_spill] sm:$0xff] %v5331_v10 }
 0x5c3   : > { %2200 = vrot.lane.b32.xlu1 %v5207_v9, %s3843_s28  ;;  %v5337_v22 = vpop.permute.xlu0 %2338 }
 0x5c4   : > { %6481 = vst [vmem:[#allocation38_spill] sm:$0xff] %v5337_v22 }
 0x5c5   : > { %v5339_v46 = vpop.permute.xlu1 %2276  ;;  %2286 = vrot.lane.b32.xlu0 %v5102_v31, %s3844_s29 }
 0x5c6   : > { %6482 = vst [vmem:[#allocation39_spill] sm:$0xff] %v5339_v46 }
 0x5c7   : > { %2184 = vrot.lane.b32.xlu1 %v5168_v15, %s3843_s28  ;;  %v5345_v17 = vpop.permute.xlu0 %2362 }
 0x5c8   : > { %6483 = vst [vmem:[#allocation40_spill] sm:$0xff] %v5345_v17 }
 0x5c9   : > { %v5347_v28 = vpop.permute.xlu1 %2260  ;;  %2350 = vrot.lane.b32.xlu0 %v5077_v34, %s3845_s30 }
 0x5ca   : > { %6484 = vst [vmem:[#allocation41_spill] sm:$0xff] %v5347_v28 }
 0x5cb   : > { %2208 = vrot.lane.b32.xlu1 %v5217_v4, %s3843_s28  ;;  %v5353_v10 = vpop.permute.xlu0 %2426 }
 0x5cc   : > { %6485 = vst [vmem:[#allocation42_spill] sm:$0xff] %v5353_v10 }
 0x5cd   : > { %v5355_v22 = vpop.permute.xlu1 %2284  ;;  %2358 = vrot.lane.b32.xlu0 %v5089_v29, %s3845_s30 }
 0x5ce   : > { %6486 = vst [vmem:[#allocation43_spill] sm:$0xff] %v5355_v22 }
 0x5cf   : > { %2272 = vrot.lane.b32.xlu1 %v5192_v51, %s3844_s29  ;;  %v5361_v46 = vpop.permute.xlu0 %2434 }
 0x5d0   : > { %6487 = vst [vmem:[#allocation44_spill] sm:$0xff] %v5361_v46 }
 0x5d1   : > { %v5363_v17 = vpop.permute.xlu1 %2348  ;;  %2342 = vrot.lane.b32.xlu0 %v5069_v47, %s3845_s30 }
 0x5d2   : > { %6488 = vst [vmem:[#allocation45_spill] sm:$0xff] %v5363_v17 }
 0x5d3   : > { %2280 = vrot.lane.b32.xlu1 %v5207_v9, %s3844_s29  ;;  %v5369_v28 = vpop.permute.xlu0 %2418 }
 0x5d4   : > { %6489 = vst [vmem:[#allocation46_spill] sm:$0xff] %v5369_v28 }
 0x5d5   : > { %v5371_v10 = vpop.permute.xlu1 %2356  ;;  %2366 = vrot.lane.b32.xlu0 %v5102_v31, %s3845_s30 }
 0x5d6   : > { %6490 = vst [vmem:[#allocation47_spill] sm:$0xff] %v5371_v10 }
 0x5d7   : > { %2264 = vrot.lane.b32.xlu1 %v5168_v15, %s3844_s29  ;;  %v5377_v22 = vpop.permute.xlu0 %2442 }
 0x5d8   : > { %6491 = vst [vmem:[#allocation48_spill] sm:$0xff] %v5377_v22  ;;  %v2499_v22 = vld [vmem:[%s6384_s7 + $0x8] sm:$0xff] }
 0x5d9   : > { %v5379_v46 = vpop.permute.xlu1 %2340  ;;  %2430 = vrot.lane.b32.xlu0 %v5077_v34, %s3846_s9  ;;  %2586 = vmatprep.mubr.f32.mxu0 %v2499_v22 }
 0x5da   : > { %6492 = vst [vmem:[#allocation49_spill] sm:$0xff] %v5379_v46  ;;  %2764 = vmatprep.mubr.f32.mxu1 %v2499_v22 }
 0x5db   : > { %2288 = vrot.lane.b32.xlu1 %v5217_v4, %s3844_s29  ;;  %v1863_v17 = vpop.permute.xlu0 %1862 }
 0x5dd   : > { %v5385_v28 = vpop.permute.xlu1 %2364  ;;  %2438 = vrot.lane.b32.xlu0 %v5089_v29, %s3846_s9 }
 0x5de   : > { %6493 = vst [vmem:[#allocation50_spill] sm:$0xff] %v5385_v28 }
 0x5df   : > { %2352 = vrot.lane.b32.xlu1 %v5192_v51, %s3845_s30  ;;  %v1871_v10 = vpop.permute.xlu0 %1870 }
 0x5e1   : > { %v5391_v25 = vpop.permute.xlu1 %2428  ;;  %2422 = vrot.lane.b32.xlu0 %v5069_v47, %s3846_s9 }
 0x5e2   : > { %6494 = vst [vmem:[#allocation51_spill] sm:$0xff] %v5391_v25 }
 0x5e3   : > { %2360 = vrot.lane.b32.xlu1 %v5207_v9, %s3845_s30  ;;  %v1879_v28 = vpop.permute.xlu0 %1878 }
 0x5e4   : > { %v1896_v27 = vsel %vm433_vm0, %v1871_v10, %v1879_v28 }
 0x5e5   : > { %v5400_v46 = vpop.permute.xlu1 %2436  ;;  %2446 = vrot.lane.b32.xlu0 %v5102_v31, %s3846_s9 }
 0x5e6   : > { %6495 = vst [vmem:[#allocation52_spill] sm:$0xff] %v5400_v46 }
 0x5e7   : > { %2344 = vrot.lane.b32.xlu1 %v5168_v15, %s3845_s30  ;;  %v1887_v25 = vpop.permute.xlu0 %1886 }
 0x5e8   : > { %v1892_v34 = vsel %vm433_vm0, %v1879_v28, %v1887_v25 }
 0x5e9   : > { %v5406_v50 = vpop.permute.xlu1 %2420 }
 0x5ea   : > { %6496 = vst [vmem:[#allocation53_spill] sm:$0xff] %v5406_v50  ;;  %v1900_v50 = vsel %vm433_vm0, %v1863_v17, %v1871_v10 }
 0x5eb   : > { %2368 = vrot.lane.b32.xlu1 %v5217_v4, %s3845_s30  ;;  %v5410_v19 = vpop.permute.xlu0 %1942 }
 0x5ed   : > { %v5412_v22 = vpop.permute.xlu1 %2444 }
 0x5ee   : > { %6497 = vst [vmem:[#allocation54_spill] sm:$0xff] %v5412_v22  ;;  %v1931_v22 = vmul.f32 %v5106_v43, %v1900_v50 }
 0x5ef   : > { %2432 = vrot.lane.b32.xlu1 %v5192_v51, %s3846_s9  ;;  %v5416_v46 = vpop.permute.xlu0 %1950  ;;  %v5440_v51 = vrot.slane %v5125_v35, %v4177_v30 }
 0x5f1   : > { %v1865_v20 = vpop.permute.xlu1 %1864 }
 0x5f3   : > { %2440 = vrot.lane.b32.xlu1 %v5207_v9, %s3846_s9  ;;  %v5420_v44 = vpop.permute.xlu0 %1958 }
 0x5f5   : > { %v1873_v2 = vpop.permute.xlu1 %1872 }
 0x5f6   : > { %v1901_v29 = vsel %vm433_vm0, %v1865_v20, %v1873_v2 }
 0x5f7   : > { %v1935_v31 = vmul.f32 %v5106_v43, %v1901_v29  ;;  %2424 = vrot.lane.b32.xlu1 %v5168_v15, %s3846_s9  ;;  %v5430_v63 = vpop.permute.xlu0 %1966  ;;  %v1979_v29 = vsel %vm514_vm1, %v5198_v16, %v5211_v55  ;;  %v5448_v43 = vrot.slane %v5135_v42, %v4177_v30  ;;  %v1978_v30 = vsel %vm514_vm1, %v5081_v33, %v5093_v61 }
 0x5f8   : > { %v1970_v15 = vsel %vm514_vm1, %v5110_v41, %v5130_v11  ;;  %v2003_v28 = vmul.f32 %v1993_v52, %v1978_v30 }
 0x5f9   : > { %v1881_v47 = vpop.permute.xlu1 %1880  ;;  %v3596_v9 = vpack.c.bf16 %v1935_v31, %v1931_v22  ;;  %v1971_v31 = vsel %vm514_vm1, %v5221_v23, %v5229_v56 }
 0x5fa   : > { %v1897_v50 = vsel %vm433_vm0, %v1873_v2, %v1881_v47  ;;  %v1904_v2 = vsel %vm433_vm0, %v1887_v25, %v1863_v17  ;;  %v2009_v24 = vmul.f32 %v5448_v43, %v1971_v31 }
 0x5fb   : > { %2448 = vrot.lane.b32.xlu1 %v5217_v4, %s3846_s9  ;;  %3597 = vmatprep.subr.bf16.mxu0 %v3596_v9  ;;  %v5458_v22 = vpop.permute.xlu0 %2022  ;;  %v2007_v4 = vmul.f32 %v1993_v52, %v1979_v29  ;;  %v1975_v9 = vsel %vm514_vm1, %v5211_v55, %v5221_v23  ;;  %v1936_v60 = vmul.f32 %v5172_v1, %v1897_v50 }
 0x5fc   : > { %v1930_v55 = vmul.f32 %v5149_v57, %v1904_v2  ;;  %v1933_v23 = vmul.f32 %v5153_v32, %v1892_v34  ;;  %v1974_v29 = vsel %vm514_vm1, %v5093_v61, %v5110_v41  ;;  %v2005_v34 = vmul.f32 %v5448_v43, %v1970_v15 }
 0x5fd   : > { %v1889_v26 = vpop.permute.xlu1 %1888  ;;  %v2008_v50 = vmul.f32 %v5436_v5, %v1975_v9  ;;  %v3600_v2 = vpack.c.bf16 %v2007_v4, %v2003_v28  ;;  %v2051_v28 = vsel %vm595_vm2, %v5253_v6, %v5261_v59 }
 0x5fe   : > { %v1893_v17 = vsel %vm433_vm0, %v1881_v47, %v1889_v26  ;;  %v1905_v25 = vsel %vm433_vm0, %v1889_v26, %v1865_v20  ;;  %v1982_v26 = vsel %vm514_vm1, %v5130_v11, %v5081_v33  ;;  %v1932_v47 = vmul.f32 %v5172_v1, %v1896_v27 }
 0x5ff   : > { %v1934_v16 = vmul.f32 %v5149_v57, %v1905_v25  ;;  %v1937_v56 = vmul.f32 %v5153_v32, %v1893_v17  ;;  %v5492_v10 = vpop.permute.xlu0 %2030  ;;  %v2006_v57 = vmul.f32 %v5440_v51, %v1983_v0  ;;  %v2002_v61 = vmul.f32 %v5440_v51, %v1982_v26 }
 0x600   : > { %v3670_v30 = vpack.c.bf16 %v1936_v60, %v1932_v47  ;;  %v3672_v33 = vpack.c.bf16 %v2009_v24, %v2005_v34  ;;  %v2004_v27 = vmul.f32 %v5436_v5, %v1974_v29  ;;  %v1980_v0 = vsel %vm514_vm1, %v5410_v19, %v5416_v46 }
 0x601   : > { %v3598_v32 = vpack.c.bf16 %v1934_v16, %v1930_v55  ;;  %v1945_v20 = vpop.permute.xlu1 %1944  ;;  %v3668_v31 = vpack.c.bf16 %v1937_v56, %v1933_v23  ;;  %v3602_v11 = vpack.c.bf16 %v2006_v57, %v2002_v61  ;;  %v2011_v4 = vmul.f32 %v1993_v52, %v1980_v0 }
 0x602   : > { %v3674_v60 = vpack.c.bf16 %v2008_v50, %v2004_v27  ;;  %v2073_v55 = vrot.slane %v5098_v8, %v4253_v54  ;;  %v5522_v23 = vrot.slane %v5145_v58, %v4253_v54  ;;  %v2059_v16 = vsel %vm595_vm2, %v5237_v62, %v5245_v45 }
 0x603   : > { %3599 = vmatpush1.bf16.msra.mxu0 %v3598_v32  ;;  %3669 = vmatprep.subr.bf16.mxu1 %v3668_v31  ;;  %v5507_v41 = vpop.permute.xlu0 %2038  ;;  %v5534_v56 = vrot.slane %v5135_v42, %v4253_v54  ;;  %v2058_v47 = vsel %vm595_vm2, %v5159_v48, %v5190_v3  ;;  %v1972_v34 = vsel %vm514_vm1, %v5420_v44, %v5430_v63 }
 0x604   : > { %3601 = vmatprep.subr.bf16.mxu0 %v3600_v2  ;;  %3671 = vmatpush1.bf16.msra.mxu1 %v3670_v30  ;;  %v1984_v57 = vsel %vm514_vm1, %v5430_v63, %v5410_v19  ;;  %v2087_v32 = vmul.f32 %v2073_v55, %v2059_v16  ;;  %v2055_v31 = vsel %vm595_vm2, %v5245_v45, %v5253_v6 }
 0x605   : > { %v1953_v15 = vpop.permute.xlu1 %1952  ;;  %3673 = vmatprep.subr.bf16.mxu1 %v3672_v33  ;;  %v2063_v50 = vsel %vm595_vm2, %v5261_v59, %v5237_v62  ;;  %v1976_v30 = vsel %vm514_vm1, %v5416_v46, %v5420_v44  ;;  %v2089_v61 = vmul.f32 %v5534_v56, %v2051_v28  ;;  %v2010_v6 = vmul.f32 %v5440_v51, %v1984_v57 }
 0x606   : > { %v1981_v1 = vsel %vm514_vm1, %v1945_v20, %v1953_v15  ;;  %v2013_v62 = vmul.f32 %v5448_v43, %v1972_v34  ;;  %v2083_v46 = vmul.f32 %v2073_v55, %v2058_v47  ;;  %v2054_v27 = vsel %vm595_vm2, %v5190_v3, %v5204_v12 }
 0x607   : > { %v2015_v9 = vmul.f32 %v1993_v52, %v1981_v1  ;;  %3603 = vmatpush1.bf16.msra.mxu0 %v3602_v11  ;;  %v5516_v24 = vpop.permute.xlu0 %2046  ;;  %v5530_v52 = vrot.slane %v5125_v35, %v4253_v54  ;;  %v2050_v54 = vsel %vm595_vm2, %v5204_v12, %v5215_v14  ;;  %v2012_v0 = vmul.f32 %v5436_v5, %v1976_v30 }
 0x608   : > { %3675 = vmatpush1.bf16.msra.mxu1 %v3674_v60  ;;  %v2085_v11 = vmul.f32 %v5534_v56, %v2050_v54  ;;  %v2088_v1 = vmul.f32 %v5522_v23, %v2055_v31  ;;  %v5612_v31 = vrot.slane %v5145_v58, %v4329_v37  ;;  %v5624_v30 = vrot.slane %v5135_v42, %v4329_v37 }
 0x609   : > { %v1961_v17 = vpop.permute.xlu1 %1960  ;;  %v3604_v25 = vpack.c.bf16 %v2015_v9, %v2011_v4  ;;  %v3608_v9 = vpack.c.bf16 %v2087_v32, %v2083_v46  ;;  %v2153_v32 = vrot.slane %v5098_v8, %v4329_v37  ;;  %v2056_v46 = vsel %vm595_vm2, %v5492_v10, %v5507_v41 }
 0x60a   : > { %v1977_v29 = vsel %vm514_vm1, %v1953_v15, %v1961_v17 }
 0x60b   : > { %3605 = vmatprep.subr.bf16.mxu0 %v3604_v25  ;;  %v5542_v26 = vpop.permute.xlu0 %2102  ;;  %v2016_v63 = vmul.f32 %v5436_v5, %v1977_v29  ;;  %v2084_v5 = vmul.f32 %v5522_v23, %v2054_v27 }
 0x60d   : > { %v1969_v2 = vpop.permute.xlu1 %1968  ;;  %v3678_v4 = vpack.c.bf16 %v2016_v63, %v2012_v0  ;;  %v3682_v16 = vpack.c.bf16 %v2088_v1, %v2084_v5 }
 0x60e   : > { %v1973_v19 = vsel %vm514_vm1, %v1961_v17, %v1969_v2  ;;  %v1985_v45 = vsel %vm514_vm1, %v1969_v2, %v1945_v20  ;;  %v2062_v20 = vsel %vm595_vm2, %v5215_v14, %v5159_v48  ;;  %v3680_v48 = vpack.c.bf16 %v2089_v61, %v2085_v11 }
 0x60f   : > { %v2014_v59 = vmul.f32 %v5440_v51, %v1985_v45  ;;  %v2017_v33 = vmul.f32 %v5448_v43, %v1973_v19  ;;  %v5582_v44 = vpop.permute.xlu0 %2110  ;;  %v2086_v51 = vmul.f32 %v5530_v52, %v2063_v50  ;;  %v2082_v3 = vmul.f32 %v5530_v52, %v2062_v20 }
 0x610   : > { %v2060_v14 = vsel %vm595_vm2, %v5458_v22, %v5492_v10  ;;  %v2139_v50 = vsel %vm676_vm3, %v5269_v40, %v5275_v13  ;;  %v2131_v2 = vsel %vm676_vm3, %v5283_v39, %v5291_v36  ;;  %v2138_v19 = vsel %vm676_vm3, %v5225_v38, %v5233_v49 }
 0x611   : > { %v3606_v43 = vpack.c.bf16 %v2014_v59, %v2010_v6  ;;  %v2025_v15 = vpop.permute.xlu1 %2024  ;;  %v3676_v60 = vpack.c.bf16 %v2017_v33, %v2013_v62  ;;  %v3610_v17 = vpack.c.bf16 %v2086_v51, %v2082_v3  ;;  %v2091_v29 = vmul.f32 %v2073_v55, %v2060_v14 }
 0x612   : > { %v2052_v45 = vsel %vm595_vm2, %v5507_v41, %v5516_v24  ;;  %v2064_v6 = vsel %vm595_vm2, %v5516_v24, %v5458_v22  ;;  %v2167_v62 = vmul.f32 %v2153_v32, %v2139_v50  ;;  %v2135_v59 = vsel %vm676_vm3, %v5275_v13, %v5283_v39 }
 0x613   : > { %3607 = vmatpush1.bf16.msra.mxu0 %v3606_v43  ;;  %3677 = vmatprep.subr.bf16.mxu1 %v3676_v60  ;;  %v5597_v12 = vpop.permute.xlu0 %2118  ;;  %v2143_v33 = vsel %vm676_vm3, %v5291_v36, %v5269_v40  ;;  %v2169_v20 = vmul.f32 %v5624_v30, %v2131_v2  ;;  %v2090_v39 = vmul.f32 %v5530_v52, %v2064_v6  ;;  %v6498_v2 = vld [vmem:[#allocation12_spill] sm:$0xff] }
 0x614   : > { %3609 = vmatprep.subr.bf16.mxu0 %v3608_v9  ;;  %3679 = vmatpush1.bf16.msra.mxu1 %v3678_v4  ;;  %v2093_v40 = vmul.f32 %v5534_v56, %v2052_v45  ;;  %v2163_v41 = vmul.f32 %v2153_v32, %v2138_v19  ;;  %v2134_v11 = vsel %vm676_vm3, %v5233_v49, %v5241_v53  ;;  %v6499_v19 = vld [vmem:[#allocation8_spill] sm:$0xff] }
 0x615   : > { %v2033_v25 = vpop.permute.xlu1 %2032  ;;  %3681 = vmatprep.subr.bf16.mxu1 %v3680_v48  ;;  %v2142_v51 = vsel %vm676_vm3, %v5249_v21, %v5225_v38  ;;  %v2092_v43 = vmul.f32 %v5522_v23, %v2056_v46  ;;  %v2168_v4 = vmul.f32 %v5612_v31, %v2135_v59  ;;  %v2136_v6 = vsel %vm676_vm3, %v5582_v44, %v5597_v12  ;;  %v6501_v59 = vld [vmem:[#allocation10_spill] sm:$0xff] }
 0x616   : > { %v2061_v28 = vsel %vm595_vm2, %v2025_v15, %v2033_v25  ;;  %v3616_v3 = vpack.c.bf16 %v2167_v62, %v2163_v41 }
 0x617   : > { %v2095_v47 = vmul.f32 %v2073_v55, %v2061_v28  ;;  %3611 = vmatpush1.bf16.msra.mxu0 %v3610_v17  ;;  %v5606_v54 = vpop.permute.xlu0 %2126  ;;  %v5620_v55 = vrot.slane %v5125_v35, %v4329_v37  ;;  %v2130_v37 = vsel %vm676_vm3, %v5241_v53, %v5249_v21  ;;  %v2164_v21 = vmul.f32 %v5612_v31, %v2134_v11 }
 0x618   : > { %3683 = vmatpush1.bf16.msra.mxu1 %v3682_v16  ;;  %v2132_v50 = vsel %vm676_vm3, %v5597_v12, %v5606_v54 }
 0x619   : > { %v2041_v34 = vpop.permute.xlu1 %2040  ;;  %v3612_v57 = vpack.c.bf16 %v2095_v47, %v2091_v29  ;;  %v2162_v49 = vmul.f32 %v5620_v55, %v2142_v51  ;;  %v3690_v14 = vpack.c.bf16 %v2168_v4, %v2164_v21  ;;  %v6512_v4 = vld [vmem:[#allocation17_spill] sm:$0xff] }
 0x61a   : > { %v2057_v61 = vsel %vm595_vm2, %v2033_v25, %v2041_v34 }
 0x61b   : > { %3613 = vmatprep.subr.bf16.mxu0 %v3612_v57  ;;  %v5632_v63 = vpop.permute.xlu0 %2190  ;;  %v2096_v22 = vmul.f32 %v5522_v23, %v2057_v61  ;;  %v2140_v23 = vsel %vm676_vm3, %v5542_v26, %v5582_v44  ;;  %v3624_v61 = vpack.c.bf16 %v6498_v2, %v4923_v7  ;;  %v6508_v44 = vld [vmem:[#allocation19_spill] sm:$0xff] }
 0x61c   : > { %v2171_v25 = vmul.f32 %v2153_v32, %v2140_v23  ;;  %v6514_v23 = vld [vmem:[#allocation6_spill] sm:$0xff] }
 0x61d   : > { %v2049_v27 = vpop.permute.xlu1 %2048  ;;  %v3686_v9 = vpack.c.bf16 %v2096_v22, %v2092_v43  ;;  %v6509_v43 = vld [vmem:[#allocation5_spill] sm:$0xff] }
 0x61e   : > { %v2053_v24 = vsel %vm595_vm2, %v2041_v34, %v2049_v27  ;;  %v2065_v13 = vsel %vm595_vm2, %v2049_v27, %v2025_v15  ;;  %v2165_v15 = vmul.f32 %v5624_v30, %v2130_v37  ;;  %v6500_v37 = vld [vmem:[#allocation11_spill] sm:$0xff]  ;;  %v6503_v27 = vld [vmem:[#allocation16_spill] sm:$0xff] }
 0x61f   : > { %v2094_v36 = vmul.f32 %v5530_v52, %v2065_v13  ;;  %v2097_v0 = vmul.f32 %v5534_v56, %v2053_v24  ;;  %v5672_v10 = vpop.permute.xlu0 %2198  ;;  %v2166_v52 = vmul.f32 %v5620_v55, %v2143_v33  ;;  %v3626_v45 = vpack.c.bf16 %v6500_v37, %v6499_v19  ;;  %v6502_v33 = vld [vmem:[#allocation14_spill] sm:$0xff]  ;;  %v6505_v24 = vld [vmem:[#allocation9_spill] sm:$0xff] }
 0x620   : > { %v3688_v38 = vpack.c.bf16 %v2169_v20, %v2165_v15  ;;  %v3696_v46 = vpack.c.bf16 %v6502_v33, %v6501_v59  ;;  %v6504_v20 = vld [vmem:[#allocation20_spill] sm:$0xff]  ;;  %v2233_v15 = vrot.slane %v5098_v8, %v6509_v43  ;;  %v6520_v19 = vld [vmem:[#allocation25_spill] sm:$0xff]  ;;  %v6522_v33 = vld [vmem:[#allocation26_spill] sm:$0xff] }
 0x621   : > { %v3614_v56 = vpack.c.bf16 %v2094_v36, %v2090_v39  ;;  %v2105_v60 = vpop.permute.xlu1 %2104  ;;  %v3684_v1 = vpack.c.bf16 %v2097_v0, %v2093_v40  ;;  %v3618_v48 = vpack.c.bf16 %v2166_v52, %v2162_v49  ;;  %v3628_v22 = vpack.c.bf16 %v6504_v20, %v6503_v27  ;;  %v6507_v40 = vld [vmem:[#allocation15_spill] sm:$0xff] }
 0x622   : > { %v3630_v12 = vpack.c.bf16 %v6508_v44, %v6507_v40  ;;  %v2173_v0 = vmul.f32 %v5624_v30, %v2132_v50  ;;  %v2172_v52 = vmul.f32 %v5612_v31, %v2136_v6  ;;  %v5746_v49 = vrot.slane %v5125_v35, %v6509_v43  ;;  %v6519_v50 = vld [vmem:[#allocation33_spill] sm:$0xff]  ;;  %v6521_v6 = vld [vmem:[#allocation35_spill] sm:$0xff] }
 0x623   : > { %3615 = vmatpush1.bf16.msra.mxu0 %v3614_v56  ;;  %3685 = vmatprep.subr.bf16.mxu1 %v3684_v1  ;;  %v5687_v53 = vpop.permute.xlu0 %2182  ;;  %v6510_v56 = vld [vmem:[#allocation18_spill] sm:$0xff]  ;;  %v2223_v59 = vsel %vm757_vm4, %v6521_v6, %v6519_v50  ;;  %v2222_v20 = vsel %vm757_vm4, %v6522_v33, %v6520_v19 }
 0x624   : > { %3617 = vmatprep.subr.bf16.mxu0 %v3616_v3  ;;  %3687 = vmatpush1.bf16.msra.mxu1 %v3686_v9  ;;  %v6513_v9 = vld [vmem:[#allocation21_spill] sm:$0xff] }
 0x625   : > { %v2113_v5 = vpop.permute.xlu1 %2112  ;;  %3689 = vmatprep.subr.bf16.mxu1 %v3688_v38  ;;  %v3702_v3 = vpack.c.bf16 %v6513_v9, %v6512_v4  ;;  %v6525_v4 = vld [vmem:[#allocation39_spill] sm:$0xff]  ;;  %v6526_v9 = vld [vmem:[#allocation37_spill] sm:$0xff] }
 0x626   : > { %v2141_v17 = vsel %vm676_vm3, %v2105_v60, %v2113_v5 }
 0x627   : > { %v2175_v16 = vmul.f32 %v2153_v32, %v2141_v17  ;;  %3619 = vmatpush1.bf16.msra.mxu0 %v3618_v48  ;;  %v5696_v28 = vpop.permute.xlu0 %2206  ;;  %v2144_v32 = vsel %vm676_vm3, %v5606_v54, %v5542_v26  ;;  %v6506_v26 = vld [vmem:[#allocation13_spill] sm:$0xff]  ;;  %v5758_v48 = vrot.slane %v5098_v8, %v6514_v23 }
 0x628   : > { %3691 = vmatpush1.bf16.msra.mxu1 %v3690_v14  ;;  %v3698_v54 = vpack.c.bf16 %v6506_v26, %v6505_v24  ;;  %v2170_v36 = vmul.f32 %v5620_v55, %v2144_v32  ;;  %v6516_v14 = vld [vmem:[#allocation29_spill] sm:$0xff]  ;;  %v5800_v26 = vrot.slane %v5145_v58, %v6514_v23 }
 0x629   : > { %v2121_v29 = vpop.permute.xlu1 %2120  ;;  %v3620_v47 = vpack.c.bf16 %v2175_v16, %v2171_v25  ;;  %v6517_v16 = vld [vmem:[#allocation24_spill] sm:$0xff]  ;;  %v2219_v32 = vsel %vm757_vm4, %v6519_v50, %v6516_v14  ;;  %v6530_v50 = vld [vmem:[#allocation43_spill] sm:$0xff] }
 0x62a   : > { %v2137_v34 = vsel %vm676_vm3, %v2113_v5, %v2121_v29  ;;  %v6515_v5 = vld [vmem:[#allocation31_spill] sm:$0xff]  ;;  %v2210_v27 = vsel %vm757_vm4, %v6517_v16, %v6522_v33  ;;  %v2291_v40 = vsel %vm838_vm5, %v6525_v4, %v6530_v50 }
 0x62b   : > { %3621 = vmatprep.subr.bf16.mxu0 %v3620_v47  ;;  %v5700_v57 = vpop.permute.xlu0 %2270  ;;  %v2176_v7 = vmul.f32 %v5612_v31, %v2137_v34  ;;  %v5754_v31 = vrot.slane %v5135_v42, %v6509_v43  ;;  %v2215_v17 = vsel %vm757_vm4, %v6516_v14, %v6515_v5  ;;  %v5770_v34 = vrot.slane %v5125_v35, %v6514_v23  ;;  %v6528_v14 = vld [vmem:[#allocation32_spill] sm:$0xff] }
 0x62c   : > { %v2247_v24 = vmul.f32 %v2233_v15, %v2215_v17  ;;  %v2216_v17 = vsel %vm757_vm4, %v5632_v63, %v5672_v10 }
 0x62d   : > { %v2129_v62 = vpop.permute.xlu1 %2128  ;;  %v3694_v25 = vpack.c.bf16 %v2176_v7, %v2172_v52  ;;  %v2249_v52 = vmul.f32 %v5754_v31, %v2223_v59  ;;  %v2212_v59 = vsel %vm757_vm4, %v5672_v10, %v5696_v28 }
 0x62e   : > { %v2133_v13 = vsel %vm676_vm3, %v2121_v29, %v2129_v62  ;;  %v2145_v39 = vsel %vm676_vm3, %v2129_v62, %v2105_v60  ;;  %v6511_v60 = vld [vmem:[#allocation22_spill] sm:$0xff]  ;;  %v6518_v29 = vld [vmem:[#allocation23_spill] sm:$0xff]  ;;  %v2211_v62 = vsel %vm757_vm4, %v6515_v5, %v6521_v6  ;;  %v2220_v6 = vsel %vm757_vm4, %v5687_v53, %v5632_v63 }
 0x62f   : > { %v2174_v41 = vmul.f32 %v5620_v55, %v2145_v39  ;;  %v2177_v11 = vmul.f32 %v5624_v30, %v2133_v13  ;;  %v5735_v51 = vpop.permute.xlu0 %2278  ;;  %v3700_v1 = vpack.c.bf16 %v6511_v60, %v6510_v56  ;;  %v5750_v55 = vrot.slane %v5145_v58, %v6509_v43  ;;  %v6524_v39 = vld [vmem:[#allocation27_spill] sm:$0xff]  ;;  %v6527_v5 = vld [vmem:[#allocation30_spill] sm:$0xff] }
 0x630   : > { %v2214_v47 = vsel %vm757_vm4, %v6518_v29, %v6517_v16  ;;  %v2218_v37 = vsel %vm757_vm4, %v6520_v19, %v6518_v29  ;;  %v2245_v60 = vmul.f32 %v5754_v31, %v2222_v20 }
 0x631   : > { %v3622_v30 = vpack.c.bf16 %v2174_v41, %v2170_v36  ;;  %v2193_v38 = vpop.permute.xlu1 %2192  ;;  %v3692_v21 = vpack.c.bf16 %v2177_v11, %v2173_v0  ;;  %v2243_v13 = vmul.f32 %v2233_v15, %v2214_v47  ;;  %v5808_v0 = vrot.slane %v5135_v42, %v6514_v23  ;;  %v6529_v47 = vld [vmem:[#allocation41_spill] sm:$0xff] }
 0x632   : > { %v2246_v41 = vmul.f32 %v5746_v49, %v2219_v32  ;;  %v2242_v11 = vmul.f32 %v5746_v49, %v2218_v37  ;;  %v2248_v43 = vmul.f32 %v5750_v55, %v2211_v62  ;;  %v2244_v56 = vmul.f32 %v5750_v55, %v2210_v27 }
 0x633   : > { %3623 = vmatpush1.bf16.msra.mxu0 %v3622_v30  ;;  %3693 = vmatprep.subr.bf16.mxu1 %v3692_v21  ;;  %v5776_v2 = vpop.permute.xlu0 %2262  ;;  %v2295_v30 = vsel %vm838_vm5, %v6526_v9, %v6525_v4  ;;  %v3632_v16 = vpack.c.bf16 %v2247_v24, %v2243_v13  ;;  %v2251_v62 = vmul.f32 %v2233_v15, %v2216_v17 }
 0x634   : > { %3625 = vmatprep.subr.bf16.mxu0 %v3624_v61  ;;  %3695 = vmatpush1.bf16.msra.mxu1 %v3694_v25  ;;  %v6523_v61 = vld [vmem:[#allocation28_spill] sm:$0xff]  ;;  %v3634_v29 = vpack.c.bf16 %v2246_v41, %v2242_v11  ;;  %v3706_v19 = vpack.c.bf16 %v2248_v43, %v2244_v56  ;;  %v2327_v37 = vmul.f32 %v5758_v48, %v2295_v30 }
 0x635   : > { %v2201_v7 = vpop.permute.xlu1 %2200  ;;  %3697 = vmatprep.subr.bf16.mxu1 %v3696_v46  ;;  %v2294_v36 = vsel %vm838_vm5, %v6524_v39, %v6523_v61  ;;  %v2299_v63 = vsel %vm838_vm5, %v6529_v47, %v6526_v9  ;;  %v2252_v27 = vmul.f32 %v5750_v55, %v2212_v59 }
 0x636   : > { %v2217_v46 = vsel %vm757_vm4, %v2193_v38, %v2201_v7  ;;  %v2323_v23 = vmul.f32 %v5758_v48, %v2294_v36  ;;  %v2326_v41 = vmul.f32 %v5770_v34, %v2299_v63  ;;  %v6538_v63 = vld [vmem:[#allocation50_spill] sm:$0xff] }
 0x637   : > { %3627 = vmatpush1.bf16.msra.mxu0 %v3626_v45  ;;  %v5822_v21 = vpop.permute.xlu0 %2286  ;;  %v2302_v45 = vsel %vm838_vm5, %v6528_v14, %v6527_v5 }
 0x638   : > { %3629 = vmatprep.subr.bf16.mxu0 %v3628_v22  ;;  %3699 = vmatpush1.bf16.msra.mxu1 %v3698_v54  ;;  %v2303_v22 = vsel %vm838_vm5, %v6530_v50, %v6529_v47  ;;  %v2255_v54 = vmul.f32 %v2233_v15, %v2217_v46  ;;  %v2325_v36 = vmul.f32 %v5808_v0, %v2302_v45  ;;  %v6534_v50 = vld [vmem:[#allocation36_spill] sm:$0xff] }
 0x639   : > { %v2185_v25 = vpop.permute.xlu1 %2184  ;;  %3701 = vmatprep.subr.bf16.mxu1 %v3700_v1  ;;  %v3704_v1 = vpack.c.bf16 %v2249_v52, %v2245_v60  ;;  %v2329_v44 = vmul.f32 %v5808_v0, %v2303_v22  ;;  %v2328_v52 = vmul.f32 %v5800_v26, %v2291_v40  ;;  %v3640_v46 = vpack.c.bf16 %v2327_v37, %v2323_v23  ;;  %v6535_v22 = vld [vmem:[#allocation34_spill] sm:$0xff] }
 0x63a   : > { %v2221_v32 = vsel %vm757_vm4, %v2185_v25, %v2193_v38  ;;  %v2224_v38 = vsel %vm757_vm4, %v5696_v28, %v5687_v53  ;;  %v2250_v53 = vmul.f32 %v5746_v49, %v2220_v6  ;;  %v3636_v33 = vpack.c.bf16 %v2255_v54, %v2251_v62  ;;  %v6537_v62 = vld [vmem:[#allocation49_spill] sm:$0xff] }
 0x63b   : > { %3631 = vmatpush1.bf16.msra.mxu0 %v3630_v12  ;;  %v2254_v10 = vmul.f32 %v5746_v49, %v2221_v32  ;;  %v5866_v28 = vpop.permute.xlu0 %2350  ;;  %v2253_v20 = vmul.f32 %v5754_v31, %v2224_v38  ;;  %v2298_v49 = vsel %vm838_vm5, %v6527_v5, %v6524_v39  ;;  %v3712_v56 = vpack.c.bf16 %v2329_v44, %v2325_v36  ;;  %v6531_v5 = vld [vmem:[#allocation47_spill] sm:$0xff] }
 0x63c   : > { %3633 = vmatprep.subr.bf16.mxu0 %v3632_v16  ;;  %3703 = vmatpush1.bf16.msra.mxu1 %v3702_v3  ;;  %v2322_v39 = vmul.f32 %v5770_v34, %v2298_v49  ;;  %v2296_v60 = vsel %vm838_vm5, %v5700_v57, %v5735_v51  ;;  %v2374_v54 = vsel %vm919_vm6, %v6535_v22, %v6534_v50 }
 0x63d   : > { %v2209_v12 = vpop.permute.xlu1 %2208  ;;  %3705 = vmatprep.subr.bf16.mxu1 %v3704_v1  ;;  %v2383_v40 = vsel %vm919_vm6, %v6538_v63, %v6537_v62 }
 0x63e   : > { %v2213_v15 = vsel %vm757_vm4, %v2201_v7, %v2209_v12  ;;  %v2225_v3 = vsel %vm757_vm4, %v2209_v12, %v2185_v25  ;;  %v2290_v7 = vsel %vm838_vm5, %v6523_v61, %v6528_v14  ;;  %v3642_v9 = vpack.c.bf16 %v2326_v41, %v2322_v39  ;;  %v6532_v14 = vld [vmem:[#allocation45_spill] sm:$0xff]  ;;  %v6533_v25 = vld [vmem:[#allocation7_spill] sm:$0xff] }
 0x63f   : > { %v2256_v24 = vmul.f32 %v5750_v55, %v2213_v15  ;;  %v2257_v13 = vmul.f32 %v5754_v31, %v2225_v3  ;;  %3635 = vmatpush1.bf16.msra.mxu0 %v3634_v29  ;;  %v3638_v55 = vpack.c.bf16 %v2254_v10, %v2250_v53  ;;  %v2324_v61 = vmul.f32 %v5800_v26, %v2290_v7  ;;  %v5893_v4 = vpop.permute.xlu0 %2358 }
 0x640   : > { %3637 = vmatprep.subr.bf16.mxu0 %v3636_v33  ;;  %3707 = vmatpush1.bf16.msra.mxu1 %v3706_v19  ;;  %v2375_v45 = vsel %vm919_vm6, %v6532_v14, %v6531_v5  ;;  %v2393_v16 = vrot.slane %v5098_v8, %v6533_v25  ;;  %v2331_v29 = vmul.f32 %v5758_v48, %v2296_v60  ;;  %v6536_v8 = vld [vmem:[#allocation38_spill] sm:$0xff]  ;;  %v6539_v33 = vld [vmem:[#allocation40_spill] sm:$0xff] }
 0x641   : > { %v3710_v11 = vpack.c.bf16 %v2256_v24, %v2252_v27  ;;  %v2273_v31 = vpop.permute.xlu1 %2272  ;;  %v3708_v43 = vpack.c.bf16 %v2257_v13, %v2253_v20  ;;  %v3714_v23 = vpack.c.bf16 %v2328_v52, %v2324_v61  ;;  %v5911_v32 = vrot.slane %v5125_v35, %v6533_v25 }
 0x642   : > { %v2300_v19 = vsel %vm838_vm5, %v5776_v2, %v5700_v57  ;;  %v2407_v37 = vmul.f32 %v2393_v16, %v2375_v45  ;;  %v2379_v35 = vsel %vm919_vm6, %v6537_v62, %v6532_v14  ;;  %v2403_v57 = vmul.f32 %v2393_v16, %v2374_v54 }
 0x643   : > { %3639 = vmatpush1.bf16.msra.mxu0 %v3638_v55  ;;  %3709 = vmatprep.subr.bf16.mxu1 %v3708_v43  ;;  %v5925_v59 = vpop.permute.xlu0 %2342  ;;  %v2330_v44 = vmul.f32 %v5770_v34, %v2300_v19  ;;  %v5938_v53 = vrot.slane %v5135_v42, %v6533_v25  ;;  %v2292_v15 = vsel %vm838_vm5, %v5735_v51, %v5822_v21  ;;  %v6544_v19 = vld [vmem:[#allocation46_spill] sm:$0xff] }
 0x644   : > { %3641 = vmatprep.subr.bf16.mxu0 %v3640_v46  ;;  %3711 = vmatpush1.bf16.msra.mxu1 %v3710_v11  ;;  %v2304_v3 = vsel %vm838_vm5, %v5822_v21, %v5776_v2  ;;  %v2406_v27 = vmul.f32 %v5911_v32, %v2379_v35  ;;  %v3648_v24 = vpack.c.bf16 %v2407_v37, %v2403_v57 }
 0x645   : > { %v2281_v30 = vpop.permute.xlu1 %2280  ;;  %3713 = vmatprep.subr.bf16.mxu1 %v3712_v56  ;;  %v2371_v51 = vsel %vm919_vm6, %v6531_v5, %v6538_v63  ;;  %v2409_v13 = vmul.f32 %v5938_v53, %v2383_v40  ;;  %v2332_v49 = vmul.f32 %v5800_v26, %v2292_v15  ;;  %v2333_v7 = vmul.f32 %v5808_v0, %v2304_v3  ;;  %v6031_v3 = vld [vmem:[%s6383_s6 + $0x38] ss:$0 sm:$0xff] }
 0x646   : > { %v2297_v17 = vsel %vm838_vm5, %v2273_v31, %v2281_v30  ;;  %v2397_v55 = vrot.slane %v5145_v58, %v6533_v25  ;;  %v2370_v11 = vsel %vm919_vm6, %v6534_v50, %v6539_v33  ;;  %v2376_v58 = vsel %vm919_vm6, %v5866_v28, %v5893_v4  ;;  %v6543_v50 = vld [vmem:[#allocation42_spill] sm:$0xff] }
 0x647   : > { %v2335_v47 = vmul.f32 %v5758_v48, %v2297_v17  ;;  %3643 = vmatpush1.bf16.msra.mxu0 %v3642_v9  ;;  %v2378_v48 = vsel %vm919_vm6, %v6536_v8, %v6535_v22  ;;  %v2411_v17 = vmul.f32 %v2393_v16, %v2376_v58  ;;  %v2380_v54 = vsel %vm919_vm6, %v5925_v59, %v5866_v28  ;;  %v2505_v58 = vld [vmem:[%s6384_s7 + $0x38] sm:$0xff] }
 0x648   : > { %3715 = vmatpush1.bf16.msra.mxu1 %v3714_v23  ;;  %v2402_v12 = vmul.f32 %v5911_v32, %v2378_v48  ;;  %v2404_v61 = vmul.f32 %v2397_v55, %v2370_v11  ;;  %v6541_v23 = vld [vmem:[#allocation51_spill] sm:$0xff]  ;;  %v2410_v63 = vmul.f32 %v5911_v32, %v2380_v54 }
 0x649   : > { %v2265_v6 = vpop.permute.xlu1 %2264  ;;  %v3644_v1 = vpack.c.bf16 %v2335_v47, %v2331_v29  ;;  %v5988_v29 = vld [vmem:[%s6383_s6 + $0x28] ss:$0 sm:$0xff]  ;;  %v6542_v47 = vld [vmem:[#allocation44_spill] sm:$0xff] }
 0x64a   : > { %v2301_v38 = vsel %vm838_vm5, %v2265_v6, %v2273_v31  ;;  %v2367_v31 = vpop.permute.xlu0 %2366  ;;  %v3650_v52 = vpack.c.bf16 %v2406_v27, %v2402_v12  ;;  %v2454_v22 = vsel %vm1000_vm7, %v6543_v50, %v6542_v47 }
 0x64b   : > { %v2334_v10 = vmul.f32 %v5770_v34, %v2301_v38  ;;  %3645 = vmatprep.subr.bf16.mxu0 %v3644_v1  ;;  %v2382_v34 = vsel %vm919_vm6, %v6539_v33, %v6536_v8  ;;  %v2458_v8 = vsel %vm1000_vm7, %v6544_v19, %v6543_v50  ;;  %v6545_v1 = vld [vmem:[#allocation53_spill] sm:$0xff]  ;;  %v2483_v35 = vmul.f32 %v5988_v29, %v2454_v22  ;;  %v6546_v38 = vld [vmem:[#allocation54_spill] sm:$0xff]  ;;  %v6547_v33 = vld [vmem:[#allocation48_spill] sm:$0xff] }
 0x64c   : > { %v2405_v43 = vmul.f32 %v5938_v53, %v2382_v34  ;;  %v2459_v28 = vsel %vm1000_vm7, %v6545_v1, %v6541_v23  ;;  %v2463_v57 = vsel %vm1000_vm7, %v6546_v38, %v6545_v1  ;;  %v2384_v12 = vsel %vm919_vm6, %v2367_v31, %v5925_v59  ;;  %v2508_v22 = vld [vmem:[%s6384_s7 + $0x50] sm:$0xff] }
 0x64d   : > { %v3646_v20 = vpack.c.bf16 %v2334_v10, %v2330_v44  ;;  %v2289_v42 = vpop.permute.xlu1 %2288  ;;  %v2372_v10 = vsel %vm919_vm6, %v5893_v4, %v2367_v31 }
 0x64e   : > { %v2293_v2 = vsel %vm838_vm5, %v2281_v30, %v2289_v42  ;;  %v2305_v21 = vsel %vm838_vm5, %v2289_v42, %v2265_v6  ;;  %v6540_v30 = vld [vmem:[#allocation52_spill] sm:$0xff]  ;;  %v5981_v14 = vpop.permute.xlu0 %2430  ;;  %v2489_v42 = vmul.f32 %v6031_v3, %v2463_v57  ;;  %v2500_v57 = vld [vmem:[%s6384_s7 + $0x10] sm:$0xff] }
 0x64f   : > { %v2336_v36 = vmul.f32 %v5800_v26, %v2293_v2  ;;  %v2337_v41 = vmul.f32 %v5808_v0, %v2305_v21  ;;  %3647 = vmatpush1.bf16.msra.mxu0 %v3646_v20  ;;  %v2408_v26 = vmul.f32 %v2397_v55, %v2371_v51  ;;  %v3720_v0 = vpack.c.bf16 %v2409_v13, %v2405_v43 }
 0x650   : > { %3649 = vmatprep.subr.bf16.mxu0 %v3648_v24  ;;  %v2455_v5 = vsel %vm1000_vm7, %v6541_v23, %v6540_v30  ;;  %v2451_v59 = vsel %vm1000_vm7, %v6540_v30, %v6546_v38  ;;  %v2412_v13 = vmul.f32 %v2397_v55, %v2372_v10  ;;  %v2413_v2 = vmul.f32 %v5938_v53, %v2384_v12  ;;  %v2506_v10 = vld [vmem:[%s6384_s7 + $0x40] sm:$0xff]  ;;  %v2509_v12 = vld [vmem:[%s6384_s7 + $0x58] sm:$0xff] }
 0x651   : > { %v3718_v46 = vpack.c.bf16 %v2336_v36, %v2332_v49  ;;  %v2353_v39 = vpop.permute.xlu1 %2352  ;;  %v3716_v56 = vpack.c.bf16 %v2337_v41, %v2333_v7  ;;  %v3722_v9 = vpack.c.bf16 %v2408_v26, %v2404_v61  ;;  %v2487_v48 = vmul.f32 %v5988_v29, %v2455_v5  ;;  %v2498_v7 = vld [vmem:[%s6384_s7] sm:$0xff]  ;;  %v3426_v41 = vld [vmem:[%s6383_s6 + $0x30] ss:$0 sm:$0xff]  ;;  %v2501_v26 = vld [vmem:[%s6384_s7 + $0x18] sm:$0xff] }
 0x652   : > { %v2439_v15 = vpop.permute.xlu0 %2438  ;;  %v2450_v36 = vsel %vm1000_vm7, %v6542_v47, %v6547_v33 }
 0x653   : > { %3651 = vmatpush1.bf16.msra.mxu0 %v3650_v52  ;;  %3717 = vmatprep.subr.bf16.mxu1 %v3716_v56  ;;  %v3656_v4 = vpack.c.bf16 %v2487_v48, %v2483_v35  ;;  %v2502_v52 = vld [vmem:[%s6384_s7 + $0x20] sm:$0xff]  ;;  %v2456_v61 = vsel %vm1000_vm7, %v5981_v14, %v2439_v15 }
 0x654   : > { %3719 = vmatpush1.bf16.msra.mxu1 %v3718_v46  ;;  %v2488_v46 = vmul.f32 %v3426_v41, %v2451_v59  ;;  %v2491_v23 = vmul.f32 %v5988_v29, %v2456_v61 }
 0x655   : > { %v2361_v60 = vpop.permute.xlu1 %2360  ;;  %3721 = vmatprep.subr.bf16.mxu1 %v3720_v0  ;;  %v2484_v0 = vmul.f32 %v3426_v41, %v2450_v36 }
 0x656   : > { %v2377_v45 = vsel %vm919_vm6, %v2353_v39, %v2361_v60 }
 0x657   : > { %v2415_v25 = vmul.f32 %v2393_v16, %v2377_v45  ;;  %v6001_v16 = vld [vmem:[%s6383_s6 + $0x20] ss:$0 sm:$0xff]  ;;  %v2504_v45 = vld [vmem:[%s6384_s7 + $0x30] sm:$0xff] }
 0x658   : > { %3723 = vmatpush1.bf16.msra.mxu1 %v3722_v9  ;;  %v2482_v44 = vmul.f32 %v6001_v16, %v2458_v8  ;;  %v2486_v34 = vmul.f32 %v6001_v16, %v2459_v28  ;;  %v3730_v9 = vpack.c.bf16 %v2488_v46, %v2484_v0  ;;  %v2507_v8 = vld [vmem:[%s6384_s7 + $0x48] sm:$0xff] }
 0x659   : > { %v2345_v37 = vpop.permute.xlu1 %2344  ;;  %v3652_v6 = vpack.c.bf16 %v2415_v25, %v2411_v17 }
 0x65a   : > { %v2381_v62 = vsel %vm919_vm6, %v2345_v37, %v2353_v39  ;;  %v2423_v39 = vpop.permute.xlu0 %2422 }
 0x65b   : > { %v2414_v40 = vmul.f32 %v5911_v32, %v2381_v62  ;;  %3653 = vmatprep.subr.bf16.mxu0 %v3652_v6  ;;  %v2462_v32 = vsel %vm1000_vm7, %v6547_v33, %v6544_v19  ;;  %v2460_v17 = vsel %vm1000_vm7, %v2423_v39, %v5981_v14 }
 0x65c   : > { %v2485_v11 = vmul.f32 %v6031_v3, %v2462_v32  ;;  %v2490_v54 = vmul.f32 %v6001_v16, %v2460_v17 }
 0x65d   : > { %v3654_v27 = vpack.c.bf16 %v2414_v40, %v2410_v63  ;;  %v2369_v20 = vpop.permute.xlu1 %2368  ;;  %v6548_v63 = vmov 0.0  }
 0x65e   : > { %v2373_v24 = vsel %vm919_vm6, %v2361_v60, %v2369_v20  ;;  %v2385_v51 = vsel %vm919_vm6, %v2369_v20, %v2345_v37  ;;  %v3728_v56 = vpack.c.bf16 %v2489_v42, %v2485_v11  ;;  %v2447_v25 = vpop.permute.xlu0 %2446 }
 0x65f   : > { %v2416_v21 = vmul.f32 %v2397_v55, %v2373_v24  ;;  %v2417_v49 = vmul.f32 %v5938_v53, %v2385_v51  ;;  %3655 = vmatpush1.bf16.msra.mxu0 %v3654_v27  ;;  %v3658_v55 = vpack.c.bf16 %v2486_v34, %v2482_v44  ;;  %v2452_v19 = vsel %vm1000_vm7, %v2439_v15, %v2447_v25 }
 0x660   : > { %3657 = vmatprep.subr.bf16.mxu0 %v3656_v4  ;;  %v2464_v48 = vsel %vm1000_vm7, %v2447_v25, %v2423_v39  ;;  %v2492_v1 = vmul.f32 %v3426_v41, %v2452_v19 }
 0x661   : > { %v3726_v31 = vpack.c.bf16 %v2416_v21, %v2412_v13  ;;  %v2433_v53 = vpop.permute.xlu1 %2432  ;;  %v3724_v43 = vpack.c.bf16 %v2417_v49, %v2413_v2  ;;  %v2493_v62 = vmul.f32 %v6031_v3, %v2464_v48  ;;  %v6213_v48 = vld [vmem:[%s6385_s8] sm:$0xff] }
 0x662   : > { %2587 = vmatmul.mubr.f32.vlgmr.msra.gmra.mrb[8].mxu0 %v2498_v7 }
 0x663   : > { %3659 = vmatpush1.bf16.msra.mxu0 %v3658_v55  ;;  %3725 = vmatprep.subr.bf16.mxu1 %v3724_v43 }
 0x664   : > { %3727 = vmatpush1.bf16.msra.mxu1 %v3726_v31  ;;  %2592 = vmatprep.mubr.f32.mxu0 %v2502_v52 }
 0x665   : > { %v2441_v60 = vpop.permute.xlu1 %2440  ;;  %3729 = vmatprep.subr.bf16.mxu1 %v3728_v56 }
 0x666   : > { %v2457_v30 = vsel %vm1000_vm7, %v2433_v53, %v2441_v60  ;;  %2593 = vmatmul.mubr.f32.gmra.mrb[10].mxu0 %v2501_v26 }
 0x667   : > { %v2495_v5 = vmul.f32 %v5988_v29, %v2457_v30  ;;  %2765 = vmatmul.mubr.f32.vlgmr.msra.gmra.mrb[8].mxu1 %v2498_v7  ;;  %2598 = vmatprep.mubr.f32.mxu0 %v2505_v58 }
 0x668   : > { %3731 = vmatpush1.bf16.msra.mxu1 %v3730_v9  ;;  %2770 = vmatprep.mubr.f32.mxu1 %v2502_v52 }
 0x669   : > { %v2425_v47 = vpop.permute.xlu1 %2424  ;;  %v3660_v50 = vpack.c.bf16 %v2495_v5, %v2491_v23 }
 0x66a   : > { %v2461_v29 = vsel %vm1000_vm7, %v2425_v47, %v2433_v53  ;;  %2599 = vmatmul.mubr.f32.gmra.mrb[12].mxu0 %v2504_v45 }
 0x66b   : > { %v2494_v14 = vmul.f32 %v6001_v16, %v2461_v29  ;;  %3661 = vmatprep.subr.bf16.mxu0 %v3660_v50  ;;  %2771 = vmatmul.mubr.f32.gmra.mrb[10].mxu1 %v2501_v26 }
 0x66c   : > { %2604 = vmatprep.mubr.f32.mxu0 %v2508_v22  ;;  %2776 = vmatprep.mubr.f32.mxu1 %v2505_v58 }
 0x66d   : > { %v3662_v37 = vpack.c.bf16 %v2494_v14, %v2490_v54  ;;  %v2449_v6 = vpop.permute.xlu1 %2448 }
 0x66e   : > { %v2453_v28 = vsel %vm1000_vm7, %v2441_v60, %v2449_v6  ;;  %v2465_v16 = vsel %vm1000_vm7, %v2449_v6, %v2425_v47  ;;  %2605 = vmatmul.mubr.f32.gmra.mrb[14].mxu0 %v2507_v8 }
 0x66f   : > { %v2496_v35 = vmul.f32 %v3426_v41, %v2453_v28  ;;  %v2497_v38 = vmul.f32 %v6031_v3, %v2465_v16  ;;  %3663 = vmatpush1.bf16.msra.mxu0 %v3662_v37  ;;  %2777 = vmatmul.mubr.f32.gmra.mrb[12].mxu1 %v2504_v45  ;;  %v2914_v37 = vmul.f32 256.0, %v6213_v48  ;;  %v2934_v28 = vmul.f32 %v6213_v48, %v6213_v48 }
 0x670   : > { %2675 = vmatprep.mubr.f32.mxu0 %v6548_v63  ;;  %2782 = vmatprep.mubr.f32.mxu1 %v2508_v22 }
 0x671   : > { %v3734_v40 = vpack.c.bf16 %v2496_v35, %v2492_v1  ;;  %v3732_v44 = vpack.c.bf16 %v2497_v38, %v2493_v62  ;;  %v2922_v1 = vmul.f32 2.0, %v6213_v48  ;;  %v2938_v38 = vmul.f32 256.0, %v2934_v28 }
 0x672   : > { %3428 = vmatmul.mubr.msk.f32.vlgmr.msra.gmra.mrb[8].mxu0 %vm1061_vm8, %v2500_v57 }
 0x673   : > { %2783 = vmatmul.mubr.f32.gmra.mrb[14].mxu1 %v2507_v8  ;;  %3733 = vmatprep.subr.bf16.mxu1 %v3732_v44 }
 0x674   : > { %3735 = vmatpush1.bf16.msra.mxu1 %v3734_v40  ;;  %2681 = vmatprep.mubr.f32.mxu0 %v6548_v63 }
 0x675   : > { %2853 = vmatprep.mubr.f32.mxu1 %v6548_v63 }
 0x676   : > { %3429 = vmatmul.mubr.msk.f32.gmra.mrb[10].mxu0 %vm1061_vm8, %v2503_v18 }
 0x677   : > { %3432 = vmatmul.mubr.msk.f32.vlgmr.msra.gmra.mrb[8].mxu1 %vm1061_vm8, %v2500_v57  ;;  %2687 = vmatprep.mubr.f32.mxu0 %v6548_v63  ;;  %v6222_v57 = vld [vmem:[%s6385_s8 + $0x8] sm:$0xff] }
 0x678   : > { %2859 = vmatprep.mubr.f32.mxu1 %v6548_v63 }
 0x67a   : > { %3430 = vmatmul.mubr.msk.f32.gmra.mrb[12].mxu0 %vm1061_vm8, %v2506_v10 }
 0x67b   : > { %3433 = vmatmul.mubr.msk.f32.gmra.mrb[10].mxu1 %vm1061_vm8, %v2503_v18  ;;  %2693 = vmatprep.mubr.f32.mxu0 %v6548_v63 }
 0x67c   : > { %2865 = vmatprep.mubr.f32.mxu1 %v6548_v63 }
 0x67e   : > { %3431 = vmatmul.mubr.msk.f32.gmra.mrb[14].mxu0 %vm1061_vm8, %v2509_v12 }
 0x67f   : > { %3434 = vmatmul.mubr.msk.f32.gmra.mrb[12].mxu1 %vm1061_vm8, %v2506_v10 }
 0x680   : > { %2871 = vmatprep.mubr.f32.mxu1 %v6548_v63 }
 0x683   : > { %3435 = vmatmul.mubr.msk.f32.gmra.mrb[14].mxu1 %vm1061_vm8, %v2509_v12  ;;  %v3143_v12 = vmul.f32 256.0, %v6222_v57 }
 0x745   : > { %v6130_v15 = vpop.f32.mrb[8].mxu0 }
 0x746   : > { %v2894_v3 = vmul.f32 %v6130_v15, %v6130_v15  ;;  %v6134_v33 = vpop.f32.mrb[9].mxu0 }
 0x747   : > { %v2882_v32 = vadd.f32 %v6134_v33, %v6130_v15  ;;  %v2895_v34 = vmul.f32 %v6134_v33, %v6134_v33 }
 0x749   : > { %2883 = vadd.xlane.f32.xlu0 %v2882_v32  ;;  %v6140_v27 = vpop.f32.mrb[10].mxu0  ;;  %v2902_v20 = vadd.f32 %v2895_v34, %v2894_v3 }
 0x74a   : > { %v2896_v4 = vmul.f32 %v6140_v27, %v6140_v27  ;;  %v6144_v59 = vpop.f32.mrb[11].mxu0  ;;  %v6146_v42 = vpop.f32.mrb[8].mxu1 }
 0x74b   : > { %v2885_v24 = vadd.f32 %v6144_v59, %v6140_v27  ;;  %v2897_v51 = vmul.f32 %v6144_v59, %v6144_v59  ;;  %v3122_v13 = vmul.f32 %v6146_v42, %v6146_v42  ;;  %v6154_v2 = vpop.f32.mrb[9].mxu1 }
 0x74c   : > { %v3110_v21 = vadd.f32 %v6154_v2, %v6146_v42  ;;  %v3123_v49 = vmul.f32 %v6154_v2, %v6154_v2 }
 0x74d   : > { %v6160_v7 = vpop.f32.mrb[12].mxu0  ;;  %v2905_v36 = vadd.f32 %v2897_v51, %v2896_v4  ;;  %v2935_v51 = vmul.f32 %v6222_v57, %v6222_v57 }
 0x74e   : > { %v2898_v41 = vmul.f32 %v6160_v7, %v6160_v7  ;;  %v6164_v11 = vpop.f32.mrb[13].mxu0  ;;  %3111 = vadd.xlane.f32.xlu1 %v3110_v21  ;;  %v6166_v55 = vpop.f32.mrb[10].mxu1  ;;  %v3130_v31 = vadd.f32 %v3123_v49, %v3122_v13 }
 0x74f   : > { %v2888_v53 = vadd.f32 %v6164_v11, %v6160_v7  ;;  %v2899_v43 = vmul.f32 %v6164_v11, %v6164_v11  ;;  %v3124_v52 = vmul.f32 %v6166_v55, %v6166_v55  ;;  %v6174_v46 = vpop.f32.mrb[11].mxu1 }
 0x750   : > { %v3113_v39 = vadd.f32 %v6174_v46, %v6166_v55  ;;  %v3125_v56 = vmul.f32 %v6174_v46, %v6174_v46 }
 0x751   : > { %v6180_v26 = vpop.f32.mrb[14].mxu0  ;;  %v2908_v0 = vadd.f32 %v2899_v43, %v2898_v41 }
 0x752   : > { %v2900_v61 = vmul.f32 %v6180_v26, %v6180_v26  ;;  %v6184_v58 = vpop.f32.mrb[15].mxu0  ;;  %2903 = vadd.xlane.f32.xlu1 %v2902_v20  ;;  %3114 = vadd.xlane.f32.xlu0 %v3113_v39  ;;  %v6186_v60 = vpop.f32.mrb[12].mxu1  ;;  %v3133_v9 = vadd.f32 %v3125_v56, %v3124_v52  ;;  %v3151_v20 = vmul.f32 2.0, %v6222_v57  ;;  %v2939_v39 = vmul.f32 256.0, %v2935_v51 }
 0x753   : > { %v2891_v30 = vadd.f32 %v6184_v58, %v6180_v26  ;;  %v2901_v23 = vmul.f32 %v6184_v58, %v6184_v58  ;;  %v3126_v5 = vmul.f32 %v6186_v60, %v6186_v60  ;;  %v6194_v45 = vpop.f32.mrb[13].mxu1 }
 0x754   : > { %v3116_v17 = vadd.f32 %v6194_v45, %v6186_v60  ;;  %v3127_v25 = vmul.f32 %v6194_v45, %v6194_v45 }
 0x755   : > { %v2911_v47 = vadd.f32 %v2901_v23, %v2900_v61 }
 0x756   : > { %3131 = vadd.xlane.f32.xlu1 %v3130_v31  ;;  %2906 = vadd.xlane.f32.xlu0 %v2905_v36  ;;  %v6200_v50 = vpop.f32.mrb[14].mxu1  ;;  %v3136_v22 = vadd.f32 %v3127_v25, %v3126_v5  ;;  %v6237_v36 = vld [vmem:[%s6385_s8 + $0x10] sm:$0xff] }
 0x757   : > { %v3128_v29 = vmul.f32 %v6200_v50, %v6200_v50  ;;  %v6204_v54 = vpop.f32.mrb[15].mxu1  ;;  %v3144_v61 = vmul.f32 256.0, %v6237_v36 }
 0x758   : > { %v3119_v19 = vadd.f32 %v6204_v54, %v6200_v50  ;;  %v3129_v14 = vmul.f32 %v6204_v54, %v6204_v54 }
 0x75a   : > { %v3139_v8 = vadd.f32 %v3129_v14, %v3128_v29  ;;  %2886 = vadd.xlane.f32.xlu1 %v2885_v24  ;;  %3134 = vadd.xlane.f32.xlu0 %v3133_v9 }
 0x75e   : > { %2889 = vadd.xlane.f32.xlu0 %v2888_v53  ;;  %3117 = vadd.xlane.f32.xlu1 %v3116_v17 }
 0x762   : > { %2892 = vadd.xlane.f32.xlu0 %v2891_v30  ;;  %2909 = vadd.xlane.f32.xlu1 %v2908_v0 }
 0x766   : > { %3137 = vadd.xlane.f32.xlu1 %v3136_v22  ;;  %3120 = vadd.xlane.f32.xlu0 %v3119_v19  ;;  %v2936_v22 = vmul.f32 %v6237_v36, %v6237_v36 }
 0x76a   : > { %2912 = vadd.xlane.f32.xlu0 %v2911_v47  ;;  %v3152_v47 = vmul.f32 2.0, %v6237_v36 }
 0x76e   : > { %3140 = vadd.xlane.f32.xlu0 %v3139_v8 }
 0x7d6   : > { %v2884_v6 = vpop.xlane.xlu0 %2883 }
 0x7d7   : > { %v2918_v62 = vadd.f32 %v2914_v37, %v2884_v6  ;;  %v2926_v35 = vmul.f32 %v2922_v1, %v2884_v6 }
 0x7d9   : > { %v6224_v18 = vmul.f32 0.00390625, %v2918_v62  ;;  %v6252_v62 = vld [vmem:[%s6385_s8 + $0x18] sm:$0xff] }
 0x7db   : > { %v3112_v16 = vpop.xlane.xlu1 %3111  ;;  %v2954_v13 = vmul.f32 %v6224_v18, %v6224_v18 }
 0x7dc   : > { %v3146_v63 = vadd.f32 %v3112_v16, %v2914_v37  ;;  %v3154_v3 = vmul.f32 %v3112_v16, %v2922_v1 }
 0x7de   : > { %v6227_v34 = vmul.f32 0.00390625, %v3146_v63 }
 0x7df   : > { %v2904_v40 = vpop.xlane.xlu1 %2903  ;;  %v3115_v44 = vpop.xlane.xlu0 %3114 }
 0x7e0   : > { %v2930_v10 = vadd.f32 %v2926_v35, %v2904_v40  ;;  %v3147_v41 = vadd.f32 %v3143_v12, %v3115_v44  ;;  %v3182_v43 = vmul.f32 %v6227_v34, %v6227_v34  ;;  %v3155_v52 = vmul.f32 %v3151_v20, %v3115_v44 }
 0x7e1   : > { %v2940_v40 = vmul.f32 256.0, %v2936_v22 }
 0x7e2   : > { %v2942_v32 = vadd.f32 %v2938_v38, %v2930_v10  ;;  %v6242_v17 = vmul.f32 0.00390625, %v3147_v41 }
 0x7e3   : > { %v3132_v4 = vpop.xlane.xlu1 %3131  ;;  %v2907_v24 = vpop.xlane.xlu0 %2906 }
 0x7e4   : > { %v2950_v21 = vmul.f32 0.00390625, %v2942_v32  ;;  %v3158_v49 = vadd.f32 %v3154_v3, %v3132_v4  ;;  %v3183_v35 = vmul.f32 %v6242_v17, %v6242_v17 }
 0x7e6   : > { %v2958_v31 = vsub.f32 %v2950_v21, %v2954_v13  ;;  %v3170_v53 = vadd.f32 %v3158_v49, %v2938_v38 }
 0x7e7   : > { %v2887_v56 = vpop.xlane.xlu1 %2886  ;;  %v3135_v0 = vpop.xlane.xlu0 %3134 }
 0x7e8   : > { %v2962_v9 = vmax.f32 %v2958_v31, 0.0  ;;  %v3178_v30 = vmul.f32 0.00390625, %v3170_v53  ;;  %v2919_v23 = vadd.f32 %v3143_v12, %v2887_v56  ;;  %v2927_v5 = vmul.f32 %v3151_v20, %v2887_v56 }
 0x7e9   : > { %v3159_v25 = vadd.f32 %v3155_v52, %v3135_v0  ;;  %v2937_v31 = vmul.f32 %v6252_v62, %v6252_v62 }
 0x7ea   : > { %v2966_v29 = vadd.f32 1e-05, %v2962_v9  ;;  %v3186_v19 = vsub.f32 %v3178_v30, %v3182_v43  ;;  %v2931_v14 = vadd.f32 %v2927_v5, %v2907_v24  ;;  %v6247_v8 = vmul.f32 0.00390625, %v2919_v23 }
 0x7eb   : > { %v3171_v37 = vadd.f32 %v3159_v25, %v2939_v39  ;;  %v3118_v6 = vpop.xlane.xlu1 %3117  ;;  %v2890_v1 = vpop.xlane.xlu0 %2889  ;;  %v2917_v24 = vmul.f32 256.0, %v6252_v62 }
 0x7ec   : > { %3812 = vrsqrt.f32 %v2966_v29  ;;  %v3190_v28 = vmax.f32 %v3186_v19, 0.0  ;;  %v2943_v16 = vadd.f32 %v2939_v39, %v2931_v14  ;;  %v2920_v63 = vadd.f32 %v3144_v61, %v2890_v1 }
 0x7ed   : > { %v3179_v38 = vmul.f32 0.00390625, %v3171_v37  ;;  %v2955_v12 = vmul.f32 %v6247_v8, %v6247_v8  ;;  %v2928_v3 = vmul.f32 %v3152_v47, %v2890_v1  ;;  %v3148_v20 = vadd.f32 %v3144_v61, %v3118_v6 }
 0x7ee   : > { %v3194_v44 = vadd.f32 1e-05, %v3190_v28  ;;  %v2951_v10 = vmul.f32 0.00390625, %v2943_v16  ;;  %v6259_v21 = vmul.f32 0.00390625, %v2920_v63  ;;  %v3156_v43 = vmul.f32 %v3152_v47, %v3118_v6 }
 0x7ef   : > { %v3187_v32 = vsub.f32 %v3179_v38, %v3183_v35  ;;  %v2910_v4 = vpop.xlane.xlu1 %2909  ;;  %v2893_v51 = vpop.xlane.xlu0 %2892  ;;  %v2925_v39 = vmul.f32 2.0, %v6252_v62  ;;  %v6264_v0 = vmul.f32 0.00390625, %v3148_v20  ;;  %v2941_v29 = vmul.f32 256.0, %v2937_v31 }
 0x7f0   : > { %3814 = vrsqrt.f32 %v3194_v44  ;;  %v2959_v13 = vsub.f32 %v2951_v10, %v2955_v12  ;;  %v2932_v49 = vadd.f32 %v2928_v3, %v2910_v4  ;;  %v2921_v61 = vadd.f32 %v2917_v24, %v2893_v51 }
 0x7f1   : > { %v3191_v41 = vmax.f32 %v3187_v32, 0.0  ;;  %v2956_v5 = vmul.f32 %v6259_v21, %v6259_v21  ;;  %v2929_v14 = vmul.f32 %v2925_v39, %v2893_v51  ;;  %v3184_v16 = vmul.f32 %v6264_v0, %v6264_v0 }
 0x7f2   : > { %v2963_v53 = vmax.f32 %v2959_v13, 0.0  ;;  %v2944_v52 = vadd.f32 %v2940_v40, %v2932_v49  ;;  %v6268_v6 = vmul.f32 0.00390625, %v2921_v61 }
 0x7f3   : > { %v3195_v56 = vadd.f32 1e-05, %v3191_v41  ;;  %v3138_v9 = vpop.xlane.xlu1 %3137  ;;  %v3121_v30 = vpop.xlane.xlu0 %3120 }
 0x7f4   : > { %v2967_v23 = vadd.f32 1e-05, %v2963_v53  ;;  %v2952_v25 = vmul.f32 0.00390625, %v2944_v52  ;;  %v3160_v22 = vadd.f32 %v3156_v43, %v3138_v9  ;;  %v3149_v1 = vadd.f32 %v3121_v30, %v2917_v24 }
 0x7f5   : > { %3816 = vrsqrt.f32 %v3195_v56  ;;  %v3157_v3 = vmul.f32 %v3121_v30, %v2925_v39 }
 0x7f6   : > { %v3813_v19 = vpop.eup %3812  ;;  %3818 = vrsqrt.f32 %v2967_v23  ;;  %v2960_v47 = vsub.f32 %v2952_v25, %v2956_v5  ;;  %v3172_v37 = vadd.f32 %v3160_v22, %v2940_v40  ;;  %v2957_v40 = vmul.f32 %v6268_v6, %v6268_v6 }
 0x7f7   : > { %2978 = vrot.lane.b32.xlu1 %v3813_v19, %s3842_s20  ;;  %v2913_v28 = vpop.xlane.xlu0 %2912  ;;  %v6275_v20 = vmul.f32 0.00390625, %v3149_v1 }
 0x7f8   : > { %v2964_v35 = vmax.f32 %v2960_v47, 0.0  ;;  %v3180_v38 = vmul.f32 0.00390625, %v3172_v37  ;;  %v2933_v63 = vadd.f32 %v2929_v14, %v2913_v28 }
 0x7f9   : > { %v3185_v52 = vmul.f32 %v6275_v20, %v6275_v20 }
 0x7fa   : > { %v3815_v44 = vpop.eup %3814  ;;  %v2968_v10 = vadd.f32 1e-05, %v2964_v35  ;;  %v3188_v12 = vsub.f32 %v3180_v38, %v3184_v16  ;;  %v2945_v32 = vadd.f32 %v2941_v29, %v2933_v63 }
 0x7fb   : > { %3206 = vrot.lane.b32.xlu0 %v3815_v44, %s3842_s20  ;;  %v3141_v4 = vpop.xlane.xlu0 %3140 }
 0x7fc   : > { %3820 = vrsqrt.f32 %v2968_v10  ;;  %v3192_v24 = vmax.f32 %v3188_v12, 0.0  ;;  %v2953_v51 = vmul.f32 0.00390625, %v2945_v32  ;;  %v3161_v13 = vadd.f32 %v3157_v3, %v3141_v4 }
 0x7fd   : > { %v2994_v4 = vsub.f32 %v6213_v48, %v6224_v18  ;;  %v3223_v18 = vsub.f32 %v6222_v57, %v6242_v17  ;;  %v2997_v17 = vsub.f32 %v6252_v62, %v6268_v6 }
 0x7fe   : > { %v3196_v49 = vadd.f32 1e-05, %v3192_v24  ;;  %v2961_v41 = vsub.f32 %v2953_v51, %v2957_v40  ;;  %v3173_v31 = vadd.f32 %v3161_v13, %v2941_v29  ;;  %v3222_v13 = vsub.f32 %v6213_v48, %v6227_v34 }
 0x7ff   : > { %v3817_v53 = vpop.eup %3816 }
 0x800   : > { %v3819_v43 = vpop.eup %3818  ;;  %3822 = vrsqrt.f32 %v3196_v49  ;;  %v2965_v39 = vmax.f32 %v2961_v41, 0.0  ;;  %v3181_v56 = vmul.f32 0.00390625, %v3173_v31  ;;  %3208 = vrot.lane.b32.xlu1 %v3817_v53, %s3842_s20  ;;  %v2995_v31 = vsub.f32 %v6222_v57, %v6247_v8 }
 0x801   : > { %2980 = vrot.lane.b32.xlu0 %v3819_v43, %s3842_s20  ;;  %v3224_v8 = vsub.f32 %v6237_v36, %v6264_v0  ;;  %v6549_v0 = vmov 2  }
 0x802   : > { %v2969_v61 = vadd.f32 1e-05, %v2965_v39  ;;  %v3189_v9 = vsub.f32 %v3181_v56, %v3185_v52  ;;  %v2996_v56 = vsub.f32 %v6237_v36, %v6259_v21  ;;  %v3225_v21 = vsub.f32 %v6252_v62, %v6275_v20 }
 0x804   : > { %3824 = vrsqrt.f32 %v2969_v61  ;;  %v3193_v30 = vmax.f32 %v3189_v9, 0.0 }
 0x806   : > { %v3821_v23 = vpop.eup %3820  ;;  %v3197_v5 = vadd.f32 1e-05, %v3193_v30 }
 0x807   : > { %2982 = vrot.lane.b32.xlu1 %v3821_v23, %s3842_s20 }
 0x808   : > { %3826 = vrsqrt.f32 %v3197_v5 }
 0x80a   : > { %v3823_v25 = vpop.eup %3822 }
 0x80b   : > { %3210 = vrot.lane.b32.xlu0 %v3823_v25, %s3842_s20 }
 0x80e   : > { %v3825_v22 = vpop.eup %3824 }
 0x80f   : > { %2984 = vrot.lane.b32.xlu1 %v3825_v22, %s3842_s20 }
 0x812   : > { %v3827_v29 = vpop.eup %3826 }
 0x813   : > { %3212 = vrot.lane.b32.xlu1 %v3827_v29, %s3842_s20 }
 0x869   : > { %v2979_v19 = vpop.permute.xlu1 %2978 }
 0x86a   : > { %v2990_v47 = vmul.f32 %v2979_v19, %v6213_v48 }
 0x86c   : > { %3002 = vrot.lane.b32.xlu0 %v2990_v47, %s3843_s28 }
 0x86d   : > { %v3207_v14 = vpop.permute.xlu0 %3206 }
 0x86e   : > { %v3218_v37 = vmul.f32 %v3207_v14, %v6213_v48 }
 0x870   : > { %3230 = vrot.lane.b32.xlu0 %v3218_v37, %s3843_s28 }
 0x872   : > { %v3209_v16 = vpop.permute.xlu1 %3208 }
 0x873   : > { %v2981_v1 = vpop.permute.xlu0 %2980  ;;  %v3219_v35 = vmul.f32 %v3209_v16, %v6222_v57 }
 0x874   : > { %v2991_v28 = vmul.f32 %v6222_v57, %v2981_v1 }
 0x876   : > { %3004 = vrot.lane.b32.xlu1 %v2991_v28, %s3843_s28 }
 0x879   : > { %v2983_v38 = vpop.permute.xlu1 %2982 }
 0x87a   : > { %v2992_v63 = vmul.f32 %v6237_v36, %v2983_v38  ;;  %3232 = vrot.lane.b32.xlu1 %v3219_v35, %s3843_s28 }
 0x87c   : > { %3006 = vrot.lane.b32.xlu0 %v2992_v63, %s3843_s28 }
 0x87d   : > { %v3211_v44 = vpop.permute.xlu0 %3210 }
 0x87e   : > { %v3220_v10 = vmul.f32 %v3211_v44, %v6237_v36 }
 0x880   : > { %3234 = vrot.lane.b32.xlu0 %v3220_v10, %s3843_s28 }
 0x881   : > { %v2985_v12 = vpop.permute.xlu1 %2984 }
 0x882   : > { %v2993_v3 = vmul.f32 %v2985_v12, %v6252_v62 }
 0x884   : > { %3008 = vrot.lane.b32.xlu1 %v2993_v3, %s3843_s28 }
 0x885   : > { %v3213_v32 = vpop.permute.xlu1 %3212 }
 0x886   : > { %v3221_v40 = vmul.f32 %v3213_v32, %v6252_v62 }
 0x888   : > { %3236 = vrot.lane.b32.xlu1 %v3221_v40, %s3843_s28 }
 0x8de   : > { %v3003_v24 = vpop.permute.xlu0 %3002 }
 0x8df   : > { %v3014_v51 = vmul.f32 %v3003_v24, %v2994_v4 }
 0x8e1   : > { %3022 = vrot.lane.b32.xlu0 %v3014_v51, %s3850_s27 }
 0x8e2   : > { %v3231_v49 = vpop.permute.xlu0 %3230 }
 0x8e3   : > { %v3242_v41 = vmul.f32 %v3231_v49, %v3222_v13 }
 0x8e5   : > { %3250 = vrot.lane.b32.xlu0 %v3242_v41, %s3850_s27 }
 0x8e8   : > { %v3005_v53 = vpop.permute.xlu1 %3004 }
 0x8e9   : > { %v3015_v43 = vmul.f32 %v3005_v53, %v2995_v31 }
 0x8eb   : > { %3024 = vrot.lane.b32.xlu1 %v3015_v43, %s3850_s27 }
 0x8ec   : > { %v3233_v52 = vpop.permute.xlu1 %3232 }
 0x8ed   : > { %v3243_v39 = vmul.f32 %v3233_v52, %v3223_v18 }
 0x8ee   : > { %v3007_v34 = vpop.permute.xlu0 %3006 }
 0x8ef   : > { %v3016_v61 = vmul.f32 %v3007_v34, %v2996_v56  ;;  %3252 = vrot.lane.b32.xlu1 %v3243_v39, %s3850_s27 }
 0x8f1   : > { %3026 = vrot.lane.b32.xlu0 %v3016_v61, %s3850_s27 }
 0x8f2   : > { %v3235_v9 = vpop.permute.xlu0 %3234 }
 0x8f3   : > { %v3244_v30 = vmul.f32 %v3235_v9, %v3224_v8 }
 0x8f5   : > { %3254 = vrot.lane.b32.xlu0 %v3244_v30, %s3850_s27 }
 0x8f6   : > { %v3009_v23 = vpop.permute.xlu1 %3008 }
 0x8f7   : > { %v3017_v5 = vmul.f32 %v3009_v23, %v2997_v17 }
 0x8f9   : > { %3028 = vrot.lane.b32.xlu1 %v3017_v5, %s3850_s27  ;;  %3039 = vperm.xlu0 %3792, %v2990_v47  }
 0x8fa   : > { %v3237_v25 = vpop.permute.xlu1 %3236 }
 0x8fb   : > { %v3245_v22 = vmul.f32 %v3237_v25, %v3225_v21 }
 0x8fd   : > { %3256 = vrot.lane.b32.xlu1 %v3245_v22, %s3850_s27  ;;  %3051 = vperm.xlu0 %3792, %v2993_v3   ;;  %s6343_s27 = scalar_lea.vmem %s6386_s10, %s3446_s5 }
 0x901   : > { %3043 = vperm.xlu1 %3793, %v2991_v28   ;;  %3267 = vperm.xlu0 %3792, %v3218_v37  }
 0x905   : > { %3047 = vperm.xlu1 %3793, %v2992_v63   ;;  %3279 = vperm.xlu0 %3792, %v3221_v40  }
 0x909   : > { %3271 = vperm.xlu1 %3793, %v3219_v35   ;;  %3795 = vset.pattern.permute.xlu0 %v6549_v0 }
 0x90d   : > { %3275 = vperm.xlu1 %3793, %v3220_v10  }
 0x911   : > { %3794 = vset.pattern.permute.xlu1 %v6549_v0 }
 0x953   : > { %v3023_v6 = vpop.permute.xlu0 %3022 }
 0x954   : > { %v3034_v29 = vadd.f32 %v3023_v6, %v6213_v48 }
 0x956   : > { %3064 = vperm.xlu1 %3794, %v3034_v29  }
 0x957   : > { %v3251_v20 = vpop.permute.xlu0 %3250 }
 0x958   : > { %v3262_v19 = vadd.f32 %v3251_v20, %v6213_v48 }
 0x95a   : > { %3292 = vperm.xlu1 %3794, %v3262_v19  }
 0x95d   : > { %v3025_v47 = vpop.permute.xlu1 %3024 }
 0x95e   : > { %v3035_v14 = vadd.f32 %v6222_v57, %v3025_v47 }
 0x960   : > { %3069 = vperm.xlu0 %3795, %v3035_v14  }
 0x961   : > { %v3253_v37 = vpop.permute.xlu1 %3252 }
 0x962   : > { %v3263_v1 = vadd.f32 %v3253_v37, %v6222_v57 }
 0x963   : > { %v3027_v28 = vpop.permute.xlu0 %3026 }
 0x964   : > { %v3036_v16 = vadd.f32 %v6237_v36, %v3027_v28  ;;  %3297 = vperm.xlu0 %3795, %v3263_v1  }
 0x966   : > { %3074 = vperm.xlu1 %3794, %v3036_v16  }
 0x967   : > { %v3255_v35 = vpop.permute.xlu0 %3254 }
 0x968   : > { %v3264_v38 = vadd.f32 %v3255_v35, %v6237_v36 }
 0x96a   : > { %3302 = vperm.xlu1 %3794, %v3264_v38  }
 0x96b   : > { %v3029_v63 = vpop.permute.xlu1 %3028 }
 0x96c   : > { %v3037_v48 = vadd.f32 %v3029_v63, %v6252_v62 }
 0x96e   : > { %3079 = vperm.xlu1 %3794, %v3037_v48  }
 0x96f   : > { %v3257_v44 = vpop.permute.xlu1 %3256 }
 0x970   : > { %v3265_v10 = vadd.f32 %v3257_v44, %v6252_v62 }
 0x972   : > { %3307 = vperm.xlu1 %3794, %v3265_v10  }
 0x978   : > { %v3040_v3 = vpop.permute.xlu0 %3039 }
 0x979   : > { %v3054_v24 = vmul.f32 %v3040_v3, %v6130_v15  ;;  %v3055_v36 = vmul.f32 %v3040_v3, %v6134_v33 }
 0x97c   : > { %v3052_v40 = vpop.permute.xlu0 %3051 }
 0x97d   : > { %v3060_v37 = vmul.f32 %v3052_v40, %v6180_v26  ;;  %v3061_v1 = vmul.f32 %v3052_v40, %v6184_v58 }
 0x980   : > { %v3044_v12 = vpop.permute.xlu1 %3043  ;;  %v3268_v51 = vpop.permute.xlu0 %3267 }
 0x981   : > { %v3282_v62 = vmul.f32 %v3268_v51, %v6146_v42  ;;  %v3283_v15 = vmul.f32 %v3268_v51, %v6154_v2  ;;  %v3056_v34 = vmul.f32 %v3044_v12, %v6140_v27  ;;  %v3057_v61 = vmul.f32 %v3044_v12, %v6144_v59 }
 0x984   : > { %v3048_v57 = vpop.permute.xlu1 %3047  ;;  %v3280_v52 = vpop.permute.xlu0 %3279 }
 0x985   : > { %v3058_v21 = vmul.f32 %v3048_v57, %v6160_v7  ;;  %v3059_v27 = vmul.f32 %v3048_v57, %v6164_v11  ;;  %v3288_v38 = vmul.f32 %v3280_v52, %v6200_v50  ;;  %v3289_v63 = vmul.f32 %v3280_v52, %v6204_v54 }
 0x988   : > { %v3272_v32 = vpop.permute.xlu1 %3271 }
 0x989   : > { %v3284_v9 = vmul.f32 %v3272_v32, %v6166_v55  ;;  %v3285_v30 = vmul.f32 %v3272_v32, %v6174_v46 }
 0x98c   : > { %v3276_v4 = vpop.permute.xlu1 %3275 }
 0x98d   : > { %v3286_v29 = vmul.f32 %v3276_v4, %v6186_v60  ;;  %v3287_v20 = vmul.f32 %v3276_v4, %v6194_v45 }
 0x9d5   : > { %v3065_v13 = vpop.permute.xlu1 %3064 }
 0x9d6   : > { %v3082_v49 = vadd.f32 %v3065_v13, %v3054_v24  ;;  %v3083_v41 = vadd.f32 %v3065_v13, %v3055_v36 }
 0x9d8   : > { %v3090_v31 = vmax.f32 %v3082_v49, 0.0  ;;  %v3091_v33 = vmax.f32 %v3083_v41, 0.0 }
 0x9d9   : > { %v3293_v53 = vpop.permute.xlu1 %3292 }
 0x9da   : > { %3098 = vst [vmem:[%s6343_s27] sm:$0xff] %v3090_v31  ;;  %3099 = vst [vmem:[%s6343_s27 + $0x8] sm:$0xff] %v3091_v33  ;;  %v3310_v43 = vadd.f32 %v3293_v53, %v3282_v62  ;;  %v3311_v18 = vadd.f32 %v3293_v53, %v3283_v15 }
 0x9dc   : > { %v3318_v39 = vmax.f32 %v3310_v43, 0.0  ;;  %v3319_v56 = vmax.f32 %v3311_v18, 0.0 }
 0x9de   : > { %3436 = vst [vmem:[%s6343_s27 + $0x40] sm:$0xff] %v3318_v39  ;;  %3437 = vst [vmem:[%s6343_s27 + $0x48] sm:$0xff] %v3319_v56 }
 0x9df   : > { %v3070_v42 = vpop.permute.xlu0 %3069 }
 0x9e0   : > { %v3084_v2 = vadd.f32 %v3070_v42, %v3056_v34  ;;  %v3085_v8 = vadd.f32 %v3070_v42, %v3057_v61 }
 0x9e2   : > { %v3092_v17 = vmax.f32 %v3084_v2, 0.0  ;;  %v3093_v23 = vmax.f32 %v3085_v8, 0.0 }
 0x9e3   : > { %v3298_v5 = vpop.permute.xlu0 %3297 }
 0x9e4   : > { %3100 = vst [vmem:[%s6343_s27 + $0x10] sm:$0xff] %v3092_v17  ;;  %3101 = vst [vmem:[%s6343_s27 + $0x18] sm:$0xff] %v3093_v23  ;;  %v3312_v59 = vadd.f32 %v3298_v5, %v3284_v9  ;;  %v3313_v25 = vadd.f32 %v3298_v5, %v3285_v30 }
 0x9e5   : > { %v3075_v22 = vpop.permute.xlu1 %3074 }
 0x9e6   : > { %v3320_v0 = vmax.f32 %v3312_v59, 0.0  ;;  %v3321_v55 = vmax.f32 %v3313_v25, 0.0  ;;  %v3086_v6 = vadd.f32 %v3075_v22, %v3058_v21  ;;  %v3087_v46 = vadd.f32 %v3075_v22, %v3059_v27 }
 0x9e8   : > { %3438 = vst [vmem:[%s6343_s27 + $0x50] sm:$0xff] %v3320_v0  ;;  %3439 = vst [vmem:[%s6343_s27 + $0x58] sm:$0xff] %v3321_v55  ;;  %v3094_v7 = vmax.f32 %v3086_v6, 0.0  ;;  %v3095_v11 = vmax.f32 %v3087_v46, 0.0 }
 0x9e9   : > { %v3303_v19 = vpop.permute.xlu1 %3302 }
 0x9ea   : > { %3102 = vst [vmem:[%s6343_s27 + $0x20] sm:$0xff] %v3094_v7  ;;  %3103 = vst [vmem:[%s6343_s27 + $0x28] sm:$0xff] %v3095_v11  ;;  %v3314_v47 = vadd.f32 %v3303_v19, %v3286_v29  ;;  %v3315_v14 = vadd.f32 %v3303_v19, %v3287_v20 }
 0x9ec   : > { %v3322_v60 = vmax.f32 %v3314_v47, 0.0  ;;  %v3323_v28 = vmax.f32 %v3315_v14, 0.0 }
 0x9ed   : > { %v3080_v16 = vpop.permute.xlu1 %3079 }
 0x9ee   : > { %3440 = vst [vmem:[%s6343_s27 + $0x60] sm:$0xff] %v3322_v60  ;;  %3441 = vst [vmem:[%s6343_s27 + $0x68] sm:$0xff] %v3323_v28  ;;  %v3088_v45 = vadd.f32 %v3080_v16, %v3060_v37  ;;  %v3089_v35 = vadd.f32 %v3080_v16, %v3061_v1 }
 0x9f0   : > { %v3096_v48 = vmax.f32 %v3088_v45, 0.0  ;;  %v3097_v44 = vmax.f32 %v3089_v35, 0.0 }
 0x9f1   : > { %v3308_v10 = vpop.permute.xlu1 %3307 }
 0x9f2   : > { %3104 = vst [vmem:[%s6343_s27 + $0x30] sm:$0xff] %v3096_v48  ;;  %3105 = vst [vmem:[%s6343_s27 + $0x38] sm:$0xff] %v3097_v44  ;;  %v3316_v26 = vadd.f32 %v3308_v10, %v3288_v38  ;;  %v3317_v58 = vadd.f32 %v3308_v10, %v3289_v63 }
 0x9f4   : > { %v3324_v12 = vmax.f32 %v3316_v26, 0.0  ;;  %v3325_v57 = vmax.f32 %v3317_v58, 0.0 }
 0x9f6   : > { %3442 = vst [vmem:[%s6343_s27 + $0x70] sm:$0xff] %v3324_v12  ;;  %3443 = vst [vmem:[%s6343_s27 + $0x78] sm:$0xff] %v3325_v57 }
 0x9f7 PF: > { %s26_s12 = sadd.s32 1, %s3837_s12  }
 0x9f8   : > { %p23_p4 = scmp.ge.s32.totalorder %s26_s12, 4  }
 0x9fa   :  { %25 = sbr.rel (!%p23_p4) target bundleno = 1 (0x1), region = 92 }

</bundles_post_ra>
